<compile_context>
chip_gen: v7x
topology: tpu7x:2x2x1
jax: 0.10.0
libtpu: 0.0.40
codegen_flags: <defaults>
</compile_context>

<pallas_src>
import functools

import jax
import jax.numpy as jnp
from jax import lax
from jax.experimental import pallas as pl
from jax.experimental.pallas import tpu as pltpu

EPS = 1e-5
LANES = 128


def _round_up(x, m):
    return (x + m - 1) // m * m


# ---------------------------------------------------------------------------
# Kernels
# ---------------------------------------------------------------------------
def _conv_pair_kernel(x_ref, w_ref, y1_ref, ytr_ref, st_ref, acc, *, th, tw, cout):
    """conv1 and shortcut conv fused as one wide matmul per 3x3 tap.

    x_ref : (1, th+2, tw+2, Cin_p) bf16 halo tile
    w_ref : (9, Cin_p, 2*Cout_p)   bf16, taps major, [conv1 | tr_conv] on lanes
    Emits per-tile per-channel sum / sum-of-squares of both raw conv outputs
    (fused with the matmul pass) for the two-pass BatchNorm.
    """
    cin = x_ref.shape[-1]
    acc[...] = jnp.zeros_like(acc)
    for dy in range(3):
        for dx in range(3):
            p = x_ref[0, dy:dy + th, dx:dx + tw, :].reshape(th * tw, cin)
            acc[...] += jnp.dot(p, w_ref[dy * 3 + dx],
                                preferred_element_type=jnp.float32)
    yy = acc[...]                                       # (th*tw, 2*Cout_p) f32
    y1_ref[...] = yy[:, :cout].reshape(1, th, tw, cout).astype(y1_ref.dtype)
    ytr_ref[...] = yy[:, cout:].reshape(1, th, tw, cout).astype(ytr_ref.dtype)
    s = jnp.sum(yy, axis=0, keepdims=True)
    sq = jnp.sum(yy * yy, axis=0, keepdims=True)
    st_ref[...] = jnp.concatenate(
        [s, sq, jnp.zeros((6, yy.shape[-1]), jnp.float32)], axis=0
    ).reshape(1, 8, -1)


def _conv_single_kernel(h_ref, w_ref, y_ref, st_ref, acc, *, th, tw):
    """3x3 conv2 on one halo tile + per-tile channel sum / sum-of-squares."""
    cin = h_ref.shape[-1]
    cout = acc.shape[-1]
    acc[...] = jnp.zeros_like(acc)
    for dy in range(3):
        for dx in range(3):
            p = h_ref[0, dy:dy + th, dx:dx + tw, :].reshape(th * tw, cin)
            acc[...] += jnp.dot(p, w_ref[dy * 3 + dx],
                                preferred_element_type=jnp.float32)
    y = acc[...]
    y_ref[...] = y.reshape(1, th, tw, cout).astype(y_ref.dtype)
    s = jnp.sum(y, axis=0, keepdims=True)
    sq = jnp.sum(y * y, axis=0, keepdims=True)
    st_ref[...] = jnp.concatenate(
        [s, sq, jnp.zeros((6, cout), jnp.float32)], axis=0
    ).reshape(1, 8, cout)


def _epilogue_kernel(y2_ref, ytr_ref, af_ref, o_ref):
    """out = relu(a2*y2 + a_tr*y_tr + b), per-channel affines precomputed."""
    y2 = y2_ref[...].astype(jnp.float32)
    ytr = ytr_ref[...].astype(jnp.float32)
    a2 = af_ref[0, 0:1, :].reshape(1, 1, 1, -1)
    atr = af_ref[0, 1:2, :].reshape(1, 1, 1, -1)
    b = af_ref[0, 2:3, :].reshape(1, 1, 1, -1)
    o_ref[...] = jnp.maximum(y2 * a2 + ytr * atr + b, 0.0)


# ---------------------------------------------------------------------------
# pallas_call wrappers (tiled over row-tiles, pipelined, megacore-parallel)
# ---------------------------------------------------------------------------
_PARAMS = pltpu.CompilerParams(dimension_semantics=("parallel",))


def _conv_pair(x_tiles, w_cat, th, tw, cout_p):
    t, thh, twp, cin_p = x_tiles.shape
    c2 = 2 * cout_p
    out_tile = pl.BlockSpec((1, th, tw, cout_p), lambda i: (i, 0, 0, 0))
    return pl.pallas_call(
        functools.partial(_conv_pair_kernel, th=th, tw=tw, cout=cout_p),
        grid=(t,),
        in_specs=[pl.BlockSpec((1, thh, twp, cin_p), lambda i: (i, 0, 0, 0)),
                  pl.BlockSpec(w_cat.shape, lambda i: (0, 0, 0))],
        out_specs=[out_tile, out_tile,
                   pl.BlockSpec((1, 8, c2), lambda i: (i, 0, 0))],
        out_shape=[jax.ShapeDtypeStruct((t, th, tw, cout_p), jnp.bfloat16),
                   jax.ShapeDtypeStruct((t, th, tw, cout_p), jnp.bfloat16),
                   jax.ShapeDtypeStruct((t, 8, c2), jnp.float32)],
        scratch_shapes=[pltpu.VMEM((th * tw, c2), jnp.float32)],
        compiler_params=_PARAMS,
    )(x_tiles, w_cat)


def _conv_single(h_tiles, w2, th, tw, cout_p):
    t, thh, twp, cin_p = h_tiles.shape
    return pl.pallas_call(
        functools.partial(_conv_single_kernel, th=th, tw=tw),
        grid=(t,),
        in_specs=[pl.BlockSpec((1, thh, twp, cin_p), lambda i: (i, 0, 0, 0)),
                  pl.BlockSpec(w2.shape, lambda i: (0, 0, 0))],
        out_specs=[pl.BlockSpec((1, th, tw, cout_p), lambda i: (i, 0, 0, 0)),
                   pl.BlockSpec((1, 8, cout_p), lambda i: (i, 0, 0))],
        out_shape=[jax.ShapeDtypeStruct((t, th, tw, cout_p), jnp.bfloat16),
                   jax.ShapeDtypeStruct((t, 8, cout_p), jnp.float32)],
        scratch_shapes=[pltpu.VMEM((th * tw, cout_p), jnp.float32)],
        compiler_params=_PARAMS,
    )(h_tiles, w2)


def _epilogue(y2_t, ytr_t, af):
    t, th, tw, cp = y2_t.shape
    tile = pl.BlockSpec((1, th, tw, cp), lambda i: (i, 0, 0, 0))
    return pl.pallas_call(
        _epilogue_kernel,
        grid=(t,),
        in_specs=[tile, tile, pl.BlockSpec((1, 8, cp), lambda i: (0, 0, 0))],
        out_specs=tile,
        out_shape=jax.ShapeDtypeStruct((t, th, tw, cp), jnp.float32),
        compiler_params=_PARAMS,
    )(y2_t, ytr_t, af)


# ---------------------------------------------------------------------------
# JAX glue (layout, halo tiling, O(C) BN finalization)
# ---------------------------------------------------------------------------
def _halo_tiles(x_nhwc, th, cp):
    """Zero-pad H/W by 1, pad channels to cp, cut overlapping (th+2)-row tiles."""
    n, h, w, c = x_nhwc.shape
    nh = h // th
    xp = jnp.pad(x_nhwc, ((0, 0), (1, 1), (1, 1), (0, cp - c)))
    tiles = jnp.stack([xp[:, t * th:t * th + th + 2] for t in range(nh)], axis=1)
    return tiles.reshape(n * nh, th + 2, w + 2, cp).astype(jnp.bfloat16)


def _conv_weight(w_oihw, cin_p, cout_p):
    """PyTorch OIHW conv weight -> (9, Cin_p, Cout_p) bf16 (tap-major)."""
    co, ci, kh, kw = w_oihw.shape
    w = jnp.transpose(w_oihw, (2, 3, 1, 0)).reshape(kh * kw, ci, co)
    w = jnp.pad(w, ((0, 0), (0, cin_p - ci), (0, cout_p - co)))
    return w.astype(jnp.bfloat16)


def _bn_scale_shift(s, sq, count, gamma, beta, cp):
    """Fold global batch stats + affine into per-channel scale/shift (f32)."""
    mean = s / count
    var = jnp.maximum(sq / count - mean * mean, 0.0)
    inv = lax.rsqrt(var + EPS)
    g = jnp.pad(gamma.reshape(-1), (0, cp - gamma.size))
    b = jnp.pad(beta.reshape(-1), (0, cp - beta.size))
    scale = g * inv
    shift = b - mean * scale
    return scale, shift


def resblock_forward(x_nchw, params):
    n, cin, h, w = x_nchw.shape
    cout = params["w1"].shape[0]
    cin_p = _round_up(cin, LANES)
    cout_p = _round_up(cout, LANES)
    th = 8 if h % 8 == 0 else h          # row-tile height (M tile = th*w rows)
    nh = h // th
    count = n * h * w

    x_nhwc = jnp.transpose(x_nchw, (0, 2, 3, 1)).astype(jnp.float32)
    x_tiles = _halo_tiles(x_nhwc, th, cin_p)            # (T, th+2, w+2, Cin_p)

    w1 = _conv_weight(params["w1"], cin_p, cout_p)
    wtr = _conv_weight(params["wtr"], cin_p, cout_p)
    w_cat = jnp.concatenate([w1, wtr], axis=-1)         # (9, Cin_p, 2*Cout_p)
    w2 = _conv_weight(params["w2"], cout_p, cout_p)

    # pass 1: conv1 + shortcut conv (fused wide matmul) + per-tile channel stats
    y1_t, ytr_t, st_a = _conv_pair(x_tiles, w_cat, th, w, cout_p)
    sa = jnp.sum(st_a, axis=0)                           # (8, 2*Cout_p)
    sc1, sh1 = _bn_scale_shift(sa[0, :cout_p], sa[1, :cout_p], count,
                               params["g1"], params["b1"], cout_p)
    sctr, shtr = _bn_scale_shift(sa[0, cout_p:], sa[1, cout_p:], count,
                                 params["gtr"], params["btr"], cout_p)

    # BN1 + ReLU fused into the halo re-tile feeding conv2 (one XLA fusion, so
    # the zero padding of h1 is exact like the PyTorch conv padding).
    y1 = y1_t.reshape(n, nh, th, w, cout_p).reshape(n, h, w, cout_p)
    h1 = jnp.maximum(y1.astype(jnp.float32) * sc1 + sh1, 0.0)
    h1_tiles = _halo_tiles(h1, th, cout_p)               # (T, th+2, w+2, Cout_p)

    # pass 2: conv2 + per-tile channel stats
    y2_t, st_b = _conv_single(h1_tiles, w2, th, w, cout_p)
    sb = jnp.sum(st_b, axis=0)
    sc2, sh2 = _bn_scale_shift(sb[0], sb[1], count, params["g2"], params["b2"], cout_p)

    # pass 3: relu(a2*y2 + a_tr*y_tr + (b2 + b_tr))  -- stacked affine array
    af = jnp.concatenate([sc2.reshape(1, -1), sctr.reshape(1, -1),
                          (sh2 + shtr).reshape(1, -1),
                          jnp.zeros((5, cout_p), jnp.float32)],
                         axis=0).reshape(1, 8, cout_p)
    out_t = _epilogue(y2_t, ytr_t, af)

    out = out_t.reshape(n, nh, th, w, cout_p).reshape(n, h, w, cout_p)
    return jnp.transpose(out[..., :cout], (0, 3, 1, 2))  # back to NCHW


# ---------------------------------------------------------------------------
# Pure-JAX f32 reference (PyTorch training-mode semantics) for correctness
# ---------------------------------------------------------------------------
def _conv_nchw(x, w):
    return lax.conv_general_dilated(x, w, window_strides=(1, 1),
                                    padding=((1, 1), (1, 1)),
                                    dimension_numbers=("NCHW", "OIHW", "NCHW"))


def _bn_nchw(y, g, b):
    mean = jnp.mean(y, axis=(0, 2, 3), keepdims=True)
    var = jnp.mean((y - mean) ** 2, axis=(0, 2, 3), keepdims=True)
    return (y - mean) * lax.rsqrt(var + EPS) * g.reshape(1, -1, 1, 1) + b.reshape(1, -1, 1, 1)


def resblock_reference(x, p):
    h = jnp.maximum(_bn_nchw(_conv_nchw(x, p["w1"]), p["g1"][0], p["b1"][0]), 0.0)
    h = _bn_nchw(_conv_nchw(h, p["w2"]), p["g2"][0], p["b2"][0])
    s = _bn_nchw(_conv_nchw(x, p["wtr"]), p["gtr"][0], p["btr"][0])
    return jnp.maximum(s + h, 0.0)


# ---------------------------------------------------------------------------
if __name__ == "__main__":
    key = jax.random.PRNGKey(0)
    ks = jax.random.split(key, 8)

    N, Cin, H, W = 2, 4, 16, 16
    Cout = Cin  # out_channels defaults to in_channels

    x = jax.random.normal(ks[0], (N, Cin, H, W), jnp.float32)

    # Deterministic synthetic parameters (PyTorch OIHW conv weights, BN affine).
    params = {
        "w1":  0.1 * jax.random.normal(ks[1], (Cout, Cin, 3, 3), jnp.float32),
        "w2":  0.1 * jax.random.normal(ks[2], (Cout, Cout, 3, 3), jnp.float32),
        "wtr": 0.1 * jax.random.normal(ks[3], (Cout, Cin, 3, 3), jnp.float32),
        "g1":  1.0 + 0.1 * jax.random.normal(ks[4], (1, Cout), jnp.float32),
        "b1":  0.1 * jax.random.normal(ks[5], (1, Cout), jnp.float32),
        "g2":  1.0 + 0.1 * jax.random.normal(ks[6], (1, Cout), jnp.float32),
        "b2":  jnp.zeros((1, Cout), jnp.float32),
        "gtr": jnp.ones((1, Cout), jnp.float32),
        "btr": 0.1 * jax.random.normal(ks[7], (1, Cout), jnp.float32),
    }
    # TODO(synk): original code calls an external `init_weights`; weights here are
    # synthetic deterministic values of the same shapes.

    out = jax.block_until_ready(jax.jit(resblock_forward)(x, params))
    ref = jax.block_until_ready(resblock_reference(x, params))

    assert out.shape == (N, Cout, H, W)
    # bf16 MXU operands vs. the f32 reference -> bf16-appropriate tolerance;
    # structural bugs would show up as O(1) errors.
    assert jnp.allclose(out, ref, atol=6e-2, rtol=6e-2), float(jnp.max(jnp.abs(out - ref)))
    print("KERNEL_OK")
</pallas_src>

<mosaic_0001>
module attributes {stable_mosaic.version = 11 : i64} {
  func.func @_conv_pair_kernel(%arg0: i32, %arg1: memref<1x10x18x128xbf16, #tpu.memory_space<vmem>>, %arg2: memref<9x128x256xbf16, #tpu.memory_space<vmem>>, %arg3: memref<1x8x16x128xbf16, #tpu.memory_space<vmem>>, %arg4: memref<1x8x16x128xbf16, #tpu.memory_space<vmem>>, %arg5: memref<1x8x256xf32, #tpu.memory_space<vmem>>, %arg6: memref<128x256xf32, #tpu.memory_space<vmem>>) attributes {dimension_semantics = [#tpu.dimension_semantics<parallel>], iteration_bounds = array<i64: 4>, scalar_prefetch = 0 : i64, scratch_operands = 1 : i64, tpu.core_type = #tpu.core_type<tc>, window_params = [{transform_indices = @transform_0, window_bounds = array<i64: 1, 10, 18, 128>}, {pipeline_mode = #tpu.pipeline_mode<synchronous>, transform_indices = @transform_1, window_bounds = array<i64: 9, 128, 256>}, {transform_indices = @transform_2, window_bounds = array<i64: 1, 8, 16, 128>}, {transform_indices = @transform_3, window_bounds = array<i64: 1, 8, 16, 128>}, {transform_indices = @transform_4, window_bounds = array<i64: 1, 8, 256>}]} {
    %cst = arith.constant 0.000000e+00 : f32
    %0 = vector.broadcast %cst : f32 to vector<128x256xf32>
    %c0 = arith.constant 0 : index
    %c0_0 = arith.constant 0 : index
    %1 = vector.load %arg6[%c0, %c0_0] : memref<128x256xf32, #tpu.memory_space<vmem>>, vector<128x256xf32>
    tpu.vector_store %arg6[%c0, %c0_0], %0 {strides = array<i32>} : memref<128x256xf32, #tpu.memory_space<vmem>>, vector<128x256xf32>,
    %c0_1 = arith.constant 0 : index
    %c0_2 = arith.constant 0 : index
    %c0_3 = arith.constant 0 : index
    %c0_4 = arith.constant 0 : index
    %2 = vector.load %arg1[%c0_1, %c0_2, %c0_3, %c0_4] : memref<1x10x18x128xbf16, #tpu.memory_space<vmem>>, vector<1x8x16x128xbf16>
    %3 = vector.shape_cast %2 : vector<1x8x16x128xbf16> to vector<8x16x128xbf16>
    %4 = vector.shape_cast %3 : vector<8x16x128xbf16> to vector<128x128xbf16>
    %c0_5 = arith.constant 0 : index
    %c0_6 = arith.constant 0 : index
    %5 = vector.load %arg6[%c0_5, %c0_6] : memref<128x256xf32, #tpu.memory_space<vmem>>, vector<128x256xf32>
    %c0_7 = arith.constant 0 : index
    %c0_8 = arith.constant 0 : index
    %c0_9 = arith.constant 0 : index
    %6 = vector.load %arg2[%c0_7, %c0_8, %c0_9] : memref<9x128x256xbf16, #tpu.memory_space<vmem>>, vector<1x128x256xbf16>
    %7 = vector.shape_cast %6 : vector<1x128x256xbf16> to vector<128x256xbf16>
    %cst_10 = arith.constant dense<0.000000e+00> : vector<128x256xf32>
    %8 = tpu.matmul %4, %7, %cst_10 {dimension_numbers = #tpu.dot_dimension_numbers<[1], [0], [0], [1], [0, 0, 1, 1], [], []>} : vector<128x128xbf16>, vector<128x256xbf16>, vector<128x256xf32> -> vector<128x256xf32>
    %9 = arith.addf %5, %8 : vector<128x256xf32>
    %c0_11 = arith.constant 0 : index
    %c0_12 = arith.constant 0 : index
    %10 = vector.load %arg6[%c0_11, %c0_12] : memref<128x256xf32, #tpu.memory_space<vmem>>, vector<128x256xf32>
    tpu.vector_store %arg6[%c0_11, %c0_12], %9 {strides = array<i32>} : memref<128x256xf32, #tpu.memory_space<vmem>>, vector<128x256xf32>,
    %c0_13 = arith.constant 0 : index
    %c0_14 = arith.constant 0 : index
    %c1 = arith.constant 1 : index
    %c0_15 = arith.constant 0 : index
    %11 = vector.load %arg1[%c0_13, %c0_14, %c1, %c0_15] : memref<1x10x18x128xbf16, #tpu.memory_space<vmem>>, vector<1x8x16x128xbf16>
    %12 = vector.shape_cast %11 : vector<1x8x16x128xbf16> to vector<8x16x128xbf16>
    %13 = vector.shape_cast %12 : vector<8x16x128xbf16> to vector<128x128xbf16>
    %c0_16 = arith.constant 0 : index
    %c0_17 = arith.constant 0 : index
    %14 = vector.load %arg6[%c0_16, %c0_17] : memref<128x256xf32, #tpu.memory_space<vmem>>, vector<128x256xf32>
    %c1_18 = arith.constant 1 : index
    %c0_19 = arith.constant 0 : index
    %c0_20 = arith.constant 0 : index
    %15 = vector.load %arg2[%c1_18, %c0_19, %c0_20] : memref<9x128x256xbf16, #tpu.memory_space<vmem>>, vector<1x128x256xbf16>
    %16 = vector.shape_cast %15 : vector<1x128x256xbf16> to vector<128x256xbf16>
    %cst_21 = arith.constant dense<0.000000e+00> : vector<128x256xf32>
    %17 = tpu.matmul %13, %16, %cst_21 {dimension_numbers = #tpu.dot_dimension_numbers<[1], [0], [0], [1], [0, 0, 1, 1], [], []>} : vector<128x128xbf16>, vector<128x256xbf16>, vector<128x256xf32> -> vector<128x256xf32>
    %18 = arith.addf %14, %17 : vector<128x256xf32>
    %c0_22 = arith.constant 0 : index
    %c0_23 = arith.constant 0 : index
    %19 = vector.load %arg6[%c0_22, %c0_23] : memref<128x256xf32, #tpu.memory_space<vmem>>, vector<128x256xf32>
    tpu.vector_store %arg6[%c0_22, %c0_23], %18 {strides = array<i32>} : memref<128x256xf32, #tpu.memory_space<vmem>>, vector<128x256xf32>,
    %c0_24 = arith.constant 0 : index
    %c0_25 = arith.constant 0 : index
    %c2 = arith.constant 2 : index
    %c0_26 = arith.constant 0 : index
    %20 = vector.load %arg1[%c0_24, %c0_25, %c2, %c0_26] : memref<1x10x18x128xbf16, #tpu.memory_space<vmem>>, vector<1x8x16x128xbf16>
    %21 = vector.shape_cast %20 : vector<1x8x16x128xbf16> to vector<8x16x128xbf16>
    %22 = vector.shape_cast %21 : vector<8x16x128xbf16> to vector<128x128xbf16>
    %c0_27 = arith.constant 0 : index
    %c0_28 = arith.constant 0 : index
    %23 = vector.load %arg6[%c0_27, %c0_28] : memref<128x256xf32, #tpu.memory_space<vmem>>, vector<128x256xf32>
    %c2_29 = arith.constant 2 : index
    %c0_30 = arith.constant 0 : index
    %c0_31 = arith.constant 0 : index
    %24 = vector.load %arg2[%c2_29, %c0_30, %c0_31] : memref<9x128x256xbf16, #tpu.memory_space<vmem>>, vector<1x128x256xbf16>
    %25 = vector.shape_cast %24 : vector<1x128x256xbf16> to vector<128x256xbf16>
    %cst_32 = arith.constant dense<0.000000e+00> : vector<128x256xf32>
    %26 = tpu.matmul %22, %25, %cst_32 {dimension_numbers = #tpu.dot_dimension_numbers<[1], [0], [0], [1], [0, 0, 1, 1], [], []>} : vector<128x128xbf16>, vector<128x256xbf16>, vector<128x256xf32> -> vector<128x256xf32>
    %27 = arith.addf %23, %26 : vector<128x256xf32>
    %c0_33 = arith.constant 0 : index
    %c0_34 = arith.constant 0 : index
    %28 = vector.load %arg6[%c0_33, %c0_34] : memref<128x256xf32, #tpu.memory_space<vmem>>, vector<128x256xf32>
    tpu.vector_store %arg6[%c0_33, %c0_34], %27 {strides = array<i32>} : memref<128x256xf32, #tpu.memory_space<vmem>>, vector<128x256xf32>,
    %c0_35 = arith.constant 0 : index
    %c1_36 = arith.constant 1 : index
    %c0_37 = arith.constant 0 : index
    %c0_38 = arith.constant 0 : index
    %29 = vector.load %arg1[%c0_35, %c1_36, %c0_37, %c0_38] : memref<1x10x18x128xbf16, #tpu.memory_space<vmem>>, vector<1x8x16x128xbf16>
    %30 = vector.shape_cast %29 : vector<1x8x16x128xbf16> to vector<8x16x128xbf16>
    %31 = vector.shape_cast %30 : vector<8x16x128xbf16> to vector<128x128xbf16>
    %c0_39 = arith.constant 0 : index
    %c0_40 = arith.constant 0 : index
    %32 = vector.load %arg6[%c0_39, %c0_40] : memref<128x256xf32, #tpu.memory_space<vmem>>, vector<128x256xf32>
    %c3 = arith.constant 3 : index
    %c0_41 = arith.constant 0 : index
    %c0_42 = arith.constant 0 : index
    %33 = vector.load %arg2[%c3, %c0_41, %c0_42] : memref<9x128x256xbf16, #tpu.memory_space<vmem>>, vector<1x128x256xbf16>
    %34 = vector.shape_cast %33 : vector<1x128x256xbf16> to vector<128x256xbf16>
    %cst_43 = arith.constant dense<0.000000e+00> : vector<128x256xf32>
    %35 = tpu.matmul %31, %34, %cst_43 {dimension_numbers = #tpu.dot_dimension_numbers<[1], [0], [0], [1], [0, 0, 1, 1], [], []>} : vector<128x128xbf16>, vector<128x256xbf16>, vector<128x256xf32> -> vector<128x256xf32>
    %36 = arith.addf %32, %35 : vector<128x256xf32>
    %c0_44 = arith.constant 0 : index
    %c0_45 = arith.constant 0 : index
    %37 = vector.load %arg6[%c0_44, %c0_45] : memref<128x256xf32, #tpu.memory_space<vmem>>, vector<128x256xf32>
    tpu.vector_store %arg6[%c0_44, %c0_45], %36 {strides = array<i32>} : memref<128x256xf32, #tpu.memory_space<vmem>>, vector<128x256xf32>,
    %c0_46 = arith.constant 0 : index
    %c1_47 = arith.constant 1 : index
    %c1_48 = arith.constant 1 : index
    %c0_49 = arith.constant 0 : index
    %38 = vector.load %arg1[%c0_46, %c1_47, %c1_48, %c0_49] : memref<1x10x18x128xbf16, #tpu.memory_space<vmem>>, vector<1x8x16x128xbf16>
    %39 = vector.shape_cast %38 : vector<1x8x16x128xbf16> to vector<8x16x128xbf16>
    %40 = vector.shape_cast %39 : vector<8x16x128xbf16> to vector<128x128xbf16>
    %c0_50 = arith.constant 0 : index
    %c0_51 = arith.constant 0 : index
    %41 = vector.load %arg6[%c0_50, %c0_51] : memref<128x256xf32, #tpu.memory_space<vmem>>, vector<128x256xf32>
    %c4 = arith.constant 4 : index
    %c0_52 = arith.constant 0 : index
    %c0_53 = arith.constant 0 : index
    %42 = vector.load %arg2[%c4, %c0_52, %c0_53] : memref<9x128x256xbf16, #tpu.memory_space<vmem>>, vector<1x128x256xbf16>
    %43 = vector.shape_cast %42 : vector<1x128x256xbf16> to vector<128x256xbf16>
    %cst_54 = arith.constant dense<0.000000e+00> : vector<128x256xf32>
    %44 = tpu.matmul %40, %43, %cst_54 {dimension_numbers = #tpu.dot_dimension_numbers<[1], [0], [0], [1], [0, 0, 1, 1], [], []>} : vector<128x128xbf16>, vector<128x256xbf16>, vector<128x256xf32> -> vector<128x256xf32>
    %45 = arith.addf %41, %44 : vector<128x256xf32>
    %c0_55 = arith.constant 0 : index
    %c0_56 = arith.constant 0 : index
    %46 = vector.load %arg6[%c0_55, %c0_56] : memref<128x256xf32, #tpu.memory_space<vmem>>, vector<128x256xf32>
    tpu.vector_store %arg6[%c0_55, %c0_56], %45 {strides = array<i32>} : memref<128x256xf32, #tpu.memory_space<vmem>>, vector<128x256xf32>,
    %c0_57 = arith.constant 0 : index
    %c1_58 = arith.constant 1 : index
    %c2_59 = arith.constant 2 : index
    %c0_60 = arith.constant 0 : index
    %47 = vector.load %arg1[%c0_57, %c1_58, %c2_59, %c0_60] : memref<1x10x18x128xbf16, #tpu.memory_space<vmem>>, vector<1x8x16x128xbf16>
    %48 = vector.shape_cast %47 : vector<1x8x16x128xbf16> to vector<8x16x128xbf16>
    %49 = vector.shape_cast %48 : vector<8x16x128xbf16> to vector<128x128xbf16>
    %c0_61 = arith.constant 0 : index
    %c0_62 = arith.constant 0 : index
    %50 = vector.load %arg6[%c0_61, %c0_62] : memref<128x256xf32, #tpu.memory_space<vmem>>, vector<128x256xf32>
    %c5 = arith.constant 5 : index
    %c0_63 = arith.constant 0 : index
    %c0_64 = arith.constant 0 : index
    %51 = vector.load %arg2[%c5, %c0_63, %c0_64] : memref<9x128x256xbf16, #tpu.memory_space<vmem>>, vector<1x128x256xbf16>
    %52 = vector.shape_cast %51 : vector<1x128x256xbf16> to vector<128x256xbf16>
    %cst_65 = arith.constant dense<0.000000e+00> : vector<128x256xf32>
    %53 = tpu.matmul %49, %52, %cst_65 {dimension_numbers = #tpu.dot_dimension_numbers<[1], [0], [0], [1], [0, 0, 1, 1], [], []>} : vector<128x128xbf16>, vector<128x256xbf16>, vector<128x256xf32> -> vector<128x256xf32>
    %54 = arith.addf %50, %53 : vector<128x256xf32>
    %c0_66 = arith.constant 0 : index
    %c0_67 = arith.constant 0 : index
    %55 = vector.load %arg6[%c0_66, %c0_67] : memref<128x256xf32, #tpu.memory_space<vmem>>, vector<128x256xf32>
    tpu.vector_store %arg6[%c0_66, %c0_67], %54 {strides = array<i32>} : memref<128x256xf32, #tpu.memory_space<vmem>>, vector<128x256xf32>,
    %c0_68 = arith.constant 0 : index
    %c2_69 = arith.constant 2 : index
    %c0_70 = arith.constant 0 : index
    %c0_71 = arith.constant 0 : index
    %56 = vector.load %arg1[%c0_68, %c2_69, %c0_70, %c0_71] : memref<1x10x18x128xbf16, #tpu.memory_space<vmem>>, vector<1x8x16x128xbf16>
    %57 = vector.shape_cast %56 : vector<1x8x16x128xbf16> to vector<8x16x128xbf16>
    %58 = vector.shape_cast %57 : vector<8x16x128xbf16> to vector<128x128xbf16>
    %c0_72 = arith.constant 0 : index
    %c0_73 = arith.constant 0 : index
    %59 = vector.load %arg6[%c0_72, %c0_73] : memref<128x256xf32, #tpu.memory_space<vmem>>, vector<128x256xf32>
    %c6 = arith.constant 6 : index
    %c0_74 = arith.constant 0 : index
    %c0_75 = arith.constant 0 : index
    %60 = vector.load %arg2[%c6, %c0_74, %c0_75] : memref<9x128x256xbf16, #tpu.memory_space<vmem>>, vector<1x128x256xbf16>
    %61 = vector.shape_cast %60 : vector<1x128x256xbf16> to vector<128x256xbf16>
    %cst_76 = arith.constant dense<0.000000e+00> : vector<128x256xf32>
    %62 = tpu.matmul %58, %61, %cst_76 {dimension_numbers = #tpu.dot_dimension_numbers<[1], [0], [0], [1], [0, 0, 1, 1], [], []>} : vector<128x128xbf16>, vector<128x256xbf16>, vector<128x256xf32> -> vector<128x256xf32>
    %63 = arith.addf %59, %62 : vector<128x256xf32>
    %c0_77 = arith.constant 0 : index
    %c0_78 = arith.constant 0 : index
    %64 = vector.load %arg6[%c0_77, %c0_78] : memref<128x256xf32, #tpu.memory_space<vmem>>, vector<128x256xf32>
    tpu.vector_store %arg6[%c0_77, %c0_78], %63 {strides = array<i32>} : memref<128x256xf32, #tpu.memory_space<vmem>>, vector<128x256xf32>,
    %c0_79 = arith.constant 0 : index
    %c2_80 = arith.constant 2 : index
    %c1_81 = arith.constant 1 : index
    %c0_82 = arith.constant 0 : index
    %65 = vector.load %arg1[%c0_79, %c2_80, %c1_81, %c0_82] : memref<1x10x18x128xbf16, #tpu.memory_space<vmem>>, vector<1x8x16x128xbf16>
    %66 = vector.shape_cast %65 : vector<1x8x16x128xbf16> to vector<8x16x128xbf16>
    %67 = vector.shape_cast %66 : vector<8x16x128xbf16> to vector<128x128xbf16>
    %c0_83 = arith.constant 0 : index
    %c0_84 = arith.constant 0 : index
    %68 = vector.load %arg6[%c0_83, %c0_84] : memref<128x256xf32, #tpu.memory_space<vmem>>, vector<128x256xf32>
    %c7 = arith.constant 7 : index
    %c0_85 = arith.constant 0 : index
    %c0_86 = arith.constant 0 : index
    %69 = vector.load %arg2[%c7, %c0_85, %c0_86] : memref<9x128x256xbf16, #tpu.memory_space<vmem>>, vector<1x128x256xbf16>
    %70 = vector.shape_cast %69 : vector<1x128x256xbf16> to vector<128x256xbf16>
    %cst_87 = arith.constant dense<0.000000e+00> : vector<128x256xf32>
    %71 = tpu.matmul %67, %70, %cst_87 {dimension_numbers = #tpu.dot_dimension_numbers<[1], [0], [0], [1], [0, 0, 1, 1], [], []>} : vector<128x128xbf16>, vector<128x256xbf16>, vector<128x256xf32> -> vector<128x256xf32>
    %72 = arith.addf %68, %71 : vector<128x256xf32>
    %c0_88 = arith.constant 0 : index
    %c0_89 = arith.constant 0 : index
    %73 = vector.load %arg6[%c0_88, %c0_89] : memref<128x256xf32, #tpu.memory_space<vmem>>, vector<128x256xf32>
    tpu.vector_store %arg6[%c0_88, %c0_89], %72 {strides = array<i32>} : memref<128x256xf32, #tpu.memory_space<vmem>>, vector<128x256xf32>,
    %c0_90 = arith.constant 0 : index
    %c2_91 = arith.constant 2 : index
    %c2_92 = arith.constant 2 : index
    %c0_93 = arith.constant 0 : index
    %74 = vector.load %arg1[%c0_90, %c2_91, %c2_92, %c0_93] : memref<1x10x18x128xbf16, #tpu.memory_space<vmem>>, vector<1x8x16x128xbf16>
    %75 = vector.shape_cast %74 : vector<1x8x16x128xbf16> to vector<8x16x128xbf16>
    %76 = vector.shape_cast %75 : vector<8x16x128xbf16> to vector<128x128xbf16>
    %c0_94 = arith.constant 0 : index
    %c0_95 = arith.constant 0 : index
    %77 = vector.load %arg6[%c0_94, %c0_95] : memref<128x256xf32, #tpu.memory_space<vmem>>, vector<128x256xf32>
    %c8 = arith.constant 8 : index
    %c0_96 = arith.constant 0 : index
    %c0_97 = arith.constant 0 : index
    %78 = vector.load %arg2[%c8, %c0_96, %c0_97] : memref<9x128x256xbf16, #tpu.memory_space<vmem>>, vector<1x128x256xbf16>
    %79 = vector.shape_cast %78 : vector<1x128x256xbf16> to vector<128x256xbf16>
    %cst_98 = arith.constant dense<0.000000e+00> : vector<128x256xf32>
    %80 = tpu.matmul %76, %79, %cst_98 {dimension_numbers = #tpu.dot_dimension_numbers<[1], [0], [0], [1], [0, 0, 1, 1], [], []>} : vector<128x128xbf16>, vector<128x256xbf16>, vector<128x256xf32> -> vector<128x256xf32>
    %81 = arith.addf %77, %80 : vector<128x256xf32>
    %c0_99 = arith.constant 0 : index
    %c0_100 = arith.constant 0 : index
    %82 = vector.load %arg6[%c0_99, %c0_100] : memref<128x256xf32, #tpu.memory_space<vmem>>, vector<128x256xf32>
    tpu.vector_store %arg6[%c0_99, %c0_100], %81 {strides = array<i32>} : memref<128x256xf32, #tpu.memory_space<vmem>>, vector<128x256xf32>,
    %c0_101 = arith.constant 0 : index
    %c0_102 = arith.constant 0 : index
    %83 = vector.load %arg6[%c0_101, %c0_102] : memref<128x256xf32, #tpu.memory_space<vmem>>, vector<128x256xf32>
    %84 = vector.extract_strided_slice %83 {offsets = [0, 0], sizes = [128, 128], strides = [1, 1]} : vector<128x256xf32> to vector<128x128xf32>
    %85 = vector.shape_cast %84 : vector<128x128xf32> to vector<1x8x16x128xf32>
    %86 = arith.truncf %85 : vector<1x8x16x128xf32> to vector<1x8x16x128xbf16>
    %c0_103 = arith.constant 0 : index
    %c0_104 = arith.constant 0 : index
    %c0_105 = arith.constant 0 : index
    %c0_106 = arith.constant 0 : index
    %87 = vector.load %arg3[%c0_103, %c0_104, %c0_105, %c0_106] : memref<1x8x16x128xbf16, #tpu.memory_space<vmem>>, vector<1x8x16x128xbf16>
    tpu.vector_store %arg3[%c0_103, %c0_104, %c0_105, %c0_106], %86 {strides = array<i32>} : memref<1x8x16x128xbf16, #tpu.memory_space<vmem>>, vector<1x8x16x128xbf16>,
    %88 = vector.extract_strided_slice %83 {offsets = [0, 128], sizes = [128, 128], strides = [1, 1]} : vector<128x256xf32> to vector<128x128xf32>
    %89 = vector.shape_cast %88 : vector<128x128xf32> to vector<1x8x16x128xf32>
    %90 = arith.truncf %89 : vector<1x8x16x128xf32> to vector<1x8x16x128xbf16>
    %c0_107 = arith.constant 0 : index
    %c0_108 = arith.constant 0 : index
    %c0_109 = arith.constant 0 : index
    %c0_110 = arith.constant 0 : index
    %91 = vector.load %arg4[%c0_107, %c0_108, %c0_109, %c0_110] : memref<1x8x16x128xbf16, #tpu.memory_space<vmem>>, vector<1x8x16x128xbf16>
    tpu.vector_store %arg4[%c0_107, %c0_108, %c0_109, %c0_110], %90 {strides = array<i32>} : memref<1x8x16x128xbf16, #tpu.memory_space<vmem>>, vector<1x8x16x128xbf16>,
    %cst_111 = arith.constant dense<0.000000e+00> : vector<256xf32>
    %92 = vector.multi_reduction <add>, %83, %cst_111 [0] : vector<128x256xf32> to vector<256xf32>
    %93 = vector.shape_cast %92 : vector<256xf32> to vector<1x256xf32>
    %94 = arith.mulf %83, %83 : vector<128x256xf32>
    %cst_112 = arith.constant dense<0.000000e+00> : vector<256xf32>
    %95 = vector.multi_reduction <add>, %94, %cst_112 [0] : vector<128x256xf32> to vector<256xf32>
    %96 = vector.shape_cast %95 : vector<256xf32> to vector<1x256xf32>
    %cst_113 = arith.constant 0.000000e+00 : f32
    %97 = vector.broadcast %cst_113 : f32 to vector<6x256xf32>
    %98 = tpu.concatenate %93, %96, %97 in 0 : vector<1x256xf32>, vector<1x256xf32>, vector<6x256xf32> -> vector<8x256xf32>
    %99 = vector.shape_cast %98 : vector<8x256xf32> to vector<1x8x256xf32>
    %c0_114 = arith.constant 0 : index
    %c0_115 = arith.constant 0 : index
    %c0_116 = arith.constant 0 : index
    %100 = vector.load %arg5[%c0_114, %c0_115, %c0_116] : memref<1x8x256xf32, #tpu.memory_space<vmem>>, vector<1x8x256xf32>
    tpu.vector_store %arg5[%c0_114, %c0_115, %c0_116], %99 {strides = array<i32>} : memref<1x8x256xf32, #tpu.memory_space<vmem>>, vector<1x8x256xf32>,
    return
  }
  func.func @transform_0(%arg0: i32) -> (i32, i32, i32, i32) {
    %c0_i32 = arith.constant 0 : i32
    %c0_i32_0 = arith.constant 0 : i32
    %c0_i32_1 = arith.constant 0 : i32
    %c0_i32_2 = arith.constant 0 : i32
    return %arg0, %c0_i32, %c0_i32_0, %c0_i32_1 : i32, i32, i32, i32
  }
  func.func @transform_1(%arg0: i32) -> (i32, i32, i32) {
    %c0_i32 = arith.constant 0 : i32
    %c0_i32_0 = arith.constant 0 : i32
    %c0_i32_1 = arith.constant 0 : i32
    %c0_i32_2 = arith.constant 0 : i32
    return %c0_i32, %c0_i32_0, %c0_i32_1 : i32, i32, i32
  }
  func.func @transform_2(%arg0: i32) -> (i32, i32, i32, i32) {
    %c0_i32 = arith.constant 0 : i32
    %c0_i32_0 = arith.constant 0 : i32
    %c0_i32_1 = arith.constant 0 : i32
    %c0_i32_2 = arith.constant 0 : i32
    return %arg0, %c0_i32, %c0_i32_0, %c0_i32_1 : i32, i32, i32, i32
  }
  func.func @transform_3(%arg0: i32) -> (i32, i32, i32, i32) {
    %c0_i32 = arith.constant 0 : i32
    %c0_i32_0 = arith.constant 0 : i32
    %c0_i32_1 = arith.constant 0 : i32
    %c0_i32_2 = arith.constant 0 : i32
    return %arg0, %c0_i32, %c0_i32_0, %c0_i32_1 : i32, i32, i32, i32
  }
  func.func @transform_4(%arg0: i32) -> (i32, i32, i32) {
    %c0_i32 = arith.constant 0 : i32
    %c0_i32_0 = arith.constant 0 : i32
    %c0_i32_1 = arith.constant 0 : i32
    return %arg0, %c0_i32, %c0_i32_0 : i32, i32, i32
  }
}

module attributes {stable_mosaic.version = 11 : i64} {
  func.func @_conv_single_kernel(%arg0: i32, %arg1: memref<1x10x18x128xbf16, #tpu.memory_space<vmem>>, %arg2: memref<9x128x128xbf16, #tpu.memory_space<vmem>>, %arg3: memref<1x8x16x128xbf16, #tpu.memory_space<vmem>>, %arg4: memref<1x8x128xf32, #tpu.memory_space<vmem>>, %arg5: memref<128x128xf32, #tpu.memory_space<vmem>>) attributes {dimension_semantics = [#tpu.dimension_semantics<parallel>], iteration_bounds = array<i64: 4>, scalar_prefetch = 0 : i64, scratch_operands = 1 : i64, tpu.core_type = #tpu.core_type<tc>, window_params = [{transform_indices = @transform_0, window_bounds = array<i64: 1, 10, 18, 128>}, {pipeline_mode = #tpu.pipeline_mode<synchronous>, transform_indices = @transform_1, window_bounds = array<i64: 9, 128, 128>}, {transform_indices = @transform_2, window_bounds = array<i64: 1, 8, 16, 128>}, {transform_indices = @transform_3, window_bounds = array<i64: 1, 8, 128>}]} {
    %cst = arith.constant 0.000000e+00 : f32
    %0 = vector.broadcast %cst : f32 to vector<128x128xf32>
    %c0 = arith.constant 0 : index
    %c0_0 = arith.constant 0 : index
    %1 = vector.load %arg5[%c0, %c0_0] : memref<128x128xf32, #tpu.memory_space<vmem>>, vector<128x128xf32>
    tpu.vector_store %arg5[%c0, %c0_0], %0 {strides = array<i32>} : memref<128x128xf32, #tpu.memory_space<vmem>>, vector<128x128xf32>,
    %c0_1 = arith.constant 0 : index
    %c0_2 = arith.constant 0 : index
    %c0_3 = arith.constant 0 : index
    %c0_4 = arith.constant 0 : index
    %2 = vector.load %arg1[%c0_1, %c0_2, %c0_3, %c0_4] : memref<1x10x18x128xbf16, #tpu.memory_space<vmem>>, vector<1x8x16x128xbf16>
    %3 = vector.shape_cast %2 : vector<1x8x16x128xbf16> to vector<8x16x128xbf16>
    %4 = vector.shape_cast %3 : vector<8x16x128xbf16> to vector<128x128xbf16>
    %c0_5 = arith.constant 0 : index
    %c0_6 = arith.constant 0 : index
    %5 = vector.load %arg5[%c0_5, %c0_6] : memref<128x128xf32, #tpu.memory_space<vmem>>, vector<128x128xf32>
    %c0_7 = arith.constant 0 : index
    %c0_8 = arith.constant 0 : index
    %c0_9 = arith.constant 0 : index
    %6 = vector.load %arg2[%c0_7, %c0_8, %c0_9] : memref<9x128x128xbf16, #tpu.memory_space<vmem>>, vector<1x128x128xbf16>
    %7 = vector.shape_cast %6 : vector<1x128x128xbf16> to vector<128x128xbf16>
    %cst_10 = arith.constant dense<0.000000e+00> : vector<128x128xf32>
    %8 = tpu.matmul %4, %7, %cst_10 {dimension_numbers = #tpu.dot_dimension_numbers<[1], [0], [0], [1], [0, 0, 1, 1], [], []>} : vector<128x128xbf16>, vector<128x128xbf16>, vector<128x128xf32> -> vector<128x128xf32>
    %9 = arith.addf %5, %8 : vector<128x128xf32>
    %c0_11 = arith.constant 0 : index
    %c0_12 = arith.constant 0 : index
    %10 = vector.load %arg5[%c0_11, %c0_12] : memref<128x128xf32, #tpu.memory_space<vmem>>, vector<128x128xf32>
    tpu.vector_store %arg5[%c0_11, %c0_12], %9 {strides = array<i32>} : memref<128x128xf32, #tpu.memory_space<vmem>>, vector<128x128xf32>,
    %c0_13 = arith.constant 0 : index
    %c0_14 = arith.constant 0 : index
    %c1 = arith.constant 1 : index
    %c0_15 = arith.constant 0 : index
    %11 = vector.load %arg1[%c0_13, %c0_14, %c1, %c0_15] : memref<1x10x18x128xbf16, #tpu.memory_space<vmem>>, vector<1x8x16x128xbf16>
    %12 = vector.shape_cast %11 : vector<1x8x16x128xbf16> to vector<8x16x128xbf16>
    %13 = vector.shape_cast %12 : vector<8x16x128xbf16> to vector<128x128xbf16>
    %c0_16 = arith.constant 0 : index
    %c0_17 = arith.constant 0 : index
    %14 = vector.load %arg5[%c0_16, %c0_17] : memref<128x128xf32, #tpu.memory_space<vmem>>, vector<128x128xf32>
    %c1_18 = arith.constant 1 : index
    %c0_19 = arith.constant 0 : index
    %c0_20 = arith.constant 0 : index
    %15 = vector.load %arg2[%c1_18, %c0_19, %c0_20] : memref<9x128x128xbf16, #tpu.memory_space<vmem>>, vector<1x128x128xbf16>
    %16 = vector.shape_cast %15 : vector<1x128x128xbf16> to vector<128x128xbf16>
    %cst_21 = arith.constant dense<0.000000e+00> : vector<128x128xf32>
    %17 = tpu.matmul %13, %16, %cst_21 {dimension_numbers = #tpu.dot_dimension_numbers<[1], [0], [0], [1], [0, 0, 1, 1], [], []>} : vector<128x128xbf16>, vector<128x128xbf16>, vector<128x128xf32> -> vector<128x128xf32>
    %18 = arith.addf %14, %17 : vector<128x128xf32>
    %c0_22 = arith.constant 0 : index
    %c0_23 = arith.constant 0 : index
    %19 = vector.load %arg5[%c0_22, %c0_23] : memref<128x128xf32, #tpu.memory_space<vmem>>, vector<128x128xf32>
    tpu.vector_store %arg5[%c0_22, %c0_23], %18 {strides = array<i32>} : memref<128x128xf32, #tpu.memory_space<vmem>>, vector<128x128xf32>,
    %c0_24 = arith.constant 0 : index
    %c0_25 = arith.constant 0 : index
    %c2 = arith.constant 2 : index
    %c0_26 = arith.constant 0 : index
    %20 = vector.load %arg1[%c0_24, %c0_25, %c2, %c0_26] : memref<1x10x18x128xbf16, #tpu.memory_space<vmem>>, vector<1x8x16x128xbf16>
    %21 = vector.shape_cast %20 : vector<1x8x16x128xbf16> to vector<8x16x128xbf16>
    %22 = vector.shape_cast %21 : vector<8x16x128xbf16> to vector<128x128xbf16>
    %c0_27 = arith.constant 0 : index
    %c0_28 = arith.constant 0 : index
    %23 = vector.load %arg5[%c0_27, %c0_28] : memref<128x128xf32, #tpu.memory_space<vmem>>, vector<128x128xf32>
    %c2_29 = arith.constant 2 : index
    %c0_30 = arith.constant 0 : index
    %c0_31 = arith.constant 0 : index
    %24 = vector.load %arg2[%c2_29, %c0_30, %c0_31] : memref<9x128x128xbf16, #tpu.memory_space<vmem>>, vector<1x128x128xbf16>
    %25 = vector.shape_cast %24 : vector<1x128x128xbf16> to vector<128x128xbf16>
    %cst_32 = arith.constant dense<0.000000e+00> : vector<128x128xf32>
    %26 = tpu.matmul %22, %25, %cst_32 {dimension_numbers = #tpu.dot_dimension_numbers<[1], [0], [0], [1], [0, 0, 1, 1], [], []>} : vector<128x128xbf16>, vector<128x128xbf16>, vector<128x128xf32> -> vector<128x128xf32>
    %27 = arith.addf %23, %26 : vector<128x128xf32>
    %c0_33 = arith.constant 0 : index
    %c0_34 = arith.constant 0 : index
    %28 = vector.load %arg5[%c0_33, %c0_34] : memref<128x128xf32, #tpu.memory_space<vmem>>, vector<128x128xf32>
    tpu.vector_store %arg5[%c0_33, %c0_34], %27 {strides = array<i32>} : memref<128x128xf32, #tpu.memory_space<vmem>>, vector<128x128xf32>,
    %c0_35 = arith.constant 0 : index
    %c1_36 = arith.constant 1 : index
    %c0_37 = arith.constant 0 : index
    %c0_38 = arith.constant 0 : index
    %29 = vector.load %arg1[%c0_35, %c1_36, %c0_37, %c0_38] : memref<1x10x18x128xbf16, #tpu.memory_space<vmem>>, vector<1x8x16x128xbf16>
    %30 = vector.shape_cast %29 : vector<1x8x16x128xbf16> to vector<8x16x128xbf16>
    %31 = vector.shape_cast %30 : vector<8x16x128xbf16> to vector<128x128xbf16>
    %c0_39 = arith.constant 0 : index
    %c0_40 = arith.constant 0 : index
    %32 = vector.load %arg5[%c0_39, %c0_40] : memref<128x128xf32, #tpu.memory_space<vmem>>, vector<128x128xf32>
    %c3 = arith.constant 3 : index
    %c0_41 = arith.constant 0 : index
    %c0_42 = arith.constant 0 : index
    %33 = vector.load %arg2[%c3, %c0_41, %c0_42] : memref<9x128x128xbf16, #tpu.memory_space<vmem>>, vector<1x128x128xbf16>
    %34 = vector.shape_cast %33 : vector<1x128x128xbf16> to vector<128x128xbf16>
    %cst_43 = arith.constant dense<0.000000e+00> : vector<128x128xf32>
    %35 = tpu.matmul %31, %34, %cst_43 {dimension_numbers = #tpu.dot_dimension_numbers<[1], [0], [0], [1], [0, 0, 1, 1], [], []>} : vector<128x128xbf16>, vector<128x128xbf16>, vector<128x128xf32> -> vector<128x128xf32>
    %36 = arith.addf %32, %35 : vector<128x128xf32>
    %c0_44 = arith.constant 0 : index
    %c0_45 = arith.constant 0 : index
    %37 = vector.load %arg5[%c0_44, %c0_45] : memref<128x128xf32, #tpu.memory_space<vmem>>, vector<128x128xf32>
    tpu.vector_store %arg5[%c0_44, %c0_45], %36 {strides = array<i32>} : memref<128x128xf32, #tpu.memory_space<vmem>>, vector<128x128xf32>,
    %c0_46 = arith.constant 0 : index
    %c1_47 = arith.constant 1 : index
    %c1_48 = arith.constant 1 : index
    %c0_49 = arith.constant 0 : index
    %38 = vector.load %arg1[%c0_46, %c1_47, %c1_48, %c0_49] : memref<1x10x18x128xbf16, #tpu.memory_space<vmem>>, vector<1x8x16x128xbf16>
    %39 = vector.shape_cast %38 : vector<1x8x16x128xbf16> to vector<8x16x128xbf16>
    %40 = vector.shape_cast %39 : vector<8x16x128xbf16> to vector<128x128xbf16>
    %c0_50 = arith.constant 0 : index
    %c0_51 = arith.constant 0 : index
    %41 = vector.load %arg5[%c0_50, %c0_51] : memref<128x128xf32, #tpu.memory_space<vmem>>, vector<128x128xf32>
    %c4 = arith.constant 4 : index
    %c0_52 = arith.constant 0 : index
    %c0_53 = arith.constant 0 : index
    %42 = vector.load %arg2[%c4, %c0_52, %c0_53] : memref<9x128x128xbf16, #tpu.memory_space<vmem>>, vector<1x128x128xbf16>
    %43 = vector.shape_cast %42 : vector<1x128x128xbf16> to vector<128x128xbf16>
    %cst_54 = arith.constant dense<0.000000e+00> : vector<128x128xf32>
    %44 = tpu.matmul %40, %43, %cst_54 {dimension_numbers = #tpu.dot_dimension_numbers<[1], [0], [0], [1], [0, 0, 1, 1], [], []>} : vector<128x128xbf16>, vector<128x128xbf16>, vector<128x128xf32> -> vector<128x128xf32>
    %45 = arith.addf %41, %44 : vector<128x128xf32>
    %c0_55 = arith.constant 0 : index
    %c0_56 = arith.constant 0 : index
    %46 = vector.load %arg5[%c0_55, %c0_56] : memref<128x128xf32, #tpu.memory_space<vmem>>, vector<128x128xf32>
    tpu.vector_store %arg5[%c0_55, %c0_56], %45 {strides = array<i32>} : memref<128x128xf32, #tpu.memory_space<vmem>>, vector<128x128xf32>,
    %c0_57 = arith.constant 0 : index
    %c1_58 = arith.constant 1 : index
    %c2_59 = arith.constant 2 : index
    %c0_60 = arith.constant 0 : index
    %47 = vector.load %arg1[%c0_57, %c1_58, %c2_59, %c0_60] : memref<1x10x18x128xbf16, #tpu.memory_space<vmem>>, vector<1x8x16x128xbf16>
    %48 = vector.shape_cast %47 : vector<1x8x16x128xbf16> to vector<8x16x128xbf16>
    %49 = vector.shape_cast %48 : vector<8x16x128xbf16> to vector<128x128xbf16>
    %c0_61 = arith.constant 0 : index
    %c0_62 = arith.constant 0 : index
    %50 = vector.load %arg5[%c0_61, %c0_62] : memref<128x128xf32, #tpu.memory_space<vmem>>, vector<128x128xf32>
    %c5 = arith.constant 5 : index
    %c0_63 = arith.constant 0 : index
    %c0_64 = arith.constant 0 : index
    %51 = vector.load %arg2[%c5, %c0_63, %c0_64] : memref<9x128x128xbf16, #tpu.memory_space<vmem>>, vector<1x128x128xbf16>
    %52 = vector.shape_cast %51 : vector<1x128x128xbf16> to vector<128x128xbf16>
    %cst_65 = arith.constant dense<0.000000e+00> : vector<128x128xf32>
    %53 = tpu.matmul %49, %52, %cst_65 {dimension_numbers = #tpu.dot_dimension_numbers<[1], [0], [0], [1], [0, 0, 1, 1], [], []>} : vector<128x128xbf16>, vector<128x128xbf16>, vector<128x128xf32> -> vector<128x128xf32>
    %54 = arith.addf %50, %53 : vector<128x128xf32>
    %c0_66 = arith.constant 0 : index
    %c0_67 = arith.constant 0 : index
    %55 = vector.load %arg5[%c0_66, %c0_67] : memref<128x128xf32, #tpu.memory_space<vmem>>, vector<128x128xf32>
    tpu.vector_store %arg5[%c0_66, %c0_67], %54 {strides = array<i32>} : memref<128x128xf32, #tpu.memory_space<vmem>>, vector<128x128xf32>,
    %c0_68 = arith.constant 0 : index
    %c2_69 = arith.constant 2 : index
    %c0_70 = arith.constant 0 : index
    %c0_71 = arith.constant 0 : index
    %56 = vector.load %arg1[%c0_68, %c2_69, %c0_70, %c0_71] : memref<1x10x18x128xbf16, #tpu.memory_space<vmem>>, vector<1x8x16x128xbf16>
    %57 = vector.shape_cast %56 : vector<1x8x16x128xbf16> to vector<8x16x128xbf16>
    %58 = vector.shape_cast %57 : vector<8x16x128xbf16> to vector<128x128xbf16>
    %c0_72 = arith.constant 0 : index
    %c0_73 = arith.constant 0 : index
    %59 = vector.load %arg5[%c0_72, %c0_73] : memref<128x128xf32, #tpu.memory_space<vmem>>, vector<128x128xf32>
    %c6 = arith.constant 6 : index
    %c0_74 = arith.constant 0 : index
    %c0_75 = arith.constant 0 : index
    %60 = vector.load %arg2[%c6, %c0_74, %c0_75] : memref<9x128x128xbf16, #tpu.memory_space<vmem>>, vector<1x128x128xbf16>
    %61 = vector.shape_cast %60 : vector<1x128x128xbf16> to vector<128x128xbf16>
    %cst_76 = arith.constant dense<0.000000e+00> : vector<128x128xf32>
    %62 = tpu.matmul %58, %61, %cst_76 {dimension_numbers = #tpu.dot_dimension_numbers<[1], [0], [0], [1], [0, 0, 1, 1], [], []>} : vector<128x128xbf16>, vector<128x128xbf16>, vector<128x128xf32> -> vector<128x128xf32>
    %63 = arith.addf %59, %62 : vector<128x128xf32>
    %c0_77 = arith.constant 0 : index
    %c0_78 = arith.constant 0 : index
    %64 = vector.load %arg5[%c0_77, %c0_78] : memref<128x128xf32, #tpu.memory_space<vmem>>, vector<128x128xf32>
    tpu.vector_store %arg5[%c0_77, %c0_78], %63 {strides = array<i32>} : memref<128x128xf32, #tpu.memory_space<vmem>>, vector<128x128xf32>,
    %c0_79 = arith.constant 0 : index
    %c2_80 = arith.constant 2 : index
    %c1_81 = arith.constant 1 : index
    %c0_82 = arith.constant 0 : index
    %65 = vector.load %arg1[%c0_79, %c2_80, %c1_81, %c0_82] : memref<1x10x18x128xbf16, #tpu.memory_space<vmem>>, vector<1x8x16x128xbf16>
    %66 = vector.shape_cast %65 : vector<1x8x16x128xbf16> to vector<8x16x128xbf16>
    %67 = vector.shape_cast %66 : vector<8x16x128xbf16> to vector<128x128xbf16>
    %c0_83 = arith.constant 0 : index
    %c0_84 = arith.constant 0 : index
    %68 = vector.load %arg5[%c0_83, %c0_84] : memref<128x128xf32, #tpu.memory_space<vmem>>, vector<128x128xf32>
    %c7 = arith.constant 7 : index
    %c0_85 = arith.constant 0 : index
    %c0_86 = arith.constant 0 : index
    %69 = vector.load %arg2[%c7, %c0_85, %c0_86] : memref<9x128x128xbf16, #tpu.memory_space<vmem>>, vector<1x128x128xbf16>
    %70 = vector.shape_cast %69 : vector<1x128x128xbf16> to vector<128x128xbf16>
    %cst_87 = arith.constant dense<0.000000e+00> : vector<128x128xf32>
    %71 = tpu.matmul %67, %70, %cst_87 {dimension_numbers = #tpu.dot_dimension_numbers<[1], [0], [0], [1], [0, 0, 1, 1], [], []>} : vector<128x128xbf16>, vector<128x128xbf16>, vector<128x128xf32> -> vector<128x128xf32>
    %72 = arith.addf %68, %71 : vector<128x128xf32>
    %c0_88 = arith.constant 0 : index
    %c0_89 = arith.constant 0 : index
    %73 = vector.load %arg5[%c0_88, %c0_89] : memref<128x128xf32, #tpu.memory_space<vmem>>, vector<128x128xf32>
    tpu.vector_store %arg5[%c0_88, %c0_89], %72 {strides = array<i32>} : memref<128x128xf32, #tpu.memory_space<vmem>>, vector<128x128xf32>,
    %c0_90 = arith.constant 0 : index
    %c2_91 = arith.constant 2 : index
    %c2_92 = arith.constant 2 : index
    %c0_93 = arith.constant 0 : index
    %74 = vector.load %arg1[%c0_90, %c2_91, %c2_92, %c0_93] : memref<1x10x18x128xbf16, #tpu.memory_space<vmem>>, vector<1x8x16x128xbf16>
    %75 = vector.shape_cast %74 : vector<1x8x16x128xbf16> to vector<8x16x128xbf16>
    %76 = vector.shape_cast %75 : vector<8x16x128xbf16> to vector<128x128xbf16>
    %c0_94 = arith.constant 0 : index
    %c0_95 = arith.constant 0 : index
    %77 = vector.load %arg5[%c0_94, %c0_95] : memref<128x128xf32, #tpu.memory_space<vmem>>, vector<128x128xf32>
    %c8 = arith.constant 8 : index
    %c0_96 = arith.constant 0 : index
    %c0_97 = arith.constant 0 : index
    %78 = vector.load %arg2[%c8, %c0_96, %c0_97] : memref<9x128x128xbf16, #tpu.memory_space<vmem>>, vector<1x128x128xbf16>
    %79 = vector.shape_cast %78 : vector<1x128x128xbf16> to vector<128x128xbf16>
    %cst_98 = arith.constant dense<0.000000e+00> : vector<128x128xf32>
    %80 = tpu.matmul %76, %79, %cst_98 {dimension_numbers = #tpu.dot_dimension_numbers<[1], [0], [0], [1], [0, 0, 1, 1], [], []>} : vector<128x128xbf16>, vector<128x128xbf16>, vector<128x128xf32> -> vector<128x128xf32>
    %81 = arith.addf %77, %80 : vector<128x128xf32>
    %c0_99 = arith.constant 0 : index
    %c0_100 = arith.constant 0 : index
    %82 = vector.load %arg5[%c0_99, %c0_100] : memref<128x128xf32, #tpu.memory_space<vmem>>, vector<128x128xf32>
    tpu.vector_store %arg5[%c0_99, %c0_100], %81 {strides = array<i32>} : memref<128x128xf32, #tpu.memory_space<vmem>>, vector<128x128xf32>,
    %c0_101 = arith.constant 0 : index
    %c0_102 = arith.constant 0 : index
    %83 = vector.load %arg5[%c0_101, %c0_102] : memref<128x128xf32, #tpu.memory_space<vmem>>, vector<128x128xf32>
    %84 = vector.shape_cast %83 : vector<128x128xf32> to vector<1x8x16x128xf32>
    %85 = arith.truncf %84 : vector<1x8x16x128xf32> to vector<1x8x16x128xbf16>
    %c0_103 = arith.constant 0 : index
    %c0_104 = arith.constant 0 : index
    %c0_105 = arith.constant 0 : index
    %c0_106 = arith.constant 0 : index
    %86 = vector.load %arg3[%c0_103, %c0_104, %c0_105, %c0_106] : memref<1x8x16x128xbf16, #tpu.memory_space<vmem>>, vector<1x8x16x128xbf16>
    tpu.vector_store %arg3[%c0_103, %c0_104, %c0_105, %c0_106], %85 {strides = array<i32>} : memref<1x8x16x128xbf16, #tpu.memory_space<vmem>>, vector<1x8x16x128xbf16>,
    %cst_107 = arith.constant dense<0.000000e+00> : vector<128xf32>
    %87 = vector.multi_reduction <add>, %83, %cst_107 [0] : vector<128x128xf32> to vector<128xf32>
    %88 = vector.shape_cast %87 : vector<128xf32> to vector<1x128xf32>
    %89 = arith.mulf %83, %83 : vector<128x128xf32>
    %cst_108 = arith.constant dense<0.000000e+00> : vector<128xf32>
    %90 = vector.multi_reduction <add>, %89, %cst_108 [0] : vector<128x128xf32> to vector<128xf32>
    %91 = vector.shape_cast %90 : vector<128xf32> to vector<1x128xf32>
    %cst_109 = arith.constant 0.000000e+00 : f32
    %92 = vector.broadcast %cst_109 : f32 to vector<6x128xf32>
    %93 = tpu.concatenate %88, %91, %92 in 0 : vector<1x128xf32>, vector<1x128xf32>, vector<6x128xf32> -> vector<8x128xf32>
    %94 = vector.shape_cast %93 : vector<8x128xf32> to vector<1x8x128xf32>
    %c0_110 = arith.constant 0 : index
    %c0_111 = arith.constant 0 : index
    %c0_112 = arith.constant 0 : index
    %95 = vector.load %arg4[%c0_110, %c0_111, %c0_112] : memref<1x8x128xf32, #tpu.memory_space<vmem>>, vector<1x8x128xf32>
    tpu.vector_store %arg4[%c0_110, %c0_111, %c0_112], %94 {strides = array<i32>} : memref<1x8x128xf32, #tpu.memory_space<vmem>>, vector<1x8x128xf32>,
    return
  }
  func.func @transform_0(%arg0: i32) -> (i32, i32, i32, i32) {
    %c0_i32 = arith.constant 0 : i32
    %c0_i32_0 = arith.constant 0 : i32
    %c0_i32_1 = arith.constant 0 : i32
    %c0_i32_2 = arith.constant 0 : i32
    return %arg0, %c0_i32, %c0_i32_0, %c0_i32_1 : i32, i32, i32, i32
  }
  func.func @transform_1(%arg0: i32) -> (i32, i32, i32) {
    %c0_i32 = arith.constant 0 : i32
    %c0_i32_0 = arith.constant 0 : i32
    %c0_i32_1 = arith.constant 0 : i32
    %c0_i32_2 = arith.constant 0 : i32
    return %c0_i32, %c0_i32_0, %c0_i32_1 : i32, i32, i32
  }
  func.func @transform_2(%arg0: i32) -> (i32, i32, i32, i32) {
    %c0_i32 = arith.constant 0 : i32
    %c0_i32_0 = arith.constant 0 : i32
    %c0_i32_1 = arith.constant 0 : i32
    %c0_i32_2 = arith.constant 0 : i32
    return %arg0, %c0_i32, %c0_i32_0, %c0_i32_1 : i32, i32, i32, i32
  }
  func.func @transform_3(%arg0: i32) -> (i32, i32, i32) {
    %c0_i32 = arith.constant 0 : i32
    %c0_i32_0 = arith.constant 0 : i32
    %c0_i32_1 = arith.constant 0 : i32
    return %arg0, %c0_i32, %c0_i32_0 : i32, i32, i32
  }
}

module attributes {stable_mosaic.version = 11 : i64} {
  func.func @_epilogue_kernel(%arg0: i32, %arg1: memref<1x8x16x128xbf16, #tpu.memory_space<vmem>>, %arg2: memref<1x8x16x128xbf16, #tpu.memory_space<vmem>>, %arg3: memref<1x8x128xf32, #tpu.memory_space<vmem>>, %arg4: memref<1x8x16x128xf32, #tpu.memory_space<vmem>>) attributes {dimension_semantics = [#tpu.dimension_semantics<parallel>], iteration_bounds = array<i64: 4>, scalar_prefetch = 0 : i64, scratch_operands = 0 : i64, tpu.core_type = #tpu.core_type<tc>, window_params = [{transform_indices = @transform_0, window_bounds = array<i64: 1, 8, 16, 128>}, {transform_indices = @transform_1, window_bounds = array<i64: 1, 8, 16, 128>}, {pipeline_mode = #tpu.pipeline_mode<synchronous>, transform_indices = @transform_2, window_bounds = array<i64: 1, 8, 128>}, {transform_indices = @transform_3, window_bounds = array<i64: 1, 8, 16, 128>}]} {
    %c0 = arith.constant 0 : index
    %c0_0 = arith.constant 0 : index
    %c0_1 = arith.constant 0 : index
    %c0_2 = arith.constant 0 : index
    %0 = vector.load %arg1[%c0, %c0_0, %c0_1, %c0_2] : memref<1x8x16x128xbf16, #tpu.memory_space<vmem>>, vector<1x8x16x128xbf16>
    %1 = arith.extf %0 : vector<1x8x16x128xbf16> to vector<1x8x16x128xf32>
    %c0_3 = arith.constant 0 : index
    %c0_4 = arith.constant 0 : index
    %c0_5 = arith.constant 0 : index
    %c0_6 = arith.constant 0 : index
    %2 = vector.load %arg2[%c0_3, %c0_4, %c0_5, %c0_6] : memref<1x8x16x128xbf16, #tpu.memory_space<vmem>>, vector<1x8x16x128xbf16>
    %3 = arith.extf %2 : vector<1x8x16x128xbf16> to vector<1x8x16x128xf32>
    %c0_7 = arith.constant 0 : index
    %c0_8 = arith.constant 0 : index
    %c0_9 = arith.constant 0 : index
    %4 = vector.load %arg3[%c0_7, %c0_8, %c0_9] : memref<1x8x128xf32, #tpu.memory_space<vmem>>, vector<1x1x128xf32>
    %5 = vector.shape_cast %4 : vector<1x1x128xf32> to vector<1x128xf32>
    %6 = vector.shape_cast %5 : vector<1x128xf32> to vector<1x1x1x128xf32>
    %c0_10 = arith.constant 0 : index
    %c1 = arith.constant 1 : index
    %c0_11 = arith.constant 0 : index
    %7 = vector.load %arg3[%c0_10, %c1, %c0_11] : memref<1x8x128xf32, #tpu.memory_space<vmem>>, vector<1x1x128xf32>
    %8 = vector.shape_cast %7 : vector<1x1x128xf32> to vector<1x128xf32>
    %9 = vector.shape_cast %8 : vector<1x128xf32> to vector<1x1x1x128xf32>
    %c0_12 = arith.constant 0 : index
    %c2 = arith.constant 2 : index
    %c0_13 = arith.constant 0 : index
    %10 = vector.load %arg3[%c0_12, %c2, %c0_13] : memref<1x8x128xf32, #tpu.memory_space<vmem>>, vector<1x1x128xf32>
    %11 = vector.shape_cast %10 : vector<1x1x128xf32> to vector<1x128xf32>
    %12 = vector.shape_cast %11 : vector<1x128xf32> to vector<1x1x1x128xf32>
    %13 = vector.broadcast %6 : vector<1x1x1x128xf32> to vector<1x8x16x128xf32>
    %14 = arith.mulf %1, %13 : vector<1x8x16x128xf32>
    %15 = vector.broadcast %9 : vector<1x1x1x128xf32> to vector<1x8x16x128xf32>
    %16 = arith.mulf %3, %15 : vector<1x8x16x128xf32>
    %17 = arith.addf %14, %16 : vector<1x8x16x128xf32>
    %18 = vector.broadcast %12 : vector<1x1x1x128xf32> to vector<1x8x16x128xf32>
    %19 = arith.addf %17, %18 : vector<1x8x16x128xf32>
    %cst = arith.constant 0.000000e+00 : f32
    %20 = vector.broadcast %cst : f32 to vector<1x8x16x128xf32>
    %21 = arith.maximumf %19, %20 : vector<1x8x16x128xf32>
    %c0_14 = arith.constant 0 : index
    %c0_15 = arith.constant 0 : index
    %c0_16 = arith.constant 0 : index
    %c0_17 = arith.constant 0 : index
    %22 = vector.load %arg4[%c0_14, %c0_15, %c0_16, %c0_17] : memref<1x8x16x128xf32, #tpu.memory_space<vmem>>, vector<1x8x16x128xf32>
    tpu.vector_store %arg4[%c0_14, %c0_15, %c0_16, %c0_17], %21 {strides = array<i32>} : memref<1x8x16x128xf32, #tpu.memory_space<vmem>>, vector<1x8x16x128xf32>,
    return
  }
  func.func @transform_0(%arg0: i32) -> (i32, i32, i32, i32) {
    %c0_i32 = arith.constant 0 : i32
    %c0_i32_0 = arith.constant 0 : i32
    %c0_i32_1 = arith.constant 0 : i32
    %c0_i32_2 = arith.constant 0 : i32
    return %arg0, %c0_i32, %c0_i32_0, %c0_i32_1 : i32, i32, i32, i32
  }
  func.func @transform_1(%arg0: i32) -> (i32, i32, i32, i32) {
    %c0_i32 = arith.constant 0 : i32
    %c0_i32_0 = arith.constant 0 : i32
    %c0_i32_1 = arith.constant 0 : i32
    %c0_i32_2 = arith.constant 0 : i32
    return %arg0, %c0_i32, %c0_i32_0, %c0_i32_1 : i32, i32, i32, i32
  }
  func.func @transform_2(%arg0: i32) -> (i32, i32, i32) {
    %c0_i32 = arith.constant 0 : i32
    %c0_i32_0 = arith.constant 0 : i32
    %c0_i32_1 = arith.constant 0 : i32
    %c0_i32_2 = arith.constant 0 : i32
    return %c0_i32, %c0_i32_0, %c0_i32_1 : i32, i32, i32
  }
  func.func @transform_3(%arg0: i32) -> (i32, i32, i32, i32) {
    %c0_i32 = arith.constant 0 : i32
    %c0_i32_0 = arith.constant 0 : i32
    %c0_i32_1 = arith.constant 0 : i32
    %c0_i32_2 = arith.constant 0 : i32
    return %arg0, %c0_i32, %c0_i32_0, %c0_i32_1 : i32, i32, i32, i32
  }
}

</mosaic_0001>

<bundles_post_ra>
// kernel: resblock_forward.5
= control target key start
LH: loop header
LB: loop body
LE: loop exit
PB: predicated region body
PF: predicated region fallthrough
CT: control target
= control target key end

     0   :  { %s566_s12 = smov 0   ;;  %s691_s0 = inlined_call_operand.vmem [shape: bf16[4,8,16,128], index: 0, kind: input, shape index: {}]   ;;  %s692_s1 = inlined_call_operand.vmem [shape: bf16[4,8,16,128], index: 1, kind: input, shape index: {}]   ;;  %s693_s2 = inlined_call_operand.vmem [shape: f32[1,8,128], index: 2, kind: input, shape index: {}]   ;;  %s694_s3 = inlined_call_operand.vmem [shape: f32[4,8,16,128], index: 3, kind: output, shape index: {}]  }
   0x1 LB: > { %s433_s13 = sadd.s32 4294967295, %s544_s12   ;;  %p437_p0 = scmp.ge.s32.totalorder %s544_s12, 1  ;;  %s544_s12 = sphi %s566_s12, %s13_s12  }
   0x2   : > { %p147_p1 = scmp.lt.s32.totalorder %s544_s12, 5 }
   0x4   : > { %p148_p2 = pnand %p437_p0, %p147_p1 }
   0x5   : > { %p176_p3 = scmp.lt.s32.totalorder (!%p148_p2), %s433_s13, 3  ;;  %v590_v0 = vld [vmem:[%s693_s2] ss:$0 sm:$0xff] (!%p148_p2)  ;;  %v595_v1 = vld [vmem:[%s693_s2 + $0x1] ss:$0 sm:$0xff] (!%p148_p2) }
   0x6   : > { %151 = sbr.rel (%p148_p2) target bundleno = 52 (0x34), region = 32  ;;  %v610_v20 = vld [vmem:[%s693_s2 + $0x2] ss:$0 sm:$0xff] (!%p148_p2) }
   0xd   : > { %s696_s13 = smov (!%p176_p3, %s433_s13), 3 }
   0xe   : > { %s449_s14 = sshll.u32 %s696_s13, 6  ;;  %s451_s27 = sshll.u32 %s696_s13, 7 }
   0xf   : > { %s580_s17 = scalar_lea.vmem %s691_s0, %s449_s14  ;;  %s585_s20 = scalar_lea.vmem %s692_s1, %s449_s14 }
  0x10   : > { %v453_v2 = vld [vmem:[%s580_s17] sm:$0xff]   ;;  %v516_v4 = vld [vmem:[%s580_s17 + $0x8] sm:$0xff]   ;;  %v517_v14 = vld [vmem:[%s580_s17 + $0x10] sm:$0xff]   ;;  %s626_s30 = scalar_lea.vmem %s694_s3, %s451_s27 }
  0x11   : > { %v485_v3 = vld [vmem:[%s585_s20] sm:$0xff]   ;;  %v454_v5 = vunpack.c.l.bf16 %v453_v2  ;;  %v455_v7 = vunpack.c.h.bf16 %v453_v2  ;;  %v523_v9 = vld [vmem:[%s585_s20 + $0x8] sm:$0xff]   ;;  %v458_v10 = vunpack.c.l.bf16 %v516_v4  ;;  %v459_v12 = vunpack.c.h.bf16 %v516_v4  ;;  %v524_v15 = vld [vmem:[%s585_s20 + $0x10] sm:$0xff]  }
  0x12   : > { %v486_v6 = vunpack.c.l.bf16 %v485_v3  ;;  %v487_v8 = vunpack.c.h.bf16 %v485_v3  ;;  %v490_v11 = vunpack.c.l.bf16 %v523_v9  ;;  %v491_v13 = vunpack.c.h.bf16 %v523_v9  ;;  %v518_v33 = vld [vmem:[%s580_s17 + $0x18] sm:$0xff]   ;;  %v519_v47 = vld [vmem:[%s580_s17 + $0x20] sm:$0xff]   ;;  %v520_v61 = vld [vmem:[%s580_s17 + $0x28] sm:$0xff]  }
  0x13   : > { %v262_v16 = vmul.f32 %v454_v5, %v590_v0  ;;  %v263_v18 = vmul.f32 %v455_v7, %v590_v0  ;;  %v264_v21 = vmul.f32 %v458_v10, %v590_v0  ;;  %v265_v23 = vmul.f32 %v459_v12, %v590_v0  ;;  %v525_v38 = vld [vmem:[%s585_s20 + $0x18] sm:$0xff]   ;;  %v526_v48 = vld [vmem:[%s585_s20 + $0x20] sm:$0xff]   ;;  %v527_v4 = vld [vmem:[%s585_s20 + $0x28] sm:$0xff]  }
  0x14   : > { %v282_v17 = vmul.f32 %v486_v6, %v595_v1  ;;  %v283_v19 = vmul.f32 %v487_v8, %v595_v1  ;;  %v284_v22 = vmul.f32 %v490_v11, %v595_v1  ;;  %v285_v24 = vmul.f32 %v491_v13, %v595_v1 }
  0x15   : > { %v462_v27 = vunpack.c.l.bf16 %v517_v14  ;;  %v494_v28 = vunpack.c.l.bf16 %v524_v15  ;;  %v463_v31 = vunpack.c.h.bf16 %v517_v14  ;;  %v495_v32 = vunpack.c.h.bf16 %v524_v15 }
  0x16   : > { %v298_v25 = vadd.f32 %v282_v17, %v262_v16  ;;  %v299_v26 = vadd.f32 %v283_v19, %v263_v18  ;;  %v300_v29 = vadd.f32 %v284_v22, %v264_v21  ;;  %v301_v30 = vadd.f32 %v285_v24, %v265_v23  ;;  %v521_v17 = vld [vmem:[%s580_s17 + $0x30] sm:$0xff]  }
  0x17   : > { %v266_v36 = vmul.f32 %v462_v27, %v590_v0  ;;  %v286_v37 = vmul.f32 %v494_v28, %v595_v1  ;;  %v267_v41 = vmul.f32 %v463_v31, %v590_v0  ;;  %v287_v42 = vmul.f32 %v495_v32, %v595_v1  ;;  %v528_v23 = vld [vmem:[%s585_s20 + $0x30] sm:$0xff]   ;;  %v522_v32 = vld [vmem:[%s580_s17 + $0x38] sm:$0xff]  }
  0x18   : > { %v318_v34 = vadd.f32 %v610_v20, %v298_v25  ;;  %v319_v35 = vadd.f32 %v610_v20, %v299_v26  ;;  %v320_v39 = vadd.f32 %v610_v20, %v300_v29  ;;  %v321_v40 = vadd.f32 %v610_v20, %v301_v30 }
  0x19   : > { %v302_v45 = vadd.f32 %v286_v37, %v266_v36  ;;  %v466_v46 = vunpack.c.l.bf16 %v518_v33  ;;  %v303_v51 = vadd.f32 %v287_v42, %v267_v41  ;;  %v498_v52 = vunpack.c.l.bf16 %v525_v38  ;;  %v529_v37 = vld [vmem:[%s585_s20 + $0x38] sm:$0xff]  }
  0x1a   : > { %v334_v43 = vmax.f32 %v318_v34, 0.0  ;;  %v335_v44 = vmax.f32 %v319_v35, 0.0  ;;  %v336_v49 = vmax.f32 %v320_v39, 0.0  ;;  %v337_v50 = vmax.f32 %v321_v40, 0.0 }
  0x1b   : > { %v322_v53 = vadd.f32 %v610_v20, %v302_v45  ;;  %v268_v54 = vmul.f32 %v466_v46, %v590_v0  ;;  %v467_v55 = vunpack.c.h.bf16 %v518_v33  ;;  %v499_v56 = vunpack.c.h.bf16 %v525_v38 }
  0x1c   : > { %350 = vst [vmem:[%s626_s30] sm:$0xff] %v334_v43  ;;  %351 = vst [vmem:[%s626_s30 + $0x8] sm:$0xff] %v335_v44  ;;  %v323_v57 = vadd.f32 %v610_v20, %v303_v51  ;;  %v288_v58 = vmul.f32 %v498_v52, %v595_v1  ;;  %v470_v59 = vunpack.c.l.bf16 %v519_v47  ;;  %v502_v60 = vunpack.c.l.bf16 %v526_v48 }
  0x1d   : > { %352 = vst [vmem:[%s626_s30 + $0x10] sm:$0xff] %v336_v49  ;;  %353 = vst [vmem:[%s626_s30 + $0x18] sm:$0xff] %v337_v50  ;;  %v338_v62 = vmax.f32 %v322_v53, 0.0  ;;  %v269_v63 = vmul.f32 %v467_v55, %v590_v0  ;;  %v289_v2 = vmul.f32 %v499_v56, %v595_v1  ;;  %v471_v3 = vunpack.c.h.bf16 %v519_v47 }
  0x1e   : > { %v339_v5 = vmax.f32 %v323_v57, 0.0  ;;  %v304_v6 = vadd.f32 %v288_v58, %v268_v54  ;;  %v270_v7 = vmul.f32 %v470_v59, %v590_v0  ;;  %v290_v8 = vmul.f32 %v502_v60, %v595_v1 }
  0x1f   : > { %354 = vst [vmem:[%s626_s30 + $0x20] sm:$0xff] %v338_v62  ;;  %v305_v9 = vadd.f32 %v289_v2, %v269_v63  ;;  %v503_v10 = vunpack.c.h.bf16 %v526_v48  ;;  %v271_v11 = vmul.f32 %v471_v3, %v590_v0  ;;  %v474_v12 = vunpack.c.l.bf16 %v520_v61 }
  0x20   : > { %355 = vst [vmem:[%s626_s30 + $0x28] sm:$0xff] %v339_v5  ;;  %v324_v13 = vadd.f32 %v610_v20, %v304_v6  ;;  %v306_v14 = vadd.f32 %v290_v8, %v270_v7  ;;  %v506_v15 = vunpack.c.l.bf16 %v527_v4  ;;  %v475_v16 = vunpack.c.h.bf16 %v520_v61 }
  0x21   : > { %v325_v18 = vadd.f32 %v610_v20, %v305_v9  ;;  %v291_v19 = vmul.f32 %v503_v10, %v595_v1  ;;  %v272_v21 = vmul.f32 %v474_v12, %v590_v0  ;;  %v507_v22 = vunpack.c.h.bf16 %v527_v4 }
  0x22   : > { %v340_v24 = vmax.f32 %v324_v13, 0.0  ;;  %v326_v25 = vadd.f32 %v610_v20, %v306_v14  ;;  %v292_v26 = vmul.f32 %v506_v15, %v595_v1  ;;  %v273_v27 = vmul.f32 %v475_v16, %v590_v0 }
  0x23   : > { %v341_v28 = vmax.f32 %v325_v18, 0.0  ;;  %v307_v29 = vadd.f32 %v291_v19, %v271_v11  ;;  %v293_v30 = vmul.f32 %v507_v22, %v595_v1  ;;  %v478_v31 = vunpack.c.l.bf16 %v521_v17 }
  0x24   : > { %356 = vst [vmem:[%s626_s30 + $0x30] sm:$0xff] %v340_v24  ;;  %v342_v33 = vmax.f32 %v326_v25, 0.0  ;;  %v308_v34 = vadd.f32 %v292_v26, %v272_v21  ;;  %v510_v35 = vunpack.c.l.bf16 %v528_v23  ;;  %v479_v36 = vunpack.c.h.bf16 %v521_v17 }
  0x25   : > { %357 = vst [vmem:[%s626_s30 + $0x38] sm:$0xff] %v341_v28  ;;  %v327_v38 = vadd.f32 %v610_v20, %v307_v29  ;;  %v309_v39 = vadd.f32 %v293_v30, %v273_v27  ;;  %v274_v40 = vmul.f32 %v478_v31, %v590_v0  ;;  %v511_v41 = vunpack.c.h.bf16 %v528_v23 }
  0x26   : > { %358 = vst [vmem:[%s626_s30 + $0x40] sm:$0xff] %v342_v33  ;;  %v328_v42 = vadd.f32 %v610_v20, %v308_v34  ;;  %v294_v43 = vmul.f32 %v510_v35, %v595_v1  ;;  %v275_v44 = vmul.f32 %v479_v36, %v590_v0  ;;  %v482_v45 = vunpack.c.l.bf16 %v522_v32 }
  0x27   : > { %v343_v46 = vmax.f32 %v327_v38, 0.0  ;;  %v329_v47 = vadd.f32 %v610_v20, %v309_v39  ;;  %v295_v48 = vmul.f32 %v511_v41, %v595_v1  ;;  %v514_v49 = vunpack.c.l.bf16 %v529_v37 }
  0x28   : > { %v344_v50 = vmax.f32 %v328_v42, 0.0  ;;  %v310_v51 = vadd.f32 %v294_v43, %v274_v40  ;;  %v276_v52 = vmul.f32 %v482_v45, %v590_v0  ;;  %v483_v53 = vunpack.c.h.bf16 %v522_v32 }
  0x29   : > { %359 = vst [vmem:[%s626_s30 + $0x48] sm:$0xff] %v343_v46  ;;  %v345_v54 = vmax.f32 %v329_v47, 0.0  ;;  %v311_v55 = vadd.f32 %v295_v48, %v275_v44  ;;  %v296_v56 = vmul.f32 %v514_v49, %v595_v1  ;;  %v515_v57 = vunpack.c.h.bf16 %v529_v37 }
  0x2a   : > { %360 = vst [vmem:[%s626_s30 + $0x50] sm:$0xff] %v344_v50  ;;  %v330_v58 = vadd.f32 %v610_v20, %v310_v51  ;;  %v277_v59 = vmul.f32 %v483_v53, %v590_v0 }
  0x2b   : > { %361 = vst [vmem:[%s626_s30 + $0x58] sm:$0xff] %v345_v54  ;;  %v331_v60 = vadd.f32 %v610_v20, %v311_v55  ;;  %v312_v61 = vadd.f32 %v296_v56, %v276_v52  ;;  %v297_v62 = vmul.f32 %v515_v57, %v595_v1 }
  0x2c   : > { %v346_v63 = vmax.f32 %v330_v58, 0.0 }
  0x2d   : > { %v347_v2 = vmax.f32 %v331_v60, 0.0  ;;  %v332_v3 = vadd.f32 %v610_v20, %v312_v61  ;;  %v313_v4 = vadd.f32 %v297_v62, %v277_v59 }
  0x2e   : > { %362 = vst [vmem:[%s626_s30 + $0x60] sm:$0xff] %v346_v63 }
  0x2f   : > { %363 = vst [vmem:[%s626_s30 + $0x68] sm:$0xff] %v347_v2  ;;  %v348_v5 = vmax.f32 %v332_v3, 0.0  ;;  %v333_v6 = vadd.f32 %v610_v20, %v313_v4 }
  0x31   : > { %364 = vst [vmem:[%s626_s30 + $0x70] sm:$0xff] %v348_v5  ;;  %v349_v7 = vmax.f32 %v333_v6, 0.0 }
  0x33   : > { %365 = vst [vmem:[%s626_s30 + $0x78] sm:$0xff] %v349_v7 }
  0x34 PF: > { %s13_s12 = sadd.s32 1, %s544_s12  }
  0x35   : > { %p10_p4 = scmp.ge.s32.totalorder %s13_s12, 6  }
  0x37   :  { %12 = sbr.rel (!%p10_p4) target bundleno = 1 (0x1), region = 65 }

// kernel: resblock_forward.3
= control target key start
LH: loop header
LB: loop body
LE: loop exit
PB: predicated region body
PF: predicated region fallthrough
CT: control target
= control target key end

     0   :  { %s6041_s15 = smov 0   ;;  %s7085_s0 = inlined_call_operand.vmem [shape: bf16[4,10,18,128], index: 0, kind: input, shape index: {}]   ;;  %s7086_s1 = inlined_call_operand.vmem [shape: bf16[9,128,256], index: 1, kind: input, shape index: {}]   ;;  %s7087_s2 = inlined_call_operand.vmem [shape: bf16[4,8,16,128], index: 2, kind: output, shape index: {0}]   ;;  %s7088_s3 = inlined_call_operand.vmem [shape: bf16[4,8,16,128], index: 3, kind: output, shape index: {1}]   ;;  %s7089_s4 = inlined_call_operand.vmem [shape: f32[4,8,256], index: 4, kind: output, shape index: {2}]  }
   0x1 LB: > { %s4798_s16 = sadd.s32 4294967295, %s6013_s15   ;;  %p4802_p0 = scmp.ge.s32.totalorder %s6013_s15, 1  ;;  %s6013_s15 = sphi %s6041_s15, %s15_s15  }
   0x2   : > { %p167_p1 = scmp.lt.s32.totalorder %s6013_s15, 5 }
   0x4   : > { %p168_p2 = pnand %p4802_p0, %p167_p1 }
   0x5   : > { %v5751_v0 = vld [vmem:[%s7086_s1 + $0x4] ss:$8 sps:$4 sm:$0xff] (!%p168_p2)   ;;  %v6015_v2 = vmov (!%p168_p2), 0   ;;  %v5755_v3 = vld [vmem:[%s7086_s1] ss:$8 sps:$4 sm:$0xff] (!%p168_p2)   ;;  %p203_p3 = scmp.lt.s32.totalorder (!%p168_p2), %s4798_s16, 3 }
   0x6   : > { %171 = sbr.rel (%p168_p2) target bundleno = 555 (0x22b), region = 28  ;;  %v5753_v1 = vld [vmem:[%s7086_s1 + $0x204] ss:$8 sps:$4 sm:$0xff] (!%p168_p2)   ;;  %480 = vmatprep.mubr.bf16.mxu1 (!%p168_p2), %v6015_v2  ;;  %2407 = vmatprep.mubr.bf16.mxu0 (!%p168_p2), %v6015_v2  ;;  %v5756_v4 = vld [vmem:[%s7086_s1 + $0x200] ss:$8 sps:$4 sm:$0xff] (!%p168_p2)   ;;  %vm1230_vm3 = vcmask (!%p168_p2), 1042432  }
   0x7   : > { %448 = vmatprep.subr.bf16.mxu1 (!%p168_p2), %v5751_v0  ;;  %2375 = vmatprep.subr.bf16.mxu0 (!%p168_p2), %v5753_v1  ;;  %v5757_v5 = vld [vmem:[%s7086_s1 + $0x14] ss:$8 sps:$4 sm:$0xff] (!%p168_p2)   ;;  %v5761_v7 = vld [vmem:[%s7086_s1 + $0x10] ss:$8 sps:$4 sm:$0xff] (!%p168_p2)   ;;  %v5763_v9 = vld [vmem:[%s7086_s1 + $0x24] ss:$8 sps:$4 sm:$0xff] (!%p168_p2)  }
   0x8   : > { %449 = vmatpush1.bf16.msra.mxu1 (!%p168_p2), %v5755_v3  ;;  %2376 = vmatpush1.bf16.msra.mxu0 (!%p168_p2), %v5756_v4  ;;  %v5759_v6 = vld [vmem:[%s7086_s1 + $0x214] ss:$8 sps:$4 sm:$0xff] (!%p168_p2)   ;;  %v5762_v8 = vld [vmem:[%s7086_s1 + $0x210] ss:$8 sps:$4 sm:$0xff] (!%p168_p2)   ;;  %v5765_v10 = vld [vmem:[%s7086_s1 + $0x224] ss:$8 sps:$4 sm:$0xff] (!%p168_p2)  }
   0x9   : > { %450 = vmatprep.subr.bf16.mxu1 (!%p168_p2), %v5757_v5  ;;  %2377 = vmatprep.subr.bf16.mxu0 (!%p168_p2), %v5759_v6  ;;  %v5767_v11 = vld [vmem:[%s7086_s1 + $0x20] ss:$8 sps:$4 sm:$0xff] (!%p168_p2)   ;;  %v5769_v13 = vld [vmem:[%s7086_s1 + $0x34] ss:$8 sps:$4 sm:$0xff] (!%p168_p2)   ;;  %v5773_v15 = vld [vmem:[%s7086_s1 + $0x30] ss:$8 sps:$4 sm:$0xff] (!%p168_p2)  }
   0xa   : > { %v5768_v12 = vld [vmem:[%s7086_s1 + $0x220] ss:$8 sps:$4 sm:$0xff] (!%p168_p2)   ;;  %v5771_v14 = vld [vmem:[%s7086_s1 + $0x234] ss:$8 sps:$4 sm:$0xff] (!%p168_p2)   ;;  %v5774_v16 = vld [vmem:[%s7086_s1 + $0x230] ss:$8 sps:$4 sm:$0xff] (!%p168_p2)  }
   0xb   : > { %v5775_v17 = vld [vmem:[%s7086_s1 + $0x44] ss:$8 sps:$4 sm:$0xff] (!%p168_p2)   ;;  %v5779_v19 = vld [vmem:[%s7086_s1 + $0x40] ss:$8 sps:$4 sm:$0xff] (!%p168_p2)   ;;  %v5781_v21 = vld [vmem:[%s7086_s1 + $0x54] ss:$8 sps:$4 sm:$0xff] (!%p168_p2)  }
   0xc   : > { %451 = vmatpush1.bf16.msra.mxu1 (!%p168_p2), %v5761_v7  ;;  %2378 = vmatpush1.bf16.msra.mxu0 (!%p168_p2), %v5762_v8  ;;  %v5777_v18 = vld [vmem:[%s7086_s1 + $0x244] ss:$8 sps:$4 sm:$0xff] (!%p168_p2)   ;;  %v5780_v20 = vld [vmem:[%s7086_s1 + $0x240] ss:$8 sps:$4 sm:$0xff] (!%p168_p2)   ;;  %v5783_v22 = vld [vmem:[%s7086_s1 + $0x254] ss:$8 sps:$4 sm:$0xff] (!%p168_p2)  }
   0xd   : > { %452 = vmatprep.subr.bf16.mxu1 %v5763_v9  ;;  %2379 = vmatprep.subr.bf16.mxu0 %v5765_v10  ;;  %s7095_s16 = smov (!%p203_p3, %s4798_s16), 3  ;;  %v5785_v23 = vld [vmem:[%s7086_s1 + $0x50] ss:$8 sps:$4 sm:$0xff]   ;;  %vm649_vm0 = vsmask.f32 3328  ;;  %vm1231_vm4 = vcmask 1046532  }
   0xe   : > { %s5741_s9 = smul.u32 120, %s7095_s16  ;;  %v5786_v24 = vld [vmem:[%s7086_s1 + $0x250] ss:$8 sps:$4 sm:$0xff]   ;;  %v5787_v25 = vld [vmem:[%s7086_s1 + $0x64] ss:$8 sps:$4 sm:$0xff]   ;;  %vm6281_vm5 = vmor %vm1230_vm3, %vm1231_vm4  ;;  %s5342_s23 = sshll.u32 %s7095_s16, 4 }
   0xf   : > { %v5789_v26 = vld [vmem:[%s7086_s1 + $0x264] ss:$8 sps:$4 sm:$0xff]   ;;  %v5791_v27 = vld [vmem:[%s7086_s1 + $0x60] ss:$8 sps:$4 sm:$0xff]   ;;  %vm650_vm1 = vsmask.f32 7440  ;;  %s222_s26 = scalar_lea.vmem %s7089_s4, %s5342_s23 }
  0x10   : > { %453 = vmatpush1.bf16.msra.mxu1 %v5767_v11  ;;  %2380 = vmatpush1.bf16.msra.mxu0 %v5768_v12  ;;  %s6136_s22 = scalar_lea.vmem %s7085_s0, %s5741_s9  ;;  %v5792_v28 = vld [vmem:[%s7086_s1 + $0x260] ss:$8 sps:$4 sm:$0xff]   ;;  %v5793_v29 = vld [vmem:[%s7086_s1 + $0x74] ss:$8 sps:$4 sm:$0xff]   ;;  %v5797_v38 = vld [vmem:[%s7086_s1 + $0x70] ss:$8 sps:$4 sm:$0xff]  }
  0x11   : > { %454 = vmatprep.subr.bf16.mxu1 %v5769_v13  ;;  %2381 = vmatprep.subr.bf16.mxu0 %v5771_v14  ;;  %v5795_v30 = vld [vmem:[%s7086_s1 + $0x274] ss:$8 sps:$4 sm:$0xff]   ;;  %v4978_v31 = vld [vmem:[%s6136_s22 + $0xc] sm:$0xf]  ;;  %v4979_v32 = vld [vmem:[%s6136_s22 + $0x10] sm:$0xf] }
  0x12   : > { %v4980_v33 = vld [vmem:[%s6136_s22 + $0x14] sm:$0x1]  ;;  %v2023_v34 = vshrl.u32 %v4978_v31, 16  ;;  %v2026_v35 = vshll.u32 %v4978_v31, 16  ;;  %v2032_v36 = vshll.u32 %v4979_v32, 16  ;;  %v2036_v37 = vshrl.u32 %v4979_v32, 16  ;;  %vm6174_vm2 = vmor %vm649_vm0, %vm650_vm1 }
  0x13   : > { %v5798_v39 = vld [vmem:[%s7086_s1 + $0x270] ss:$8 sps:$4 sm:$0xff]   ;;  %v2042_v40 = vshll.u32 %v4980_v33, 16  ;;  %v5802_v45 = vld [vmem:[%s7086_s1 + $0x84] ss:$8 sps:$4 sm:$0xff]   ;;  %vm4669_vm6 = vcmask 1040384  }
  0x14   : > { %455 = vmatpush1.bf16.msra.mxu1 %v5773_v15  ;;  %2382 = vmatpush1.bf16.msra.mxu0 %v5774_v16  ;;  %v2025_v41 = vrot.slane %v2023_v34, 4  ;;  %v2028_v42 = vrot.slane %v2026_v35, 5  ;;  %v2034_v43 = vrot.slane %v2032_v36, 5  ;;  %v2038_v44 = vrot.slane %v2036_v37, 4  ;;  %v5805_v46 = vld [vmem:[%s7086_s1 + $0x284] ss:$8 sps:$4 sm:$0xff]  }
  0x15   : > { %456 = vmatprep.subr.bf16.mxu1 %v5775_v17  ;;  %2383 = vmatprep.subr.bf16.mxu0 %v5777_v18  ;;  %v5799_v47 = vld [vmem:[%s6136_s22] sm:$0xff]   ;;  %v2044_v50 = vrot.slane %v2042_v40, 5  ;;  %v4981_v53 = vld [vmem:[%s6136_s22 + $0x18] sm:$0xf]  ;;  %v4982_v56 = vld [vmem:[%s6136_s22 + $0x1c] sm:$0xf] }
  0x16   : > { %v2029_v48 = vor.u32 %v2028_v42, %v2025_v41  ;;  %v2039_v49 = vor.u32 %v2038_v44, %v2034_v43  ;;  %v5800_v51 = vld [vmem:[%s7086_s1 + $0x80] ss:$8 sps:$4 sm:$0xff]   ;;  %v2047_v58 = vshrl.u32 %v4981_v53, 16  ;;  %v2050_v59 = vshll.u32 %v4981_v53, 16  ;;  %v5808_v4 = vld [vmem:[%s7086_s1 + $0x294] ss:$8 sps:$4 sm:$0xff]  }
  0x17   : > { %v4983_v57 = vld [vmem:[%s6136_s22 + $0x20] sm:$0x1]  ;;  %v2056_v60 = vshll.u32 %v4982_v56, 16  ;;  %v2060_v61 = vshrl.u32 %v4982_v56, 16  ;;  %v5806_v8 = vld [vmem:[%s7086_s1 + $0x290] ss:$8 sps:$4 sm:$0xff]  }
  0x18   : > { %457 = vmatpush1.bf16.msra.mxu1 %v5779_v19  ;;  %2384 = vmatpush1.bf16.msra.mxu0 %v5780_v20  ;;  %v2030_v54 = vrot.slane %v2029_v48, 4  ;;  %v2040_v55 = vrot.slane %v2039_v49, 4  ;;  %v5803_v0 = vld [vmem:[%s7086_s1 + $0x280] ss:$8 sps:$4 sm:$0xff]   ;;  %v2066_v1 = vshll.u32 %v4983_v57, 16  ;;  %v2049_v5 = vrot.slane %v2047_v58, 4 }
  0x19   : > { %458 = vmatprep.subr.bf16.mxu1 %v5781_v21  ;;  %2385 = vmatprep.subr.bf16.mxu0 %v5783_v22  ;;  %v2052_v6 = vrot.slane %v2050_v59, 5  ;;  %v2058_v7 = vrot.slane %v2056_v60, 5  ;;  %v5812_v9 = vld [vmem:[%s7086_s1 + $0x94] ss:$8 sps:$4 sm:$0xff]   ;;  %v2062_v10 = vrot.slane %v2060_v61, 4  ;;  %v5809_v13 = vld [vmem:[%s6136_s22 + $0xc] sm:$0xff]  }
  0x1a   : > { %v2035_v62 = vsel %vm6174_vm2, %v2030_v54, %v2034_v43  ;;  %v2045_v63 = vsel %vm6174_vm2, %v2040_v55, %v2044_v50  ;;  %v5810_v11 = vld [vmem:[%s7086_s1 + $0x90] ss:$8 sps:$4 sm:$0xff]   ;;  %v2068_v15 = vrot.slane %v2066_v1, 5  ;;  %v5815_v16 = vld [vmem:[%s7086_s1 + $0x2a4] ss:$8 sps:$4 sm:$0xff]   ;;  %vm4672_vm7 = vcmask 1041408  }
  0x1b   : > { %v5018_v3 = vcombine.low %v2035_v62, %v2045_v63  ;;  %v2053_v12 = vor.u32 %v2052_v6, %v2049_v5  ;;  %v2063_v14 = vor.u32 %v2062_v10, %v2058_v7  ;;  %v5822_v17 = vld [vmem:[%s7086_s1 + $0xa4] ss:$8 sps:$4 sm:$0xff]   ;;  %v4985_v20 = vld [vmem:[%s6136_s22 + $0x28] sm:$0xf]  ;;  %v5818_v35 = vld [vmem:[%s7086_s1 + $0x2b4] ss:$8 sps:$4 sm:$0xff]  }
  0x1c   : > { %459 = vmatpush1.bf16.msra.mxu1 %v5785_v23  ;;  %2386 = vmatpush1.bf16.msra.mxu0 %v5786_v24  ;;  %v4984_v19 = vld [vmem:[%s6136_s22 + $0x24] sm:$0xf]  ;;  %v4986_v22 = vld [vmem:[%s6136_s22 + $0x2c] sm:$0x1]  ;;  %v5820_v36 = vld [vmem:[%s7086_s1 + $0xa0] ss:$8 sps:$4 sm:$0xff]  }
  0x1d   : > { %460 = vmatprep.subr.bf16.mxu1 %v5787_v25  ;;  %2387 = vmatprep.subr.bf16.mxu0 %v5789_v26  ;;  %v2054_v18 = vrot.slane %v2053_v12, 4  ;;  %v2064_v21 = vrot.slane %v2063_v14, 4  ;;  %v2071_v23 = vshrl.u32 %v4984_v19, 16  ;;  %v2074_v24 = vshll.u32 %v4984_v19, 16  ;;  %v5825_v42 = vld [vmem:[%s7086_s1 + $0x2c4] ss:$8 sps:$4 sm:$0xff]  }
  0x1e   : > { %v2080_v25 = vshll.u32 %v4985_v20, 16  ;;  %v5830_v43 = vld [vmem:[%s7086_s1 + $0xb0] ss:$8 sps:$4 sm:$0xff]   ;;  %v4988_v48 = vld [vmem:[%s6136_s22 + $0x34] sm:$0xf] }
  0x1f   : > { %v2059_v26 = vsel %vm6174_vm2, %v2054_v18, %v2058_v7  ;;  %v2073_v31 = vrot.slane %v2071_v23, 4  ;;  %v2076_v32 = vrot.slane %v2074_v24, 5  ;;  %v4989_v49 = vld [vmem:[%s6136_s22 + $0x38] sm:$0x1]  ;;  %v2104_v55 = vshll.u32 %v4988_v48, 16 }
  0x20   : > { %461 = vmatpush1.bf16.msra.mxu1 %v5791_v27  ;;  %2388 = vmatpush1.bf16.msra.mxu0 %v5792_v28  ;;  %v2084_v27 = vshrl.u32 %v4985_v20, 16  ;;  %v2090_v28 = vshll.u32 %v4986_v22, 16  ;;  %v2082_v33 = vrot.slane %v2080_v25, 5  ;;  %v2108_v56 = vshrl.u32 %v4988_v48, 16  ;;  %v5823_v61 = vld [vmem:[%s7086_s1 + $0x2c0] ss:$8 sps:$4 sm:$0xff]  }
  0x21   : > { %462 = vmatprep.subr.bf16.mxu1 %v5793_v29  ;;  %2389 = vmatprep.subr.bf16.mxu0 %v5795_v30  ;;  %v2069_v29 = vsel %vm6174_vm2, %v2064_v21, %v2068_v15  ;;  %v5813_v30 = vld [vmem:[%s7086_s1 + $0x2a0] ss:$8 sps:$4 sm:$0xff]   ;;  %v2114_v59 = vshll.u32 %v4989_v49, 16  ;;  %v2106_v63 = vrot.slane %v2104_v55, 5  ;;  %v5828_v1 = vld [vmem:[%s7086_s1 + $0x2d4] ss:$8 sps:$4 sm:$0xff]  }
  0x22   : > { %v5019_v34 = vcombine.low %v2059_v26, %v2069_v29  ;;  %v2086_v37 = vrot.slane %v2084_v27, 4  ;;  %v2092_v41 = vrot.slane %v2090_v28, 5  ;;  %v5840_v7 = vld [vmem:[%s7086_s1 + $0xc0] ss:$8 sps:$4 sm:$0xff]   ;;  %v5043_v10 = vld [vmem:[%s6136_s22 + $0x10] sm:$0xf] }
  0x23   : > { %v2116_v6 = vrot.slane %v2114_v59, 5  ;;  %v2602_v14 = vrot.slane %v5043_v10, 5  ;;  %v5044_v15 = vld [vmem:[%s6136_s22 + $0x14] sm:$0x1]  ;;  %v5833_v19 = vld [vmem:[%s7086_s1 + $0x2e0] ss:$8 sps:$4 sm:$0xff]  }
  0x24   : > { %463 = vmatpush1.bf16.msra.mxu1 %v5797_v38  ;;  %2390 = vmatpush1.bf16.msra.mxu0 %v5798_v39  ;;  %v5816_v38 = vld [vmem:[%s7086_s1 + $0x2b0] ss:$8 sps:$4 sm:$0xff]   ;;  %v2077_v39 = vor.u32 %v2076_v32, %v2073_v31  ;;  %v2087_v40 = vor.u32 %v2086_v37, %v2082_v33  ;;  %v5838_v21 = vld [vmem:[%s7086_s1 + $0x2f4] ss:$8 sps:$4 sm:$0xff]   ;;  %v2605_v25 = vrot.slane %v5044_v15, 5 }
  0x25   : > { %1005 = vmatprep.subr.bf16.mxu1 %v5802_v45  ;;  %2817 = vmatprep.subr.bf16.mxu0 %v5805_v46  ;;  %v5832_v45 = vld [vmem:[%s7086_s1 + $0xb4] ss:$8 sps:$4 sm:$0xff]   ;;  %v4987_v46 = vld [vmem:[%s6136_s22 + $0x30] sm:$0xf]  ;;  %v2604_v24 = vrot.slane %v2602_v14, 4 }
  0x26   : > { %v2078_v44 = vrot.slane %v2077_v39, 4  ;;  %v2095_v50 = vshrl.u32 %v4987_v46, 16  ;;  %v2098_v54 = vshll.u32 %v4987_v46, 16  ;;  %v5849_v26 = vld [vmem:[%s7086_s1 + $0xd4] ss:$8 sps:$4 sm:$0xff]  }
  0x27   : > { %481 = vmatmul.mubr.bf16.vlgmr.msra.gmra.mrb[0].mxu1 %v5799_v47  ;;  %2408 = vmatmul.mubr.bf16.vlgmr.msra.gmra.mrb[0].mxu0 %v5018_v3  ;;  %v2088_v47 = vrot.slane %v2087_v40, 4  ;;  %v5826_v3 = vld [vmem:[%s7086_s1 + $0x2d0] ss:$8 sps:$4 sm:$0xff]   ;;  %v5046_v28 = vld [vmem:[%s6136_s22 + $0x1c] sm:$0xf]  ;;  %v2606_v32 = vsel %vm6281_vm5, %v2604_v24, %v2605_v25 }
  0x28   : > { %1006 = vmatpush1.bf16.msra.mxu1 %v5800_v51  ;;  %2818 = vmatpush1.bf16.msra.mxu0 %v5803_v0  ;;  %v5819_v51 = vld [vmem:[%s6136_s22 + $0x18] sm:$0xff]   ;;  %v2083_v53 = vsel %vm6174_vm2, %v2078_v44, %v2082_v33  ;;  %v2097_v58 = vrot.slane %v2095_v50, 4  ;;  %v2100_v62 = vrot.slane %v2098_v54, 5  ;;  %v2110_v0 = vrot.slane %v2108_v56, 4  ;;  %v5047_v33 = vld [vmem:[%s6136_s22 + $0x20] sm:$0x1] }
  0x29   : > { %490 = vmatprep.mubr.bf16.mxu1 %v6015_v2  ;;  %2819 = vmatprep.subr.bf16.mxu0 %v5808_v4  ;;  %v2093_v57 = vsel %vm6174_vm2, %v2088_v47, %v2092_v41  ;;  %v5847_v27 = vld [vmem:[%s7086_s1 + $0xd0] ss:$8 sps:$4 sm:$0xff]   ;;  %v5856_v37 = vld [vmem:[%s7086_s1 + $0xe4] ss:$8 sps:$4 sm:$0xff]   ;;  %v5843_v40 = vld [vmem:[%s7086_s1 + $0x300] ss:$8 sps:$4 sm:$0xff]  }
  0x2a   : > { %2417 = vmatprep.mubr.bf16.mxu0 %v6015_v2  ;;  %1007 = vmatprep.subr.bf16.mxu1 %v5812_v9  ;;  %v5020_v60 = vcombine.low %v2083_v53, %v2093_v57  ;;  %v2101_v4 = vor.u32 %v2100_v62, %v2097_v58  ;;  %v2111_v5 = vor.u32 %v2110_v0, %v2106_v63  ;;  %v5842_v9 = vld [vmem:[%s7086_s1 + $0xc4] ss:$8 sps:$4 sm:$0xff]   ;;  %v5836_v29 = vld [vmem:[%s7086_s1 + $0x2f0] ss:$8 sps:$4 sm:$0xff]   ;;  %v5863_v46 = vld [vmem:[%s7086_s1 + $0xf4] ss:$8 sps:$4 sm:$0xff]  }
  0x2b   : > { %v5861_v47 = vld [vmem:[%s7086_s1 + $0xf0] ss:$8 sps:$4 sm:$0xff]   ;;  %v5846_v48 = vld [vmem:[%s6136_s22 + $0x3c] sm:$0xff]   ;;  %v5048_v53 = vld [vmem:[%s6136_s22 + $0x24] sm:$0xe] }
  0x2c   : > { %1008 = vmatpush1.bf16.msra.mxu1 %v5810_v11  ;;  %2820 = vmatpush1.bf16.msra.mxu0 %v5806_v8  ;;  %v5835_v8 = vld [vmem:[%s7086_s1 + $0x2e4] ss:$8 sps:$4 sm:$0xff]   ;;  %v2102_v11 = vrot.slane %v2101_v4, 4  ;;  %v2112_v12 = vrot.slane %v2111_v5, 4  ;;  %v5052_v57 = vld [vmem:[%s6136_s22 + $0x34] sm:$0xf] }
  0x2d   : > { %1009 = vmatprep.subr.bf16.mxu1 %v5822_v17  ;;  %2821 = vmatprep.subr.bf16.mxu0 %v5815_v16  ;;  %v5829_v16 = vld [vmem:[%s6136_s22 + $0x24] sm:$0xff]   ;;  %v5050_v55 = vld [vmem:[%s6136_s22 + $0x2c] sm:$0x1]  ;;  %v625_v58 = vld [vmem:[%s6136_s22] sm:$0xf]  ;;  %v5068_v62 = vrot.slane %v5048_v53, 9 }
  0x2e   : > { %v2107_v17 = vsel %vm6174_vm2, %v2102_v11, %v2106_v63  ;;  %v2117_v18 = vsel %vm6174_vm2, %v2112_v12, %v2116_v6  ;;  %v5859_v56 = vld [vmem:[%s7086_s1 + $0x324] ss:$8 sps:$4 sm:$0xff]   ;;  %v2619_v0 = vrot.slane %v5050_v55, 5  ;;  %v653_v4 = vshrl.u32 %v625_v58, 16  ;;  %v5051_v6 = vld [vmem:[%s6136_s22 + $0x30] sm:$0xe] }
  0x2f   : > { %491 = vmatmul.mubr.bf16.gmra.mrb[4].mxu1 %v5809_v13  ;;  %2418 = vmatmul.mubr.bf16.gmra.mrb[4].mxu0 %v5019_v34  ;;  %v5042_v13 = vld [vmem:[%s6136_s22 + $0xc] sm:$0xe]  ;;  %v5021_v20 = vcombine.low %v2107_v17, %v2117_v18  ;;  %v2609_v34 = vrot.slane %v5046_v28, 5  ;;  %v656_v5 = vshll.u32 %v625_v58, 16  ;;  %v5053_v10 = vld [vmem:[%s6136_s22 + $0x38] sm:$0x1] }
  0x30   : > { %500 = vmatprep.mubr.bf16.mxu1 %v6015_v2  ;;  %2822 = vmatpush1.bf16.msra.mxu0 %v5813_v30  ;;  %v5066_v23 = vrot.slane %v5042_v13, 9  ;;  %v5045_v30 = vld [vmem:[%s6136_s22 + $0x18] sm:$0xe]  ;;  %v5069_v15 = vrot.slane %v5051_v6, 9  ;;  %v5872_v18 = vld [vmem:[%s7086_s1 + $0x344] ss:$8 sps:$4 sm:$0xff]  }
  0x31   : > { %2427 = vmatprep.mubr.bf16.mxu0 %v6015_v2  ;;  %2823 = vmatprep.subr.bf16.mxu0 %v5818_v35  ;;  %v5845_v35 = vld [vmem:[%s7086_s1 + $0x304] ss:$8 sps:$4 sm:$0xff]   ;;  %v5067_v41 = vrot.slane %v5045_v30, 9  ;;  %v2611_v44 = vrot.slane %v2609_v34, 4  ;;  %v5864_v13 = vld [vmem:[%s7086_s1 + $0x330] ss:$8 sps:$4 sm:$0xff]  }
  0x32   : > { %1010 = vmatpush1.bf16.msra.mxu1 %v5820_v36  ;;  %v2603_v31 = vsel %vm6281_vm5, %v5066_v23, %v2602_v14  ;;  %v5854_v36 = vld [vmem:[%s7086_s1 + $0xe0] ss:$8 sps:$4 sm:$0xff]   ;;  %v658_v17 = vrot.slane %v656_v5, 5  ;;  %v629_v30 = vld [vmem:[%s6136_s22 + $0x10] sm:$0xf] }
  0x33   : > { %1011 = vmatprep.subr.bf16.mxu1 %v5832_v45  ;;  %v5090_v39 = vcombine.low %v2603_v31, %v2606_v32  ;;  %v5049_v45 = vld [vmem:[%s6136_s22 + $0x28] sm:$0xf]  ;;  %v2610_v49 = vsel %vm6281_vm5, %v5067_v41, %v2609_v34  ;;  %v5054_v32 = vld [vmem:[%s6136_s22 + $0x3c] sm:$0xe]  ;;  %v686_v41 = vshll.u32 %v629_v30, 16 }
  0x34   : > { %2824 = vmatpush1.bf16.msra.mxu0 %v5816_v38  ;;  %v5839_v38 = vld [vmem:[%s6136_s22 + $0x30] sm:$0xff]   ;;  %v2616_v54 = vrot.slane %v5049_v45, 5  ;;  %v627_v14 = vld [vmem:[%s6136_s22 + $0x8] sm:$0x1]  ;;  %v5070_v45 = vrot.slane %v5054_v32, 9 }
  0x35   : > { %2825 = vmatprep.subr.bf16.mxu0 %v5825_v42  ;;  %v2612_v42 = vrot.slane %v5047_v33, 5  ;;  %v5870_v28 = vld [vmem:[%s7086_s1 + $0x340] ss:$8 sps:$4 sm:$0xff]   ;;  %v5878_v33 = vld [vmem:[%s7086_s1 + $0x354] ss:$8 sps:$4 sm:$0xff]   ;;  %v6396_v58 = vrot.slane %v686_v41, 5 }
  0x36   : > { %1012 = vmatpush1.bf16.msra.mxu1 %v5830_v43  ;;  %v5852_v43 = vld [vmem:[%s7086_s1 + $0x314] ss:$8 sps:$4 sm:$0xff]   ;;  %v2618_v63 = vrot.slane %v2616_v54, 4  ;;  %v2617_v11 = vsel %vm6281_vm5, %v5068_v62, %v2616_v54  ;;  %v5884_v62 = vld [vmem:[%s7086_s1 + $0x364] ss:$8 sps:$4 sm:$0xff]  }
  0x37   : > { %501 = vmatmul.mubr.bf16.gmra.mrb[8].mxu1 %v5819_v51  ;;  %2428 = vmatmul.mubr.bf16.gmra.mrb[8].mxu0 %v5020_v60  ;;  %v2613_v50 = vsel %vm6281_vm5, %v2611_v44, %v2612_v42  ;;  %v5850_v51 = vld [vmem:[%s7086_s1 + $0x310] ss:$8 sps:$4 sm:$0xff]   ;;  %v626_v60 = vld [vmem:[%s6136_s22 + $0x4] sm:$0xf]  ;;  %v690_v42 = vshrl.u32 %v629_v30, 16 }
  0x38   : > { %510 = vmatprep.mubr.bf16.mxu1 %v6015_v2  ;;  %2826 = vmatpush1.bf16.msra.mxu0 %v5823_v61  ;;  %v5091_v59 = vcombine.low %v2610_v49, %v2613_v50  ;;  %v5869_v61 = vld [vmem:[%s7086_s1 + $0x104] ss:$8 sps:$4 sm:$0xff]   ;;  %v2620_v12 = vsel %vm6281_vm5, %v2618_v63, %v2619_v0  ;;  %v630_v49 = vld [vmem:[%s6136_s22 + $0x14] sm:$0x1]  ;;  %v631_v50 = vld [vmem:[%s6136_s22 + $0x18] sm:$0xf] }
  0x39   : > { %2437 = vmatprep.mubr.bf16.mxu0 %v6015_v2  ;;  %2827 = vmatprep.subr.bf16.mxu0 %v5828_v1  ;;  %v5857_v1 = vld [vmem:[%s7086_s1 + $0x320] ss:$8 sps:$4 sm:$0xff]   ;;  %v5092_v25 = vcombine.low %v2617_v11, %v2620_v12  ;;  %v632_v55 = vld [vmem:[%s6136_s22 + $0x1c] sm:$0xf]  ;;  %v6405_v63 = vld [vmem:[%s6136_s22 + $0x4c] sm:$0xf] }
  0x3a   : > { %1013 = vmatprep.subr.bf16.mxu1 %v5842_v9  ;;  %v666_v9 = vshrl.u32 %v626_v60, 16  ;;  %v701_v0 = vshrl.u32 %v631_v50, 16  ;;  %v5057_v11 = vld [vmem:[%s6136_s22 + $0x48] sm:$0xe] }
  0x3b   : > { %1014 = vmatpush1.bf16.msra.mxu1 %v5840_v7  ;;  %v2623_v7 = vrot.slane %v5052_v57, 5 }
  0x3c   : > { %2828 = vmatpush1.bf16.msra.mxu0 %v5826_v3  ;;  %1015 = vmatprep.subr.bf16.mxu1 %v5849_v26  ;;  %v5866_v3 = vld [vmem:[%s7086_s1 + $0x334] ss:$8 sps:$4 sm:$0xff]   ;;  %v668_v24 = vrot.slane %v666_v9, 4  ;;  %v672_v26 = vshll.u32 %v627_v14, 16  ;;  %v2637_v14 = vrot.slane %v6405_v63, 5 }
  0x3d   : > { %2829 = vmatprep.subr.bf16.mxu0 %v5835_v8  ;;  %v662_v8 = vshll.u32 %v626_v60, 16  ;;  %v2624_v34 = vsel %vm6281_vm5, %v5069_v15, %v2623_v7  ;;  %v696_v60 = vshll.u32 %v630_v49, 16  ;;  %v633_v15 = vld [vmem:[%s6136_s22 + $0x20] sm:$0x1] }
  0x3e   : > { %v674_v44 = vrot.slane %v672_v26, 5  ;;  %v5890_v26 = vld [vmem:[%s7086_s1 + $0x374] ss:$8 sps:$4 sm:$0xff]   ;;  %v2639_v32 = vrot.slane %v2637_v14, 4 }
  0x3f   : > { %511 = vmatmul.mubr.bf16.gmra.mrb[12].mxu1 %v5829_v16  ;;  %2438 = vmatmul.mubr.bf16.gmra.mrb[12].mxu0 %v5021_v20  ;;  %v655_v16 = vrot.slane %v653_v4, 4  ;;  %v2625_v20 = vrot.slane %v2623_v7, 4  ;;  %v6369_v23 = vrot.slane %v662_v8, 5  ;;  %v714_v4 = vshrl.u32 %v632_v55, 16 }
  0x40   : > { %520 = vmatprep.mubr.bf16.mxu1 %v6015_v2  ;;  %2830 = vmatpush1.bf16.msra.mxu0 %v5833_v19  ;;  %v5853_v19 = vld [vmem:[%s6136_s22 + $0x48] sm:$0xff]   ;;  %v698_v12 = vrot.slane %v696_v60, 5  ;;  %v637_v60 = vld [vmem:[%s6136_s22 + $0x30] sm:$0xf] }
  0x41   : > { %2849 = vmatprep.mubr.bf16.mxu0 %v6015_v2  ;;  %2831 = vmatprep.subr.bf16.mxu0 %v5838_v21  ;;  %v2626_v21 = vrot.slane %v5053_v10, 5  ;;  %v659_v31 = vor.u32 %v658_v17, %v655_v16  ;;  %v5867_v16 = vld [vmem:[%s7086_s1 + $0x100] ss:$8 sps:$4 sm:$0xff]   ;;  %v703_v17 = vrot.slane %v701_v0, 4 }
  0x42   : > { %1016 = vmatpush1.bf16.msra.mxu1 %v5847_v27  ;;  %v5055_v27 = vld [vmem:[%s6136_s22 + $0x40] sm:$0xf] }
  0x43   : > { %1017 = vmatprep.subr.bf16.mxu1 %v5856_v37  ;;  %v5056_v37 = vld [vmem:[%s6136_s22 + $0x44] sm:$0x1] }
  0x44   : > { %2832 = vmatpush1.bf16.msra.mxu0 %v5836_v29  ;;  %v628_v29 = vld [vmem:[%s6136_s22 + $0xc] sm:$0xf] }
  0x45   : > { %3188 = vmatprep.subr.bf16.mxu0 %v5845_v35  ;;  %v2627_v35 = vsel %vm6281_vm5, %v2625_v20, %v2626_v21  ;;  %v716_v20 = vrot.slane %v714_v4, 4 }
  0x46   : > { %1018 = vmatpush1.bf16.msra.mxu1 %v5854_v36  ;;  %v669_v36 = vor.u32 %v668_v24, %v6369_v23  ;;  %v634_v24 = vld [vmem:[%s6136_s22 + $0x24] sm:$0xf] }
  0x47   : > { %521 = vmatmul.mubr.bf16.gmra.mrb[16].mxu1 %v5839_v38  ;;  %2850 = vmatmul.mubr.bf16.vlgmr.msra.gmra.mrb[0].mxu0 %v5090_v39  ;;  %v2630_v38 = vrot.slane %v5055_v27, 5  ;;  %v677_v39 = vshrl.u32 %v628_v29, 16  ;;  %v728_v41 = vshll.u32 %v634_v24, 16 }
  0x48   : > { %530 = vmatprep.mubr.bf16.mxu1 %v6015_v2  ;;  %3189 = vmatpush1.bf16.msra.mxu0 %v5843_v40  ;;  %v680_v40 = vshll.u32 %v628_v29, 16  ;;  %v670_v53 = vrot.slane %v669_v36, 4  ;;  %v5071_v29 = vrot.slane %v5057_v11, 9  ;;  %v5875_v36 = vld [vmem:[%s7086_s1 + $0x114] ss:$8 sps:$4 sm:$0xff]   ;;  %v752_v11 = vshll.u32 %v637_v60, 16 }
  0x49   : > { %2859 = vmatprep.mubr.bf16.mxu0 %v6015_v2  ;;  %3190 = vmatprep.subr.bf16.mxu0 %v5852_v43  ;;  %v5860_v43 = vld [vmem:[%s6136_s22 + $0x54] sm:$0xff]   ;;  %v2632_v54 = vrot.slane %v2630_v38, 4  ;;  %v2631_v7 = vsel %vm6281_vm5, %v5070_v45, %v2630_v38 }
  0x4a   : > { %1019 = vmatprep.subr.bf16.mxu1 %v5863_v46  ;;  %v5876_v46 = vld [vmem:[%s7086_s1 + $0x350] ss:$8 sps:$4 sm:$0xff]   ;;  %v682_v57 = vrot.slane %v680_v40, 5  ;;  %v675_v6 = vsel %vm6174_vm2, %v670_v53, %v674_v44  ;;  %v725_v40 = vshrl.u32 %v634_v24, 16  ;;  %v2638_v49 = vsel %vm6281_vm5, %v5071_v29, %v2637_v14 }
  0x4b   : > { %1020 = vmatpush1.bf16.msra.mxu1 %v5861_v47  ;;  %v660_v47 = vrot.slane %v659_v31, 4  ;;  %v635_v31 = vld [vmem:[%s6136_s22 + $0x28] sm:$0xf]  ;;  %v639_v24 = vld [vmem:[%s6136_s22 + $0x38] sm:$0x1] }
  0x4c   : > { %3191 = vmatpush1.bf16.msra.mxu0 %v5850_v51  ;;  %1450 = vmatprep.subr.bf16.mxu1 %v5869_v61  ;;  %v5093_v51 = vcombine.low %v2624_v34, %v2627_v35  ;;  %v5882_v61 = vld [vmem:[%s7086_s1 + $0x360] ss:$8 sps:$4 sm:$0xff]   ;;  %v6437_v34 = vld [vmem:[%s6136_s22 + $0x58] sm:$0xf]  ;;  %v734_v44 = vshll.u32 %v635_v31, 16  ;;  %v738_v45 = vshrl.u32 %v635_v31, 16 }
  0x4d   : > { %3192 = vmatprep.subr.bf16.mxu0 %v5859_v56  ;;  %v679_v56 = vrot.slane %v677_v39, 4  ;;  %v665_v5 = vsel %vm6174_vm2, %v660_v47, %v6369_v23  ;;  %v5873_v35 = vld [vmem:[%s7086_s1 + $0x110] ss:$8 sps:$4 sm:$0xff]   ;;  %v5060_v39 = vld [vmem:[%s6136_s22 + $0x54] sm:$0xe] }
  0x4e   : > { %v4850_v21 = vcombine.low %v665_v5, %v675_v6  ;;  %v5072_v53 = vrot.slane %v5060_v39, 9  ;;  %v6471_v63 = vrot.slane %v734_v44, 5  ;;  %v740_v0 = vrot.slane %v738_v45, 4  ;;  %v5891_v39 = vld [vmem:[%s7086_s1 + $0x140] ss:$8 sps:$4 sm:$0xff]  }
  0x4f   : > { %531 = vmatmul.mubr.bf16.gmra.mrb[20].mxu1 %v5846_v48  ;;  %2860 = vmatmul.mubr.bf16.gmra.mrb[4].mxu0 %v5091_v59  ;;  %v2633_v48 = vrot.slane %v5056_v37, 5  ;;  %v692_v59 = vrot.slane %v690_v42, 4  ;;  %v683_v9 = vor.u32 %v682_v57, %v679_v56  ;;  %v5881_v42 = vld [vmem:[%s7086_s1 + $0x124] ss:$8 sps:$4 sm:$0xff]   ;;  %v5900_v45 = vld [vmem:[%s7086_s1 + $0x154] ss:$8 sps:$4 sm:$0xff]  }
  0x50   : > { %540 = vmatprep.mubr.bf16.mxu1 %v6015_v2  ;;  %2869 = vmatprep.mubr.bf16.mxu0 %v6015_v2 }
  0x51   : > { %3193 = vmatpush1.bf16.msra.mxu0 %v5857_v1  ;;  %v704_v1 = vshll.u32 %v631_v50, 16  ;;  %v2634_v8 = vsel %vm6281_vm5, %v2632_v54, %v2633_v48  ;;  %v693_v10 = vor.u32 %v692_v59, %v6396_v58  ;;  %v684_v27 = vrot.slane %v683_v9, 4  ;;  %v636_v54 = vld [vmem:[%s6136_s22 + $0x2c] sm:$0x1]  ;;  %v5063_v9 = vld [vmem:[%s6136_s22 + $0x60] sm:$0xe] }
  0x52   : > { %3194 = vmatprep.subr.bf16.mxu0 %v5866_v3  ;;  %v710_v3 = vshll.u32 %v632_v55, 16  ;;  %v5094_v23 = vcombine.low %v2631_v7, %v2634_v8  ;;  %v2644_v48 = vrot.slane %v6437_v34, 5  ;;  %v5897_v55 = vld [vmem:[%s7086_s1 + $0x384] ss:$8 sps:$4 sm:$0xff]   ;;  %v730_v59 = vrot.slane %v728_v41, 5 }
  0x53   : > { %v744_v6 = vshll.u32 %v636_v54, 16  ;;  %v638_v7 = vld [vmem:[%s6136_s22 + $0x34] sm:$0xf]  ;;  %v640_v41 = vld [vmem:[%s6136_s22 + $0x3c] sm:$0xf] }
  0x54   : > { %v2646_v4 = vrot.slane %v2644_v48, 4  ;;  %v5887_v8 = vld [vmem:[%s7086_s1 + $0x134] ss:$8 sps:$4 sm:$0xff]  }
  0x55   : > { %3195 = vmatpush1.bf16.msra.mxu0 %v5864_v13  ;;  %v5059_v13 = vld [vmem:[%s6136_s22 + $0x50] sm:$0x1] }
  0x56   : > { %3196 = vmatprep.subr.bf16.mxu0 %v5872_v18  ;;  %v706_v18 = vrot.slane %v704_v1, 5  ;;  %v2640_v30 = vrot.slane %v5059_v13, 5  ;;  %v5064_v1 = vld [vmem:[%s6136_s22 + $0x64] sm:$0xf] }
  0x57   : > { %541 = vmatmul.mubr.bf16.gmra.mrb[24].mxu1 %v5853_v19  ;;  %2870 = vmatmul.mubr.bf16.gmra.mrb[8].mxu0 %v5092_v25  ;;  %v6426_v19 = vrot.slane %v710_v3, 5  ;;  %v5888_v25 = vld [vmem:[%s7086_s1 + $0x370] ss:$8 sps:$4 sm:$0xff]  }
  0x58   : > { %550 = vmatprep.mubr.bf16.mxu1 %v6015_v2  ;;  %2879 = vmatprep.mubr.bf16.mxu0 %v6015_v2  ;;  %v707_v37 = vor.u32 %v706_v18, %v703_v17  ;;  %v2641_v50 = vsel %vm6281_vm5, %v2639_v32, %v2640_v30  ;;  %v5065_v17 = vld [vmem:[%s6136_s22 + $0x68] sm:$0x1]  ;;  %v758_v18 = vshll.u32 %v638_v7, 16  ;;  %v5073_v30 = vrot.slane %v5063_v9, 9 }
  0x59   : > { %3197 = vmatpush1.bf16.msra.mxu0 %v5870_v28  ;;  %v694_v28 = vrot.slane %v693_v10, 4  ;;  %v717_v38 = vor.u32 %v716_v20, %v6426_v19  ;;  %v5095_v3 = vcombine.low %v2638_v49, %v2641_v50  ;;  %v749_v10 = vshrl.u32 %v637_v60, 16 }
  0x5a   : > { %3198 = vmatprep.subr.bf16.mxu0 %v5878_v33  ;;  %v720_v33 = vshll.u32 %v633_v15, 16  ;;  %v708_v56 = vrot.slane %v707_v37, 4  ;;  %v2651_v15 = vrot.slane %v5064_v1, 5  ;;  %v762_v20 = vshrl.u32 %v638_v7, 16 }
  0x5b   : > { %v699_v47 = vsel %vm6174_vm2, %v694_v28, %v698_v12  ;;  %v718_v57 = vrot.slane %v717_v38, 4  ;;  %v754_v28 = vrot.slane %v752_v11, 5  ;;  %v2654_v32 = vrot.slane %v5065_v17, 5  ;;  %v645_v17 = vld [vmem:[%s6136_s22 + $0x50] sm:$0x1] }
  0x5c   : > { %v713_v12 = vsel %vm6174_vm2, %v708_v56, %v6426_v19  ;;  %v2653_v31 = vrot.slane %v2651_v15, 4  ;;  %v768_v37 = vshll.u32 %v639_v24, 16  ;;  %v2652_v44 = vsel %vm6281_vm5, %v5073_v30, %v2651_v15  ;;  %v642_v56 = vld [vmem:[%s6136_s22 + $0x44] sm:$0x1]  ;;  %v5895_v30 = vld [vmem:[%s7086_s1 + $0x380] ss:$8 sps:$4 sm:$0xff]  }
  0x5d   : > { %3199 = vmatpush1.bf16.msra.mxu0 %v5876_v46  ;;  %v689_v46 = vsel %vm6174_vm2, %v684_v27, %v6396_v58  ;;  %v727_v58 = vrot.slane %v725_v40, 4  ;;  %v751_v27 = vrot.slane %v749_v10, 4  ;;  %v773_v50 = vshrl.u32 %v640_v41, 16  ;;  %v5914_v10 = vld [vmem:[%s7086_s1 + $0x174] ss:$8 sps:$4 sm:$0xff]  }
  0x5e   : > { %3200 = vmatprep.subr.bf16.mxu0 %v5884_v62  ;;  %v5879_v62 = vld [vmem:[%s7086_s1 + $0x120] ss:$8 sps:$4 sm:$0xff]   ;;  %v770_v49 = vrot.slane %v768_v37, 5 }
  0x5f   : > { %551 = vmatmul.mubr.bf16.gmra.mrb[28].mxu1 %v5860_v43  ;;  %2880 = vmatmul.mubr.bf16.gmra.mrb[12].mxu0 %v5093_v51  ;;  %v5062_v43 = vld [vmem:[%s6136_s22 + $0x5c] sm:$0x1]  ;;  %v722_v51 = vrot.slane %v720_v33, 5  ;;  %v731_v14 = vor.u32 %v730_v59, %v727_v58  ;;  %v5893_v33 = vld [vmem:[%s7086_s1 + $0x144] ss:$8 sps:$4 sm:$0xff]   ;;  %v755_v40 = vor.u32 %v754_v28, %v751_v27 }
  0x60   : > { %1037 = vmatprep.mubr.bf16.mxu1 %v6015_v2  ;;  %2889 = vmatprep.mubr.bf16.mxu0 %v6015_v2  ;;  %v2647_v5 = vrot.slane %v5062_v43, 5  ;;  %v5907_v58 = vld [vmem:[%s7086_s1 + $0x164] ss:$8 sps:$4 sm:$0xff]   ;;  %v646_v27 = vld [vmem:[%s6136_s22 + $0x54] sm:$0xf] }
  0x61   : > { %3201 = vmatpush1.bf16.msra.mxu0 %v5882_v61  ;;  %v4851_v61 = vcombine.low %v689_v46, %v699_v47  ;;  %v723_v13 = vsel %vm6174_vm2, %v718_v57, %v722_v51  ;;  %v732_v29 = vrot.slane %v731_v14, 4  ;;  %v2655_v47 = vsel %vm6281_vm5, %v2653_v31, %v2654_v32  ;;  %v5898_v57 = vld [vmem:[%s7086_s1 + $0x150] ss:$8 sps:$4 sm:$0xff]   ;;  %v5904_v32 = vld [vmem:[%s7086_s1 + $0x394] ss:$8 sps:$4 sm:$0xff]  }
  0x62   : > { %3202 = vmatprep.subr.bf16.mxu0 %v5890_v26  ;;  %v2648_v19 = vsel %vm6281_vm5, %v2646_v4, %v2647_v5  ;;  %v746_v26 = vrot.slane %v744_v6, 5  ;;  %v776_v51 = vshll.u32 %v640_v41, 16  ;;  %v5097_v60 = vcombine.low %v2652_v44, %v2655_v47  ;;  %v5905_v6 = vld [vmem:[%s7086_s1 + $0x160] ss:$8 sps:$4 sm:$0xff]   ;;  %v647_v31 = vld [vmem:[%s6136_s22 + $0x58] sm:$0xf] }
  0x63   : > { %v737_v43 = vsel %vm6174_vm2, %v732_v29, %v6471_v63  ;;  %v792_v5 = vshll.u32 %v642_v56, 16  ;;  %v824_v37 = vshll.u32 %v646_v27, 16  ;;  %v834_v41 = vshrl.u32 %v647_v31, 16  ;;  %v5918_v56 = vld [vmem:[%s7086_s1 + $0x3b4] ss:$8 sps:$4 sm:$0xff]  }
  0x64   : > { %v778_v1 = vrot.slane %v776_v51, 5 }
  0x65   : > { %3203 = vmatpush1.bf16.msra.mxu0 %v5888_v25  ;;  %v4852_v25 = vcombine.low %v713_v12, %v723_v13 }
  0x66   : > { %3742 = vmatprep.subr.bf16.mxu0 %v5897_v55  ;;  %v756_v55 = vrot.slane %v755_v40, 4  ;;  %v830_v40 = vshll.u32 %v647_v31, 16  ;;  %v5952_v31 = vld [vmem:[%s7086_s1 + $0x404] ss:$8 sps:$4 sm:$0xff]  }
  0x67   : > { %1038 = vmatmul.mubr.bf16.vlgmr.msra.gmra.mrb[0].mxu1 %v4850_v21  ;;  %2890 = vmatmul.mubr.bf16.gmra.mrb[16].mxu0 %v5094_v23  ;;  %v2645_v21 = vsel %vm6281_vm5, %v5072_v53, %v2644_v48  ;;  %v5885_v23 = vld [vmem:[%s7086_s1 + $0x130] ss:$8 sps:$4 sm:$0xff]  }
  0x68   : > { %1451 = vmatpush1.bf16.msra.mxu1 %v5867_v16  ;;  %1047 = vmatprep.mubr.bf16.mxu1 %v6015_v2  ;;  %v741_v16 = vor.u32 %v740_v0, %v6471_v63  ;;  %v5096_v38 = vcombine.low %v2645_v21, %v2648_v19  ;;  %v644_v63 = vld [vmem:[%s6136_s22 + $0x4c] sm:$0xf]  ;;  %v775_v0 = vrot.slane %v773_v50, 4  ;;  %v648_v50 = vld [vmem:[%s6136_s22 + $0x5c] sm:$0x1] }
  0x69   : > { %2899 = vmatprep.mubr.bf16.mxu0 %v6015_v2  ;;  %1452 = vmatprep.subr.bf16.mxu1 %v5875_v36  ;;  %v764_v36 = vrot.slane %v762_v20, 4  ;;  %v806_v9 = vshll.u32 %v644_v63, 16  ;;  %v810_v12 = vshrl.u32 %v644_v63, 16  ;;  %v5894_v20 = vld [vmem:[%s6136_s22 + $0x18] sm:$0xff]   ;;  %v5925_v63 = vld [vmem:[%s7086_s1 + $0x3c4] ss:$8 sps:$4 sm:$0xff]  }
  0x6a   : > { %v742_v34 = vrot.slane %v741_v16, 4  ;;  %v779_v14 = vor.u32 %v778_v1, %v775_v0  ;;  %v794_v16 = vrot.slane %v792_v5, 5  ;;  %v5908_v1 = vld [vmem:[%s6136_s22 + $0x30] sm:$0xff]  }
  0x6c   : > { %1453 = vmatpush1.bf16.msra.mxu1 %v5873_v35  ;;  %v6499_v35 = vrot.slane %v758_v18, 5  ;;  %v747_v46 = vsel %vm6174_vm2, %v742_v34, %v746_v26  ;;  %v5912_v18 = vld [vmem:[%s7086_s1 + $0x170] ss:$8 sps:$4 sm:$0xff]   ;;  %v812_v26 = vrot.slane %v810_v12, 4  ;;  %v780_v28 = vrot.slane %v779_v14, 4 }
  0x6d   : > { %1454 = vmatprep.subr.bf16.mxu1 %v5881_v42  ;;  %v641_v42 = vld [vmem:[%s6136_s22 + $0x40] sm:$0xf]  ;;  %v4853_v59 = vcombine.low %v737_v43, %v747_v46  ;;  %v5901_v43 = vld [vmem:[%s6136_s22 + $0x24] sm:$0xff]   ;;  %v5930_v14 = vld [vmem:[%s7086_s1 + $0x3d0] ss:$8 sps:$4 sm:$0xff]  }
  0x6e   : > { %v765_v48 = vor.u32 %v764_v36, %v6499_v35  ;;  %v782_v53 = vshll.u32 %v641_v42, 16  ;;  %v786_v54 = vshrl.u32 %v641_v42, 16  ;;  %v761_v11 = vsel %vm6174_vm2, %v756_v55, %v6499_v35  ;;  %v5902_v42 = vld [vmem:[%s7086_s1 + $0x390] ss:$8 sps:$4 sm:$0xff]  }
  0x6f   : > { %1048 = vmatmul.mubr.bf16.gmra.mrb[4].mxu1 %v4851_v61  ;;  %2900 = vmatmul.mubr.bf16.gmra.mrb[20].mxu0 %v5095_v3  ;;  %v821_v36 = vshrl.u32 %v646_v27, 16  ;;  %v836_v55 = vrot.slane %v834_v41, 4 }
  0x70   : > { %1057 = vmatprep.mubr.bf16.mxu1 %v6015_v2  ;;  %2909 = vmatprep.mubr.bf16.mxu0 %v6015_v2  ;;  %v766_v61 = vrot.slane %v765_v48, 4  ;;  %v784_v3 = vrot.slane %v782_v53, 5  ;;  %v788_v4 = vrot.slane %v786_v54, 4  ;;  %v826_v53 = vrot.slane %v824_v37, 5 }
  0x71   : > { %1455 = vmatpush1.bf16.msra.mxu1 %v5879_v62  ;;  %v643_v62 = vld [vmem:[%s6136_s22 + $0x48] sm:$0xf]  ;;  %v823_v51 = vrot.slane %v821_v36, 4  ;;  %v832_v54 = vrot.slane %v830_v40, 5  ;;  %v5926_v40 = vld [vmem:[%s7086_s1 + $0x190] ss:$8 sps:$4 sm:$0xff]  }
  0x72   : > { %1456 = vmatprep.subr.bf16.mxu1 %v5887_v8  ;;  %v797_v7 = vshrl.u32 %v643_v62, 16  ;;  %v800_v8 = vshll.u32 %v643_v62, 16  ;;  %v771_v13 = vsel %vm6174_vm2, %v766_v61, %v770_v49  ;;  %v789_v15 = vor.u32 %v788_v4, %v784_v3  ;;  %v5909_v49 = vld [vmem:[%s7086_s1 + $0x3a0] ss:$8 sps:$4 sm:$0xff]   ;;  %v5916_v62 = vld [vmem:[%s7086_s1 + $0x3b0] ss:$8 sps:$4 sm:$0xff]  }
  0x73   : > { %v4854_v24 = vcombine.low %v761_v11, %v771_v13  ;;  %v840_v61 = vshll.u32 %v648_v50, 16  ;;  %v1182_v11 = vld [vmem:[%s6136_s22] sm:$0xe]  ;;  %v1184_v13 = vld [vmem:[%s6136_s22 + $0x8] sm:$0x1] }
  0x74   : > { %v799_v21 = vrot.slane %v797_v7, 4  ;;  %v802_v19 = vrot.slane %v800_v8, 5  ;;  %v790_v29 = vrot.slane %v789_v15, 4  ;;  %v5923_v7 = vld [vmem:[%s7086_s1 + $0x3c0] ss:$8 sps:$4 sm:$0xff]  }
  0x75   : > { %1457 = vmatpush1.bf16.msra.mxu1 %v5885_v23  ;;  %v5921_v23 = vld [vmem:[%s7086_s1 + $0x184] ss:$8 sps:$4 sm:$0xff]   ;;  %v842_v5 = vrot.slane %v840_v61, 5  ;;  %v5932_v8 = vld [vmem:[%s7086_s1 + $0x3d4] ss:$8 sps:$4 sm:$0xff]  }
  0x76   : > { %1458 = vmatprep.subr.bf16.mxu1 %v5893_v33  ;;  %v816_v33 = vshll.u32 %v645_v17, 16  ;;  %v803_v34 = vor.u32 %v802_v19, %v799_v21  ;;  %v5939_v15 = vld [vmem:[%s7086_s1 + $0x3e4] ss:$8 sps:$4 sm:$0xff]   ;;  %v5915_v17 = vld [vmem:[%s6136_s22 + $0x3c] sm:$0xff]   ;;  %v1238_v21 = vrot.slane %v1184_v13, 5 }
  0x77   : > { %1058 = vmatmul.mubr.bf16.gmra.mrb[8].mxu1 %v4852_v25  ;;  %2910 = vmatmul.mubr.bf16.gmra.mrb[24].mxu0 %v5096_v38  ;;  %v808_v25 = vrot.slane %v806_v9, 5  ;;  %v785_v38 = vsel %vm6174_vm2, %v780_v28, %v784_v3  ;;  %v1186_v19 = vld [vmem:[%s6136_s22 + $0x10] sm:$0xf]  ;;  %v1185_v28 = vld [vmem:[%s6136_s22 + $0xc] sm:$0xe] }
  0x78   : > { %1067 = vmatprep.mubr.bf16.mxu1 %v6015_v2  ;;  %2919 = vmatprep.mubr.bf16.mxu0 %v6015_v2  ;;  %v818_v44 = vrot.slane %v816_v33, 5  ;;  %v804_v47 = vrot.slane %v803_v34, 4  ;;  %v1242_v27 = vrot.slane %v1186_v19, 5  ;;  %v5919_v33 = vld [vmem:[%s7086_s1 + $0x180] ss:$8 sps:$4 sm:$0xff]  }
  0x79   : > { %1459 = vmatpush1.bf16.msra.mxu1 %v5891_v39  ;;  %v813_v35 = vor.u32 %v812_v26, %v808_v25  ;;  %v795_v39 = vsel %vm6174_vm2, %v790_v29, %v794_v16  ;;  %v1187_v29 = vld [vmem:[%s6136_s22 + $0x14] sm:$0x1]  ;;  %v5922_v34 = vld [vmem:[%s6136_s22 + $0x48] sm:$0xff]  }
  0x7a   : > { %1460 = vmatprep.subr.bf16.mxu1 %v5900_v45  ;;  %v5911_v45 = vld [vmem:[%s7086_s1 + $0x3a4] ss:$8 sps:$4 sm:$0xff]   ;;  %v4855_v46 = vcombine.low %v785_v38, %v795_v39  ;;  %v1244_v36 = vrot.slane %v1242_v27, 4  ;;  %v1245_v37 = vrot.slane %v1187_v29, 5  ;;  %v1189_v38 = vld [vmem:[%s6136_s22 + $0x1c] sm:$0xf] }
  0x7b   : > { %v814_v48 = vrot.slane %v813_v35, 4  ;;  %v4875_v35 = vrot.slane %v1185_v28, 9  ;;  %v5928_v39 = vld [vmem:[%s7086_s1 + $0x194] ss:$8 sps:$4 sm:$0xff]   ;;  %v5947_v19 = vld [vmem:[%s7086_s1 + $0x1c0] ss:$8 sps:$4 sm:$0xff]  }
  0x7d   : > { %1461 = vmatpush1.bf16.msra.mxu1 %v5898_v57  ;;  %v809_v57 = vsel %vm6174_vm2, %v804_v47, %v808_v25  ;;  %v1243_v41 = vsel %vm6281_vm5, %v4875_v35, %v1242_v27  ;;  %v1192_v47 = vld [vmem:[%s6136_s22 + $0x28] sm:$0xf]  ;;  %v5955_v27 = vld [vmem:[%s7086_s1 + $0x1d4] ss:$8 sps:$4 sm:$0xff]  }
  0x7e   : > { %1462 = vmatprep.subr.bf16.mxu1 %v5907_v58  ;;  %v819_v58 = vsel %vm6174_vm2, %v814_v48, %v818_v44  ;;  %v1190_v44 = vld [vmem:[%s6136_s22 + $0x20] sm:$0x1] }
  0x7f   : > { %1068 = vmatmul.mubr.bf16.gmra.mrb[12].mxu1 %v4853_v59  ;;  %2920 = vmatmul.mubr.bf16.gmra.mrb[28].mxu0 %v5097_v60  ;;  %v827_v59 = vor.u32 %v826_v53, %v823_v51  ;;  %v837_v60 = vor.u32 %v836_v55, %v832_v54  ;;  %v4856_v0 = vcombine.low %v809_v57, %v819_v58  ;;  %v1252_v51 = vrot.slane %v1190_v44, 5  ;;  %v5170_v53 = vld [vmem:[%s6136_s22 + $0x18] sm:$0xf]  ;;  %v5933_v55 = vld [vmem:[%s7086_s1 + $0x1a0] ss:$8 sps:$4 sm:$0xff]  }
  0x80   : > { %1077 = vmatprep.mubr.bf16.mxu1 %v6015_v2  ;;  %3220 = vmatprep.mubr.bf16.mxu0 %v6015_v2  ;;  %v1191_v57 = vld [vmem:[%s6136_s22 + $0x24] sm:$0xe]  ;;  %v1193_v58 = vld [vmem:[%s6136_s22 + $0x2c] sm:$0x1]  ;;  %v3390_v61 = vshrl.u32 %v5170_v53, 16 }
  0x81   : > { %1463 = vmatpush1.bf16.msra.mxu1 %v5905_v6  ;;  %v828_v3 = vrot.slane %v827_v59, 4  ;;  %v838_v4 = vrot.slane %v837_v60, 4  ;;  %v1183_v6 = vld [vmem:[%s6136_s22 + $0x4] sm:$0xf]  ;;  %v1256_v59 = vrot.slane %v1192_v47, 5 }
  0x82   : > { %1464 = vmatprep.subr.bf16.mxu1 %v5914_v10  ;;  %v1235_v12 = vrot.slane %v1183_v6, 5  ;;  %v5942_v60 = vld [vmem:[%s7086_s1 + $0x1b4] ss:$8 sps:$4 sm:$0xff]   ;;  %v5940_v6 = vld [vmem:[%s7086_s1 + $0x1b0] ss:$8 sps:$4 sm:$0xff]  }
  0x83   : > { %v833_v9 = vsel %vm6174_vm2, %v828_v3, %v832_v54  ;;  %v843_v10 = vsel %vm6174_vm2, %v838_v4, %v842_v5  ;;  %v4877_v3 = vrot.slane %v1191_v57, 9  ;;  %v1259_v5 = vrot.slane %v1193_v58, 5  ;;  %v1199_v57 = vld [vmem:[%s6136_s22 + $0x44] sm:$0x1] }
  0x84   : > { %v4857_v16 = vcombine.low %v833_v9, %v843_v10  ;;  %v1258_v9 = vrot.slane %v1256_v59, 4  ;;  %v5949_v10 = vld [vmem:[%s7086_s1 + $0x1c4] ss:$8 sps:$4 sm:$0xff]  }
  0x85   : > { %1465 = vmatpush1.bf16.msra.mxu1 %v5912_v18  ;;  %v4874_v18 = vrot.slane %v1182_v11, 9  ;;  %v5172_v11 = vld [vmem:[%s6136_s22 + $0x20] sm:$0x1] }
  0x86   : > { %1821 = vmatprep.subr.bf16.mxu1 %v5921_v23  ;;  %v5937_v23 = vld [vmem:[%s7086_s1 + $0x3e0] ss:$8 sps:$4 sm:$0xff]  }
  0x87   : > { %1078 = vmatmul.mubr.bf16.gmra.mrb[16].mxu1 %v4854_v24  ;;  %3221 = vmatmul.mubr.bf16.vlgmr.msra.gmra.mrb[0].mxu0 %v5894_v20  ;;  %v1237_v20 = vrot.slane %v1235_v12, 4  ;;  %v5946_v24 = vld [vmem:[%s7086_s1 + $0x3f4] ss:$8 sps:$4 sm:$0xff]   ;;  %v1236_v25 = vsel %vm6281_vm5, %v4874_v18, %v1235_v12  ;;  %v3392_v12 = vrot.slane %v3390_v61, 4  ;;  %v5174_v18 = vld [vmem:[%s6136_s22 + $0x28] sm:$0xf] }
  0x88   : > { %1087 = vmatprep.mubr.bf16.mxu1 %v6015_v2  ;;  %3743 = vmatpush1.bf16.msra.mxu0 %v5895_v30  ;;  %v5944_v30 = vld [vmem:[%s7086_s1 + $0x3f0] ss:$8 sps:$4 sm:$0xff]  }
  0x89   : > { %3230 = vmatprep.mubr.bf16.mxu0 %v6015_v2  ;;  %3744 = vmatprep.subr.bf16.mxu0 %v5904_v32  ;;  %v1239_v26 = vsel %vm6281_vm5, %v1237_v20, %v1238_v21  ;;  %v1194_v20 = vld [vmem:[%s6136_s22 + $0x30] sm:$0xe] }
  0x8a   : > { %v4898_v32 = vcombine.low %v1236_v25, %v1239_v26  ;;  %v1196_v25 = vld [vmem:[%s6136_s22 + $0x38] sm:$0x1]  ;;  %v3409_v26 = vshll.u32 %v5172_v11, 16 }
  0x8c   : > { %3745 = vmatpush1.bf16.msra.mxu0 %v5902_v42  ;;  %v1246_v42 = vsel %vm6281_vm5, %v1244_v36, %v1245_v37  ;;  %v1266_v36 = vrot.slane %v1196_v25, 5  ;;  %v5953_v37 = vld [vmem:[%s7086_s1 + $0x1d0] ss:$8 sps:$4 sm:$0xff]   ;;  %v5179_v25 = vld [vmem:[%s6136_s22 + $0x3c] sm:$0xf] }
  0x8d   : > { %3746 = vmatprep.subr.bf16.mxu0 %v5911_v45  ;;  %v1249_v45 = vrot.slane %v1189_v38, 5  ;;  %v4899_v48 = vcombine.low %v1243_v41, %v1246_v42  ;;  %v1198_v41 = vld [vmem:[%s6136_s22 + $0x40] sm:$0xf]  ;;  %v5961_v42 = vld [vmem:[%s7086_s1 + $0x1e4] ss:$8 sps:$4 sm:$0xff]  }
  0x8e   : > { %v1270_v58 = vrot.slane %v1198_v41, 5 }
  0x8f   : > { %1088 = vmatmul.mubr.bf16.gmra.mrb[20].mxu1 %v4855_v46  ;;  %3231 = vmatmul.mubr.bf16.gmra.mrb[4].mxu0 %v5901_v43  ;;  %v1188_v43 = vld [vmem:[%s6136_s22 + $0x18] sm:$0xe]  ;;  %v5935_v46 = vld [vmem:[%s7086_s1 + $0x1a4] ss:$8 sps:$4 sm:$0xff]   ;;  %v1251_v54 = vrot.slane %v1249_v45, 4 }
  0x90   : > { %1097 = vmatprep.mubr.bf16.mxu1 %v6015_v2  ;;  %3240 = vmatprep.mubr.bf16.mxu0 %v6015_v2  ;;  %v4876_v50 = vrot.slane %v1188_v43, 9  ;;  %v5175_v43 = vld [vmem:[%s6136_s22 + $0x2c] sm:$0x1] }
  0x91   : > { %3747 = vmatpush1.bf16.msra.mxu0 %v5909_v49  ;;  %v5929_v49 = vld [vmem:[%s6136_s22 + $0x54] sm:$0xff]  }
  0x92   : > { %3748 = vmatprep.subr.bf16.mxu0 %v5918_v56  ;;  %v5171_v56 = vld [vmem:[%s6136_s22 + $0x1c] sm:$0xf] }
  0x93   : > { %v3403_v4 = vshrl.u32 %v5171_v56, 16 }
  0x95   : > { %3749 = vmatpush1.bf16.msra.mxu0 %v5916_v62  ;;  %v3393_v62 = vshll.u32 %v5170_v53, 16  ;;  %v5959_v53 = vld [vmem:[%s7086_s1 + $0x1e0] ss:$8 sps:$4 sm:$0xff]  }
  0x96   : > { %3750 = vmatprep.subr.bf16.mxu0 %v5925_v63  ;;  %v3399_v63 = vshll.u32 %v5171_v56, 16 }
  0x97   : > { %1098 = vmatmul.mubr.bf16.gmra.mrb[24].mxu1 %v4856_v0  ;;  %3241 = vmatmul.mubr.bf16.gmra.mrb[8].mxu0 %v5908_v1  ;;  %v1250_v0 = vsel %vm6281_vm5, %v4876_v50, %v1249_v45  ;;  %v1253_v1 = vsel %vm6281_vm5, %v1251_v54, %v1252_v51  ;;  %v1197_v50 = vld [vmem:[%s6136_s22 + $0x3c] sm:$0xe]  ;;  %v5176_v51 = vld [vmem:[%s6136_s22 + $0x30] sm:$0xf]  ;;  %v5177_v54 = vld [vmem:[%s6136_s22 + $0x34] sm:$0xf] }
  0x98   : > { %1107 = vmatprep.mubr.bf16.mxu1 %v6015_v2  ;;  %3250 = vmatprep.mubr.bf16.mxu0 %v6015_v2  ;;  %v4900_v13 = vcombine.low %v1250_v0, %v1253_v1  ;;  %v3441_v0 = vshll.u32 %v5176_v51, 16  ;;  %v3447_v1 = vshll.u32 %v5177_v54, 16 }
  0x99   : > { %3751 = vmatpush1.bf16.msra.mxu0 %v5923_v7  ;;  %v1195_v7 = vld [vmem:[%s6136_s22 + $0x34] sm:$0xf] }
  0x9a   : > { %3752 = vmatprep.subr.bf16.mxu0 %v5932_v8  ;;  %v5936_v8 = vld [vmem:[%s6136_s22 + $0x60] sm:$0xff]   ;;  %v1263_v21 = vrot.slane %v1195_v7, 5  ;;  %v1273_v7 = vrot.slane %v1199_v57, 5  ;;  %v1205_v57 = vld [vmem:[%s6136_s22 + $0x5c] sm:$0x1] }
  0x9c   : > { %v1265_v35 = vrot.slane %v1263_v21, 4 }
  0x9d   : > { %3753 = vmatpush1.bf16.msra.mxu0 %v5930_v14  ;;  %v3395_v14 = vrot.slane %v3393_v62, 5 }
  0x9e   : > { %3754 = vmatprep.subr.bf16.mxu0 %v5939_v15  ;;  %v6684_v15 = vrot.slane %v3399_v63, 5  ;;  %v1267_v56 = vsel %vm6281_vm5, %v1265_v35, %v1266_v36  ;;  %v3438_v63 = vshrl.u32 %v5176_v51, 16  ;;  %v5182_v51 = vld [vmem:[%s6136_s22 + $0x48] sm:$0xf] }
  0x9f   : > { %1108 = vmatmul.mubr.bf16.gmra.mrb[28].mxu1 %v4857_v16  ;;  %3251 = vmatmul.mubr.bf16.gmra.mrb[12].mxu0 %v5915_v17  ;;  %v3405_v16 = vrot.slane %v3403_v4, 4  ;;  %v5173_v17 = vld [vmem:[%s6136_s22 + $0x24] sm:$0xf] }
  0xa0   : > { %1482 = vmatprep.mubr.bf16.mxu1 %v6015_v2  ;;  %3260 = vmatprep.mubr.bf16.mxu0 %v6015_v2  ;;  %v3414_v28 = vshrl.u32 %v5173_v17, 16  ;;  %v3417_v29 = vshll.u32 %v5173_v17, 16 }
  0xa1   : > { %3755 = vmatpush1.bf16.msra.mxu0 %v5937_v23  ;;  %v1257_v23 = vsel %vm6281_vm5, %v4877_v3, %v1256_v59  ;;  %v3433_v59 = vshll.u32 %v5175_v43, 16  ;;  %v3451_v3 = vshrl.u32 %v5177_v54, 16 }
  0xa2   : > { %3756 = vmatprep.subr.bf16.mxu0 %v5946_v24  ;;  %v1260_v24 = vsel %vm6281_vm5, %v1258_v9, %v1259_v5  ;;  %v3416_v44 = vrot.slane %v3414_v28, 4  ;;  %v3419_v45 = vrot.slane %v3417_v29, 5 }
  0xa3   : > { %v4901_v38 = vcombine.low %v1257_v23, %v1260_v24  ;;  %v3435_v11 = vrot.slane %v3433_v59, 5  ;;  %v5178_v23 = vld [vmem:[%s6136_s22 + $0x38] sm:$0x1]  ;;  %v5181_v59 = vld [vmem:[%s6136_s22 + $0x44] sm:$0x1] }
  0xa4   : > { %v3420_v61 = vor.u32 %v3419_v45, %v3416_v44 }
  0xa5   : > { %3757 = vmatpush1.bf16.msra.mxu0 %v5944_v30  ;;  %v3423_v30 = vshll.u32 %v5174_v18, 16 }
  0xa6   : > { %4184 = vmatprep.subr.bf16.mxu0 %v5952_v31  ;;  %v3427_v31 = vshrl.u32 %v5174_v18, 16  ;;  %v6742_v18 = vrot.slane %v3447_v1, 5  ;;  %v3486_v1 = vshrl.u32 %v5182_v51, 16 }
  0xa7   : > { %1483 = vmatmul.mubr.bf16.vlgmr.msra.gmra.mrb[0].mxu1 %v4898_v32  ;;  %3261 = vmatmul.mubr.bf16.gmra.mrb[16].mxu0 %v5922_v34  ;;  %v3396_v32 = vor.u32 %v3395_v14, %v3392_v12  ;;  %v4878_v34 = vrot.slane %v1194_v20, 9  ;;  %v3421_v12 = vrot.slane %v3420_v61, 4  ;;  %v6740_v14 = vld [vmem:[%s6136_s22 + $0x4c] sm:$0xf]  ;;  %v3453_v20 = vrot.slane %v3451_v3, 4 }
  0xa8   : > { %1822 = vmatpush1.bf16.msra.mxu1 %v5919_v33  ;;  %1492 = vmatprep.mubr.bf16.mxu1 %v6015_v2  ;;  %v3406_v33 = vor.u32 %v3405_v16, %v6684_v15  ;;  %v3429_v47 = vrot.slane %v3427_v31, 4  ;;  %v3443_v16 = vrot.slane %v3441_v0, 5  ;;  %v1277_v24 = vrot.slane %v6740_v14, 5  ;;  %v1200_v31 = vld [vmem:[%s6136_s22 + $0x48] sm:$0xe] }
  0xa9   : > { %3270 = vmatprep.mubr.bf16.mxu0 %v6015_v2  ;;  %1823 = vmatprep.subr.bf16.mxu1 %v5928_v39  ;;  %v5943_v39 = vld [vmem:[%s6136_s22 + $0x6c] sm:$0xff]   ;;  %v3454_v36 = vor.u32 %v3453_v20, %v6742_v18  ;;  %v4880_v43 = vrot.slane %v1200_v31, 9  ;;  %v5970_v0 = vld [vmem:[%s7086_s1 + $0x434] ss:$8 sps:$4 sm:$0xff]   ;;  %v3489_v3 = vshll.u32 %v5182_v51, 16 }
  0xaa   : > { %v1279_v44 = vrot.slane %v1277_v24, 4 }
  0xac   : > { %1824 = vmatpush1.bf16.msra.mxu1 %v5926_v40  ;;  %v3411_v40 = vrot.slane %v3409_v26, 5  ;;  %v5180_v26 = vld [vmem:[%s6136_s22 + $0x40] sm:$0xf] }
  0xad   : > { %1825 = vmatprep.subr.bf16.mxu1 %v5935_v46  ;;  %v6712_v46 = vrot.slane %v3423_v30, 5  ;;  %v3471_v41 = vshll.u32 %v5180_v26, 16 }
  0xaf   : > { %1493 = vmatmul.mubr.bf16.gmra.mrb[4].mxu1 %v4899_v48  ;;  %3271 = vmatmul.mubr.bf16.gmra.mrb[20].mxu0 %v5929_v49  ;;  %v3397_v48 = vrot.slane %v3396_v32, 4  ;;  %v3407_v49 = vrot.slane %v3406_v33, 4  ;;  %v3430_v62 = vor.u32 %v3429_v47, %v6712_v46  ;;  %v3426_v30 = vsel %vm6174_vm2, %v3421_v12, %v6712_v46  ;;  %v1202_v32 = vld [vmem:[%s6136_s22 + $0x50] sm:$0x1]  ;;  %v5964_v46 = vld [vmem:[%s7086_s1 + $0x424] ss:$8 sps:$4 sm:$0xff]  }
  0xb0   : > { %1502 = vmatprep.mubr.bf16.mxu1 %v6015_v2  ;;  %3280 = vmatprep.mubr.bf16.mxu0 %v6015_v2  ;;  %v1280_v45 = vrot.slane %v1202_v32, 5  ;;  %v5972_v32 = vld [vmem:[%s7086_s1 + $0x440] ss:$8 sps:$4 sm:$0xff]  }
  0xb1   : > { %1826 = vmatpush1.bf16.msra.mxu1 %v5933_v55  ;;  %v1264_v55 = vsel %vm6281_vm5, %v4878_v34, %v1263_v21  ;;  %v3402_v4 = vsel %vm6174_vm2, %v3397_v48, %v6684_v15  ;;  %v3412_v5 = vsel %vm6174_vm2, %v3407_v49, %v3411_v40  ;;  %v3440_v15 = vrot.slane %v3438_v63, 4  ;;  %v5950_v21 = vld [vmem:[%s7086_s1 + $0x400] ss:$8 sps:$4 sm:$0xff]   ;;  %v5956_v34 = vld [vmem:[%s7086_s1 + $0x410] ss:$8 sps:$4 sm:$0xff]  }
  0xb2   : > { %1827 = vmatprep.subr.bf16.mxu1 %v5942_v60  ;;  %v5967_v60 = vld [vmem:[%s7086_s1 + $0x1f4] ss:$8 sps:$4 sm:$0xff]   ;;  %v4902_v9 = vcombine.low %v1264_v55, %v1267_v56  ;;  %v5210_v17 = vcombine.low %v3402_v4, %v3412_v5  ;;  %v3465_v40 = vshll.u32 %v5179_v25, 16  ;;  %v5962_v49 = vld [vmem:[%s7086_s1 + $0x420] ss:$8 sps:$4 sm:$0xff]   ;;  %v3455_v55 = vrot.slane %v3454_v36, 4 }
  0xb3   : > { %v3444_v35 = vor.u32 %v3443_v16, %v3440_v15  ;;  %v3481_v15 = vshll.u32 %v5181_v59, 16  ;;  %v5968_v16 = vld [vmem:[%s7086_s1 + $0x430] ss:$8 sps:$4 sm:$0xff]   ;;  %v5980_v59 = vld [vmem:[%s7086_s1 + $0x460] ss:$8 sps:$4 sm:$0xff]  }
  0xb4   : > { %v3467_v61 = vrot.slane %v3465_v40, 5 }
  0xb5   : > { %1828 = vmatpush1.bf16.msra.mxu1 %v5940_v6  ;;  %v4879_v6 = vrot.slane %v1197_v50, 9  ;;  %v1203_v50 = vld [vmem:[%s6136_s22 + $0x54] sm:$0xe]  ;;  %v3445_v54 = vrot.slane %v3444_v35, 4  ;;  %v3483_v31 = vrot.slane %v3481_v15, 5 }
  0xb6   : > { %1829 = vmatprep.subr.bf16.mxu1 %v5949_v10  ;;  %v1272_v10 = vrot.slane %v1270_v58, 4 }
  0xb7   : > { %1503 = vmatmul.mubr.bf16.gmra.mrb[8].mxu1 %v4900_v13  ;;  %3281 = vmatmul.mubr.bf16.gmra.mrb[24].mxu0 %v5936_v8  ;;  %v5965_v8 = vld [vmem:[%s7086_s1 + $0x1f0] ss:$8 sps:$4 sm:$0xff]   ;;  %v3431_v13 = vrot.slane %v3430_v62, 4  ;;  %v1271_v28 = vsel %vm6281_vm5, %v4879_v6, %v1270_v58  ;;  %v6786_v62 = vrot.slane %v3471_v41, 5  ;;  %v1278_v6 = vsel %vm6281_vm5, %v4880_v43, %v1277_v24 }
  0xb8   : > { %1512 = vmatprep.mubr.bf16.mxu1 %v6015_v2  ;;  %3290 = vmatprep.mubr.bf16.mxu0 %v6015_v2  ;;  %v1274_v29 = vsel %vm6281_vm5, %v1272_v10, %v1273_v7  ;;  %v1281_v7 = vsel %vm6281_vm5, %v1279_v44, %v1280_v45  ;;  %v5184_v24 = vld [vmem:[%s6136_s22 + $0x50] sm:$0x1] }
  0xb9   : > { %1830 = vmatpush1.bf16.msra.mxu1 %v5947_v19  ;;  %v5958_v19 = vld [vmem:[%s7086_s1 + $0x414] ss:$8 sps:$4 sm:$0xff]   ;;  %v3436_v33 = vsel %vm6174_vm2, %v3431_v13, %v3435_v11  ;;  %v4903_v47 = vcombine.low %v1271_v28, %v1274_v29  ;;  %v1287_v11 = vrot.slane %v1205_v57, 5  ;;  %v3505_v36 = vshll.u32 %v5184_v24, 16  ;;  %v5976_v44 = vld [vmem:[%s7086_s1 + $0x450] ss:$8 sps:$4 sm:$0xff]  }
  0xba   : > { %1831 = vmatprep.subr.bf16.mxu1 %v5955_v27  ;;  %v5991_v27 = vld [vmem:[%s7086_s1 + $0x204] ss:$8 sps:$4 sm:$0xff]   ;;  %v5211_v48 = vcombine.low %v3426_v30, %v3436_v33  ;;  %v5188_v57 = vld [vmem:[%s6136_s22 + $0x60] sm:$0xf] }
  0xbd   : > { %1832 = vmatpush1.bf16.msra.mxu1 %v5953_v37  ;;  %v3457_v37 = vshll.u32 %v5178_v23, 16  ;;  %v4904_v23 = vcombine.low %v1278_v6, %v1281_v7  ;;  %v5984_v7 = vld [vmem:[%s7086_s1 + $0x470] ss:$8 sps:$4 sm:$0xff]  }
  0xbe   : > { %1833 = vmatprep.subr.bf16.mxu1 %v5961_v42  ;;  %v3475_v42 = vshrl.u32 %v5180_v26, 16  ;;  %v5185_v26 = vld [vmem:[%s6136_s22 + $0x54] sm:$0xf] }
  0xbf   : > { %1513 = vmatmul.mubr.bf16.gmra.mrb[12].mxu1 %v4901_v38  ;;  %3291 = vmatmul.mubr.bf16.gmra.mrb[28].mxu0 %v5943_v39  ;;  %v1204_v38 = vld [vmem:[%s6136_s22 + $0x58] sm:$0xf]  ;;  %v3462_v39 = vshrl.u32 %v5179_v25, 16  ;;  %v3459_v56 = vrot.slane %v3457_v37, 5  ;;  %v5978_v37 = vld [vmem:[%s7086_s1 + $0x454] ss:$8 sps:$4 sm:$0xff]  }
  0xc0   : > { %1522 = vmatprep.mubr.bf16.mxu1 %v6015_v2  ;;  %3774 = vmatprep.mubr.bf16.mxu0 %v6015_v2  ;;  %v1284_v58 = vrot.slane %v1204_v38, 5  ;;  %v3477_v63 = vrot.slane %v3475_v42, 4  ;;  %v3510_v38 = vshrl.u32 %v5185_v26, 16 }
  0xc1   : > { %1834 = vmatpush1.bf16.msra.mxu1 %v5959_v53  ;;  %v5183_v53 = vld [vmem:[%s6136_s22 + $0x4c] sm:$0xf]  ;;  %v3460_v12 = vsel %vm6174_vm2, %v3455_v55, %v3459_v56 }
  0xc2   : > { %1835 = vmatprep.subr.bf16.mxu1 %v5967_v60  ;;  %v3464_v60 = vrot.slane %v3462_v39, 4  ;;  %v3495_v4 = vshll.u32 %v5183_v53, 16  ;;  %v3499_v5 = vshrl.u32 %v5183_v53, 16  ;;  %v1286_v10 = vrot.slane %v1284_v58, 4 }
  0xc3   : > { %v3478_v14 = vor.u32 %v3477_v63, %v6786_v62  ;;  %v3513_v39 = vshll.u32 %v5185_v26, 16  ;;  %v3512_v51 = vrot.slane %v3510_v38, 4  ;;  %v5995_v38 = vld [vmem:[%s7086_s1 + $0x224] ss:$8 sps:$4 sm:$0xff]  }
  0xc4   : > { %v3468_v13 = vor.u32 %v3467_v61, %v3464_v60  ;;  %v6806_v20 = vrot.slane %v3495_v4, 5  ;;  %v1288_v33 = vsel %vm6281_vm5, %v1286_v10, %v1287_v11  ;;  %v5986_v61 = vld [vmem:[%s7086_s1 + $0x474] ss:$8 sps:$4 sm:$0xff]   ;;  %v3537_v4 = vshll.u32 %v5188_v57, 16 }
  0xc5   : > { %1836 = vmatpush1.bf16.msra.mxu1 %v5965_v8  ;;  %v3450_v8 = vsel %vm6174_vm2, %v3445_v54, %v6742_v18  ;;  %v3491_v18 = vrot.slane %v3489_v3, 5  ;;  %v3479_v30 = vrot.slane %v3478_v14, 4  ;;  %v3515_v53 = vrot.slane %v3513_v39, 5 }
  0xc6   : > { %5469 = vmatprep.subr.bf16.mxu1 %v5991_v27  ;;  %v5212_v25 = vcombine.low %v3450_v8, %v3460_v12  ;;  %v5186_v27 = vld [vmem:[%s6136_s22 + $0x58] sm:$0xf]  ;;  %v3469_v29 = vrot.slane %v3468_v13, 4  ;;  %v3534_v3 = vshrl.u32 %v5188_v57, 16  ;;  %v5971_v8 = vld [vmem:[%s6136_s22 + $0xc] sm:$0xff]   ;;  %v3539_v14 = vrot.slane %v3537_v4, 5 }
  0xc7   : > { %1523 = vmatmul.mubr.bf16.gmra.mrb[16].mxu1 %v4902_v9  ;;  %3775 = vmatmul.mubr.bf16.vlgmr.msra.gmra.mrb[0].mxu0 %v5210_v17  ;;  %v4881_v9 = vrot.slane %v1203_v50, 9  ;;  %v3488_v17 = vrot.slane %v3486_v1, 4  ;;  %v3519_v40 = vshll.u32 %v5186_v27, 16  ;;  %v3523_v41 = vshrl.u32 %v5186_v27, 16  ;;  %v5187_v50 = vld [vmem:[%s6136_s22 + $0x5c] sm:$0x1] }
  0xc8   : > { %1532 = vmatprep.mubr.bf16.mxu1 %v6015_v2  ;;  %4185 = vmatpush1.bf16.msra.mxu0 %v5950_v21  ;;  %v3501_v21 = vrot.slane %v3499_v5, 4  ;;  %v3474_v42 = vsel %vm6174_vm2, %v3469_v29, %v6786_v62  ;;  %v3484_v43 = vsel %vm6174_vm2, %v3479_v30, %v3483_v31  ;;  %v3529_v60 = vshll.u32 %v5187_v50, 16  ;;  %v5993_v31 = vld [vmem:[%s7086_s1 + $0x214] ss:$8 sps:$4 sm:$0xff]   ;;  %v5998_v57 = vld [vmem:[%s7086_s1 + $0x230] ss:$8 sps:$4 sm:$0xff]  }
  0xc9   : > { %3784 = vmatprep.mubr.bf16.mxu0 %v6015_v2  ;;  %4186 = vmatprep.subr.bf16.mxu0 %v5958_v19  ;;  %v5974_v19 = vld [vmem:[%s7086_s1 + $0x444] ss:$8 sps:$4 sm:$0xff]   ;;  %v1285_v28 = vsel %vm6281_vm5, %v4881_v9, %v1284_v58  ;;  %v3521_v54 = vrot.slane %v3519_v40, 5  ;;  %v3525_v55 = vrot.slane %v3523_v41, 4  ;;  %v5213_v56 = vcombine.low %v3474_v42, %v3484_v43  ;;  %v5193_v43 = vld [vmem:[%s6136_s22 + $0x74] sm:$0x1] }
  0xca   : > { %v3502_v35 = vor.u32 %v3501_v21, %v6806_v20  ;;  %v4905_v45 = vcombine.low %v1285_v28, %v1288_v33  ;;  %v5189_v58 = vld [vmem:[%s6136_s22 + $0x64] sm:$0xf]  ;;  %v3531_v12 = vrot.slane %v3529_v60, 5  ;;  %v3536_v13 = vrot.slane %v3534_v3, 4  ;;  %v5997_v50 = vld [vmem:[%s7086_s1 + $0x234] ss:$8 sps:$4 sm:$0xff]  }
  0xcb   : > { %v3526_v1 = vor.u32 %v3525_v55, %v3521_v54  ;;  %v3543_v5 = vshll.u32 %v5189_v58, 16  ;;  %v3547_v6 = vshrl.u32 %v5189_v58, 16  ;;  %v5999_v58 = vld [vmem:[%s7086_s1 + $0x244] ss:$8 sps:$4 sm:$0xff]   ;;  %v6001_v3 = vld [vmem:[%s7086_s1 + $0x254] ss:$8 sps:$4 sm:$0xff]  }
  0xcc   : > { %4187 = vmatpush1.bf16.msra.mxu0 %v5956_v34  ;;  %v3492_v34 = vor.u32 %v3491_v18, %v3488_v17  ;;  %v5190_v17 = vld [vmem:[%s6136_s22 + $0x68] sm:$0x1]  ;;  %v5191_v18 = vld [vmem:[%s6136_s22 + $0x6c] sm:$0xf]  ;;  %v3540_v24 = vor.u32 %v3539_v14, %v3536_v13  ;;  %v5983_v4 = vld [vmem:[%s6136_s22 + $0x30] sm:$0xff]  }
  0xcd   : > { %4188 = vmatprep.subr.bf16.mxu0 %v5964_v46  ;;  %v3527_v11 = vrot.slane %v3526_v1, 4  ;;  %v3545_v15 = vrot.slane %v3543_v5, 5  ;;  %v3553_v26 = vshll.u32 %v5190_v17, 16  ;;  %v3558_v27 = vshrl.u32 %v5191_v18, 16  ;;  %v5236_v1 = vld [vmem:[%s6136_s22 + $0x20] sm:$0x1] }
  0xce   : > { %v3493_v46 = vrot.slane %v3492_v34, 4  ;;  %v3561_v28 = vshll.u32 %v5191_v18, 16  ;;  %v5994_v34 = vld [vmem:[%s7086_s1 + $0x210] ss:$8 sps:$4 sm:$0xff]   ;;  %v5239_v17 = vld [vmem:[%s6136_s22 + $0x2c] sm:$0x1] }
  0xcf   : > { %1533 = vmatmul.mubr.bf16.gmra.mrb[20].mxu1 %v4903_v47  ;;  %3785 = vmatmul.mubr.bf16.gmra.mrb[4].mxu0 %v5211_v48  ;;  %v3503_v47 = vrot.slane %v3502_v35, 4  ;;  %v3507_v48 = vrot.slane %v3505_v36, 5  ;;  %v3541_v35 = vrot.slane %v3540_v24, 4  ;;  %v3560_v39 = vrot.slane %v3558_v27, 4  ;;  %v6005_v18 = vld [vmem:[%s7086_s1 + $0x274] ss:$8 sps:$4 sm:$0xff]  }
  0xd0   : > { %1542 = vmatprep.mubr.bf16.mxu1 %v6015_v2  ;;  %3794 = vmatprep.mubr.bf16.mxu0 %v6015_v2  ;;  %v3498_v62 = vsel %vm6174_vm2, %v3493_v46, %v6806_v20  ;;  %v5192_v20 = vld [vmem:[%s6136_s22 + $0x70] sm:$0xf]  ;;  %v3563_v40 = vrot.slane %v3561_v28, 5  ;;  %v5996_v46 = vld [vmem:[%s7086_s1 + $0x220] ss:$8 sps:$4 sm:$0xff]   ;;  %v3979_v24 = vrot.slane %v5239_v17, 5 }
  0xd1   : > { %4189 = vmatpush1.bf16.msra.mxu0 %v5962_v49  ;;  %v5982_v49 = vld [vmem:[%s7086_s1 + $0x464] ss:$8 sps:$4 sm:$0xff]   ;;  %v3508_v63 = vsel %vm6174_vm2, %v3503_v47, %v3507_v48  ;;  %v3567_v29 = vshll.u32 %v5192_v20, 16  ;;  %v3571_v30 = vshrl.u32 %v5192_v20, 16  ;;  %v5987_v20 = vld [vmem:[%s6136_s22 + $0x3c] sm:$0xff]  }
  0xd2   : > { %4190 = vmatprep.subr.bf16.mxu0 %v5970_v0  ;;  %v3516_v0 = vor.u32 %v3515_v53, %v3512_v51  ;;  %v5214_v9 = vcombine.low %v3498_v62, %v3508_v63  ;;  %v3564_v47 = vor.u32 %v3563_v40, %v3560_v39  ;;  %v5979_v51 = vld [vmem:[%s6136_s22 + $0x24] sm:$0xff]   ;;  %v5244_v39 = vld [vmem:[%s6136_s22 + $0x40] sm:$0xf] }
  0xd3   : > { %v3569_v41 = vrot.slane %v3567_v29, 5  ;;  %v3573_v42 = vrot.slane %v3571_v30, 4  ;;  %v6000_v63 = vld [vmem:[%s7086_s1 + $0x240] ss:$8 sps:$4 sm:$0xff]   ;;  %v5240_v30 = vld [vmem:[%s6136_s22 + $0x30] sm:$0xe] }
  0xd4   : > { %v3517_v10 = vrot.slane %v3516_v0, 4  ;;  %v5234_v0 = vld [vmem:[%s6136_s22 + $0x18] sm:$0xe] }
  0xd5   : > { %4191 = vmatpush1.bf16.msra.mxu0 %v5968_v16  ;;  %v3549_v16 = vrot.slane %v3547_v6, 4  ;;  %v3574_v48 = vor.u32 %v3573_v42, %v3569_v41  ;;  %v5258_v6 = vrot.slane %v5234_v0, 9 }
  0xd6   : > { %4192 = vmatprep.subr.bf16.mxu0 %v5974_v19  ;;  %v3522_v21 = vsel %vm6174_vm2, %v3517_v10, %v3521_v54  ;;  %v5992_v19 = vld [vmem:[%s7086_s1 + $0x200] ss:$8 sps:$4 sm:$0xff]   ;;  %v3565_v54 = vrot.slane %v3564_v47, 4  ;;  %v3990_v47 = vrot.slane %v5244_v39, 5 }
  0xd7   : > { %1543 = vmatmul.mubr.bf16.gmra.mrb[24].mxu1 %v4904_v23  ;;  %3795 = vmatmul.mubr.bf16.gmra.mrb[8].mxu0 %v5212_v25  ;;  %v3532_v23 = vsel %vm6174_vm2, %v3527_v11, %v3531_v12  ;;  %v3550_v25 = vor.u32 %v3549_v16, %v3545_v15  ;;  %v3575_v55 = vrot.slane %v3574_v48, 4  ;;  %v5238_v10 = vld [vmem:[%s6136_s22 + $0x28] sm:$0xf]  ;;  %v6003_v11 = vld [vmem:[%s7086_s1 + $0x264] ss:$8 sps:$4 sm:$0xff]  }
  0xd8   : > { %1552 = vmatprep.mubr.bf16.mxu1 %v6015_v2  ;;  %3804 = vmatprep.mubr.bf16.mxu0 %v6015_v2  ;;  %v5215_v33 = vcombine.low %v3522_v21, %v3532_v23  ;;  %v3570_v60 = vsel %vm6174_vm2, %v3565_v54, %v3569_v41  ;;  %v3976_v14 = vrot.slane %v5238_v10, 5  ;;  %v5237_v16 = vld [vmem:[%s6136_s22 + $0x24] sm:$0xe]  ;;  %v5245_v48 = vld [vmem:[%s6136_s22 + $0x44] sm:$0x1] }
  0xd9   : > { %4193 = vmatpush1.bf16.msra.mxu0 %v5972_v32  ;;  %v5975_v32 = vld [vmem:[%s6136_s22 + $0x18] sm:$0xff]   ;;  %v3551_v36 = vrot.slane %v3550_v25, 4  ;;  %v5241_v25 = vld [vmem:[%s6136_s22 + $0x34] sm:$0xf]  ;;  %v4992_v54 = vld [vmem:[%s6136_s22 + $0x44] sm:$0x1] }
  0xda   : > { %4194 = vmatprep.subr.bf16.mxu0 %v5978_v37  ;;  %v3555_v37 = vrot.slane %v3553_v26, 5  ;;  %v3978_v23 = vrot.slane %v3976_v14, 4  ;;  %v6006_v26 = vld [vmem:[%s7086_s1 + $0x270] ss:$8 sps:$4 sm:$0xff]   ;;  %v3983_v27 = vrot.slane %v5241_v25, 5  ;;  %v2138_v0 = vshll.u32 %v4992_v54, 16 }
  0xdb   : > { %v4996_v25 = vld [vmem:[%s6136_s22 + $0x54] sm:$0xf] }
  0xdc   : > { %v3980_v29 = vsel %vm6281_vm5, %v3978_v23, %v3979_v24 }
  0xdd   : > { %4195 = vmatpush1.bf16.msra.mxu0 %v5976_v44  ;;  %v3546_v44 = vsel %vm6174_vm2, %v3541_v35, %v3545_v15  ;;  %v6004_v15 = vld [vmem:[%s7086_s1 + $0x260] ss:$8 sps:$4 sm:$0xff]  }
  0xde   : > { %4196 = vmatprep.subr.bf16.mxu0 %v5982_v49  ;;  %v3577_v49 = vshll.u32 %v5193_v43, 16 }
  0xdf   : > { %1553 = vmatmul.mubr.bf16.gmra.mrb[28].mxu1 %v4905_v45  ;;  %3805 = vmatmul.mubr.bf16.gmra.mrb[12].mxu0 %v5213_v56  ;;  %v3556_v45 = vsel %vm6174_vm2, %v3551_v36, %v3555_v37  ;;  %v5260_v36 = vrot.slane %v5240_v30, 9  ;;  %v3985_v37 = vrot.slane %v3983_v27, 4 }
  0xe0   : > { %1853 = vmatprep.mubr.bf16.mxu1 %v6015_v2  ;;  %3814 = vmatprep.mubr.bf16.mxu0 %v6015_v2  ;;  %v5216_v53 = vcombine.low %v3546_v44, %v3556_v45  ;;  %v3579_v56 = vrot.slane %v3577_v49, 5 }
  0xe1   : > { %4197 = vmatpush1.bf16.msra.mxu0 %v5980_v59  ;;  %v5235_v59 = vld [vmem:[%s6136_s22 + $0x1c] sm:$0xf]  ;;  %v3984_v44 = vsel %vm6281_vm5, %v5260_v36, %v3983_v27 }
  0xe2   : > { %4198 = vmatprep.subr.bf16.mxu0 %v5986_v61  ;;  %v3580_v61 = vsel %vm6174_vm2, %v3575_v55, %v3579_v56  ;;  %v3969_v62 = vrot.slane %v5235_v59, 5  ;;  %v5989_v55 = vld [vmem:[%s6136_s22 + $0x54] sm:$0xff]   ;;  %v4993_v56 = vld [vmem:[%s6136_s22 + $0x48] sm:$0xf]  ;;  %v5251_v36 = vld [vmem:[%s6136_s22 + $0x5c] sm:$0x1] }
  0xe3   : > { %v5217_v5 = vcombine.low %v3570_v60, %v3580_v61  ;;  %v3992_v60 = vrot.slane %v3990_v47, 4  ;;  %v3993_v61 = vrot.slane %v5245_v48, 5 }
  0xe4   : > { %v3970_v12 = vsel %vm6281_vm5, %v5258_v6, %v3969_v62 }
  0xe5   : > { %4199 = vmatpush1.bf16.msra.mxu0 %v5984_v7  ;;  %v3971_v7 = vrot.slane %v3969_v62, 4 }
  0xe7   : > { %1854 = vmatmul.mubr.bf16.vlgmr.msra.gmra.mrb[0].mxu1 %v5971_v8  ;;  %3815 = vmatmul.mubr.bf16.gmra.mrb[16].mxu0 %v5214_v9  ;;  %v3972_v8 = vrot.slane %v5236_v1, 5  ;;  %v6002_v9 = vld [vmem:[%s7086_s1 + $0x250] ss:$8 sps:$4 sm:$0xff]   ;;  %v5247_v1 = vld [vmem:[%s6136_s22 + $0x4c] sm:$0xf] }
  0xe8   : > { %5477 = vmatpush1.bf16.msra.mxu1 %v5992_v19  ;;  %1863 = vmatprep.mubr.bf16.mxu1 %v6015_v2  ;;  %v5259_v19 = vrot.slane %v5237_v16, 9 }
  0xe9   : > { %3824 = vmatprep.mubr.bf16.mxu0 %v6015_v2  ;;  %5470 = vmatprep.subr.bf16.mxu1 %v5993_v31  ;;  %v3973_v13 = vsel %vm6281_vm5, %v3971_v7, %v3972_v8  ;;  %v5242_v31 = vld [vmem:[%s6136_s22 + $0x38] sm:$0x1]  ;;  %v3994_v8 = vsel %vm6281_vm5, %v3992_v60, %v3993_v61 }
  0xea   : > { %v5282_v21 = vcombine.low %v3970_v12, %v3973_v13  ;;  %v3977_v28 = vsel %vm6281_vm5, %v5259_v19, %v3976_v14  ;;  %v2140_v12 = vrot.slane %v2138_v0, 5  ;;  %v5248_v13 = vld [vmem:[%s6136_s22 + $0x50] sm:$0x1]  ;;  %v3997_v14 = vrot.slane %v5247_v1, 5  ;;  %v5250_v19 = vld [vmem:[%s6136_s22 + $0x58] sm:$0xf] }
  0xeb   : > { %v5283_v35 = vcombine.low %v3977_v28, %v3980_v29  ;;  %v4000_v29 = vrot.slane %v5248_v13, 5 }
  0xec   : > { %5478 = vmatpush1.bf16.msra.mxu1 %v5994_v34  ;;  %v5988_v34 = vld [vmem:[%s6136_s22 + $0x48] sm:$0xff]   ;;  %v3999_v28 = vrot.slane %v3997_v14, 4 }
  0xed   : > { %5471 = vmatprep.subr.bf16.mxu1 %v5995_v38  ;;  %v3986_v38 = vrot.slane %v5242_v31, 5 }
  0xef   : > { %1864 = vmatmul.mubr.bf16.gmra.mrb[4].mxu1 %v5975_v32  ;;  %3825 = vmatmul.mubr.bf16.gmra.mrb[20].mxu0 %v5215_v33  ;;  %v4990_v32 = vld [vmem:[%s6136_s22 + $0x3c] sm:$0xf]  ;;  %v4991_v33 = vld [vmem:[%s6136_s22 + $0x40] sm:$0xf]  ;;  %v3987_v45 = vsel %vm6281_vm5, %v3985_v37, %v3986_v38  ;;  %v2167_v37 = vshrl.u32 %v4996_v25, 16  ;;  %v2170_v38 = vshll.u32 %v4996_v25, 16 }
  0xf0   : > { %1873 = vmatprep.mubr.bf16.mxu1 %v6015_v2  ;;  %3834 = vmatprep.mubr.bf16.mxu0 %v6015_v2  ;;  %v2119_v40 = vshrl.u32 %v4990_v32, 16  ;;  %v2122_v41 = vshll.u32 %v4990_v32, 16  ;;  %v2128_v42 = vshll.u32 %v4991_v33, 16  ;;  %v2132_v43 = vshrl.u32 %v4991_v33, 16  ;;  %v5256_v25 = vld [vmem:[%s6136_s22 + $0x70] sm:$0xf] }
  0xf1   : > { %5479 = vmatpush1.bf16.msra.mxu1 %v5996_v46  ;;  %v5243_v46 = vld [vmem:[%s6136_s22 + $0x3c] sm:$0xe] }
  0xf2   : > { %5472 = vmatprep.subr.bf16.mxu1 %v5997_v50  ;;  %v2121_v49 = vrot.slane %v2119_v40, 4  ;;  %v2124_v50 = vrot.slane %v2122_v41, 5  ;;  %v5261_v59 = vrot.slane %v5243_v46, 9 }
  0xf4   : > { %v2125_v62 = vor.u32 %v2124_v50, %v2121_v49  ;;  %v3991_v7 = vsel %vm6281_vm5, %v5261_v59, %v3990_v47  ;;  %v4007_v49 = vrot.slane %v5251_v36, 5  ;;  %v2169_v50 = vrot.slane %v2167_v37, 4 }
  0xf5   : > { %5480 = vmatpush1.bf16.msra.mxu1 %v5998_v57  ;;  %v4994_v57 = vld [vmem:[%s6136_s22 + $0x4c] sm:$0xf]  ;;  %v5285_v23 = vcombine.low %v3991_v7, %v3994_v8 }
  0xf6   : > { %5473 = vmatprep.subr.bf16.mxu1 %v5999_v58  ;;  %v5284_v58 = vcombine.low %v3984_v44, %v3987_v45  ;;  %v2156_v6 = vshrl.u32 %v4994_v57, 16  ;;  %v2126_v10 = vrot.slane %v2125_v62, 4  ;;  %v5253_v62 = vld [vmem:[%s6136_s22 + $0x64] sm:$0xf] }
  0xf7   : > { %1874 = vmatmul.mubr.bf16.gmra.mrb[8].mxu1 %v5979_v51  ;;  %3835 = vmatmul.mubr.bf16.gmra.mrb[24].mxu0 %v5216_v53  ;;  %v2130_v51 = vrot.slane %v2128_v42, 5  ;;  %v2134_v53 = vrot.slane %v2132_v43, 4  ;;  %v4001_v43 = vsel %vm6281_vm5, %v3999_v28, %v4000_v29  ;;  %v4011_v8 = vrot.slane %v5253_v62, 5 }
  0xf8   : > { %1883 = vmatprep.mubr.bf16.mxu1 %v6015_v2  ;;  %3844 = vmatprep.mubr.bf16.mxu0 %v6015_v2 }
  0xf9   : > { %5481 = vmatpush1.bf16.msra.mxu1 %v6000_v63  ;;  %v2135_v63 = vor.u32 %v2134_v53, %v2130_v51  ;;  %v2131_v27 = vsel %vm6174_vm2, %v2126_v10, %v2130_v51  ;;  %v2172_v51 = vrot.slane %v2170_v38, 5  ;;  %v5252_v10 = vld [vmem:[%s6136_s22 + $0x60] sm:$0xe] }
  0xfa   : > { %5474 = vmatprep.subr.bf16.mxu1 %v6001_v3  ;;  %v2143_v3 = vshrl.u32 %v4993_v56, 16 }
  0xfb   : > { %v2173_v0 = vor.u32 %v2172_v51, %v2169_v50 }
  0xfc   : > { %v2145_v16 = vrot.slane %v2143_v3, 4 }
  0xfd   : > { %5482 = vmatpush1.bf16.msra.mxu1 %v6002_v9  ;;  %v5246_v9 = vld [vmem:[%s6136_s22 + $0x48] sm:$0xe]  ;;  %v2174_v13 = vrot.slane %v2173_v0, 4 }
  0xfe   : > { %5475 = vmatprep.subr.bf16.mxu1 %v6003_v11  ;;  %v2136_v11 = vrot.slane %v2135_v63, 4  ;;  %v5262_v24 = vrot.slane %v5246_v9, 9 }
  0xff   : > { %1884 = vmatmul.mubr.bf16.gmra.mrb[12].mxu1 %v5983_v4  ;;  %3845 = vmatmul.mubr.bf16.gmra.mrb[28].mxu0 %v5217_v5  ;;  %v2146_v4 = vshll.u32 %v4993_v56, 16  ;;  %v2152_v5 = vshll.u32 %v4994_v57, 16  ;;  %v4998_v56 = vld [vmem:[%s6136_s22 + $0x5c] sm:$0x1]  ;;  %v4999_v57 = vld [vmem:[%s6136_s22 + $0x60] sm:$0xf] }
 0x100   : > { %1893 = vmatprep.mubr.bf16.mxu1 %v6015_v2  ;;  %4216 = vmatprep.mubr.bf16.mxu0 %v6015_v2  ;;  %v2141_v31 = vsel %vm6174_vm2, %v2136_v11, %v2140_v12  ;;  %v3998_v41 = vsel %vm6281_vm5, %v5262_v24, %v3997_v14  ;;  %v2186_v3 = vshll.u32 %v4998_v56, 16  ;;  %v5254_v11 = vld [vmem:[%s6136_s22 + $0x68] sm:$0x1] }
 0x101   : > { %5483 = vmatpush1.bf16.msra.mxu1 %v6004_v15  ;;  %v4995_v15 = vld [vmem:[%s6136_s22 + $0x50] sm:$0x1]  ;;  %v2148_v17 = vrot.slane %v2146_v4, 5  ;;  %v5022_v42 = vcombine.low %v2131_v27, %v2141_v31  ;;  %v2191_v4 = vshrl.u32 %v4999_v57, 16  ;;  %v5001_v24 = vld [vmem:[%s6136_s22 + $0x68] sm:$0x1] }
 0x102   : > { %5476 = vmatprep.subr.bf16.mxu1 %v6005_v18  ;;  %v6976_v18 = vrot.slane %v2152_v5, 5  ;;  %v2162_v30 = vshll.u32 %v4995_v15, 16  ;;  %v2194_v5 = vshll.u32 %v4999_v57, 16  ;;  %v2188_v15 = vrot.slane %v2186_v3, 5 }
 0x103   : > { %v2149_v32 = vor.u32 %v2148_v17, %v2145_v16  ;;  %v2193_v16 = vrot.slane %v2191_v4, 4 }
 0x104   : > { %v2164_v44 = vrot.slane %v2162_v30, 5  ;;  %v2196_v17 = vrot.slane %v2194_v5, 5  ;;  %v2210_v30 = vshll.u32 %v5001_v24, 16 }
 0x105   : > { %5484 = vmatpush1.bf16.msra.mxu1 %v6006_v26  ;;  %v4997_v26 = vld [vmem:[%s6136_s22 + $0x58] sm:$0xf]  ;;  %v2150_v46 = vrot.slane %v2149_v32, 4 }
 0x106   : > { %v2176_v39 = vshll.u32 %v4997_v26, 16  ;;  %v2180_v40 = vshrl.u32 %v4997_v26, 16  ;;  %v2197_v28 = vor.u32 %v2196_v17, %v2193_v16 }
 0x107   : > { %1894 = vmatmul.mubr.bf16.gmra.mrb[16].mxu1 %v5987_v20  ;;  %4217 = vmatmul.mubr.bf16.vlgmr.msra.gmra.mrb[0].mxu0 %v5282_v21  ;;  %v2158_v20 = vrot.slane %v2156_v6, 4  ;;  %v5990_v21 = vld [vmem:[%s6136_s22 + $0x60] sm:$0xff]   ;;  %v2155_v59 = vsel %vm6174_vm2, %v2150_v46, %v6976_v18 }
 0x108   : > { %1903 = vmatprep.mubr.bf16.mxu1 %v6015_v2  ;;  %4226 = vmatprep.mubr.bf16.mxu0 %v6015_v2  ;;  %v2178_v53 = vrot.slane %v2176_v39, 5  ;;  %v2182_v54 = vrot.slane %v2180_v40, 4  ;;  %v2198_v38 = vrot.slane %v2197_v28, 4  ;;  %v2212_v40 = vrot.slane %v2210_v30, 5 }
 0x109   : > { %v2159_v33 = vor.u32 %v2158_v20, %v6976_v18 }
 0x10a   : > { %v2183_v1 = vor.u32 %v2182_v54, %v2178_v53  ;;  %v2179_v26 = vsel %vm6174_vm2, %v2174_v13, %v2178_v53 }
 0x10b   : > { %v2160_v47 = vrot.slane %v2159_v33, 4  ;;  %v4018_v33 = vrot.slane %v5256_v25, 5 }
 0x10c   : > { %v2184_v14 = vrot.slane %v2183_v1, 4 }
 0x10d   : > { %v2165_v63 = vsel %vm6174_vm2, %v2160_v47, %v2164_v44 }
 0x10e   : > { %v5023_v12 = vcombine.low %v2155_v59, %v2165_v63  ;;  %v2189_v27 = vsel %vm6174_vm2, %v2184_v14, %v2188_v15 }
 0x10f   : > { %1904 = vmatmul.mubr.bf16.gmra.mrb[20].mxu1 %v5988_v34  ;;  %4227 = vmatmul.mubr.bf16.gmra.mrb[4].mxu0 %v5283_v35  ;;  %v5249_v34 = vld [vmem:[%s6136_s22 + $0x54] sm:$0xe]  ;;  %v4004_v35 = vrot.slane %v5250_v19, 5  ;;  %v4013_v19 = vrot.slane %v4011_v8, 4  ;;  %v5024_v36 = vcombine.low %v2179_v26, %v2189_v27 }
 0x110   : > { %1913 = vmatprep.mubr.bf16.mxu1 %v6015_v2  ;;  %4236 = vmatprep.mubr.bf16.mxu0 %v6015_v2  ;;  %v5263_v45 = vrot.slane %v5249_v34, 9  ;;  %v5255_v34 = vld [vmem:[%s6136_s22 + $0x6c] sm:$0xe] }
 0x111   : > { %v4006_v48 = vrot.slane %v4004_v35, 4 }
 0x112   : > { %v4005_v60 = vsel %vm6281_vm5, %v5263_v45, %v4004_v35  ;;  %v5257_v35 = vld [vmem:[%s6136_s22 + $0x74] sm:$0x1] }
 0x113   : > { %v4008_v61 = vsel %vm6281_vm5, %v4006_v48, %v4007_v49 }
 0x114   : > { %v5287_v9 = vcombine.low %v4005_v60, %v4008_v61 }
 0x117   : > { %1914 = vmatmul.mubr.bf16.gmra.mrb[24].mxu1 %v5989_v55  ;;  %4237 = vmatmul.mubr.bf16.gmra.mrb[8].mxu0 %v5284_v58  ;;  %v5286_v55 = vcombine.low %v3998_v41, %v4001_v43  ;;  %v5000_v58 = vld [vmem:[%s6136_s22 + $0x64] sm:$0xf]  ;;  %v5265_v41 = vrot.slane %v5255_v34, 9  ;;  %v4021_v43 = vrot.slane %v5257_v35, 5  ;;  %s5340_s22 = sshll.u32 %s7095_s16, 6 }
 0x118   : > { %1923 = vmatprep.mubr.bf16.mxu1 %v6015_v2  ;;  %4246 = vmatprep.mubr.bf16.mxu0 %v6015_v2  ;;  %v2200_v6 = vshll.u32 %v5000_v58, 16  ;;  %v2204_v7 = vshrl.u32 %v5000_v58, 16  ;;  %s7050_s18 = scalar_lea.vmem %s7087_s2, %s5340_s22  ;;  %s7055_s21 = scalar_lea.vmem %s7088_s3, %s5340_s22 }
 0x119   : > { %v4019_v46 = vsel %vm6281_vm5, %v5265_v41, %v4018_v33 }
 0x11a   : > { %v2202_v18 = vrot.slane %v2200_v6, 5  ;;  %v2206_v20 = vrot.slane %v2204_v7, 4 }
 0x11c   : > { %v2207_v29 = vor.u32 %v2206_v20, %v2202_v18  ;;  %v2203_v44 = vsel %vm6174_vm2, %v2198_v38, %v2202_v18 }
 0x11e   : > { %v2208_v39 = vrot.slane %v2207_v29, 4 }
 0x11f   : > { %1924 = vmatmul.mubr.bf16.gmra.mrb[28].mxu1 %v5990_v21  ;;  %4247 = vmatmul.mubr.bf16.gmra.mrb[12].mxu0 %v5285_v23  ;;  %v5264_v21 = vrot.slane %v5252_v10, 9  ;;  %v4014_v23 = vrot.slane %v5254_v11, 5 }
 0x120   : > { %2447 = vmatprep.mubr.bf16.mxu1 %v6015_v2  ;;  %4256 = vmatprep.mubr.bf16.mxu0 %v6015_v2  ;;  %v2213_v45 = vsel %vm6174_vm2, %v2208_v39, %v2212_v40 }
 0x121   : > { %v4012_v31 = vsel %vm6281_vm5, %v5264_v21, %v4011_v8  ;;  %v4015_v32 = vsel %vm6281_vm5, %v4013_v19, %v4014_v23  ;;  %v5025_v48 = vcombine.low %v2203_v44, %v2213_v45 }
 0x122   : > { %v5288_v37 = vcombine.low %v4012_v31, %v4015_v32 }
 0x127   : > { %2448 = vmatmul.mubr.bf16.vlgmr.msra.gmra.mrb[16].mxu1 %v5022_v42  ;;  %4257 = vmatmul.mubr.bf16.gmra.mrb[16].mxu0 %v5286_v55  ;;  %v4020_v42 = vrot.slane %v4018_v33, 4 }
 0x128   : > { %2457 = vmatprep.mubr.bf16.mxu1 %v6015_v2  ;;  %4266 = vmatprep.mubr.bf16.mxu0 %v6015_v2 }
 0x129   : > { %v4022_v47 = vsel %vm6281_vm5, %v4020_v42, %v4021_v43 }
 0x12a   : > { %v5289_v49 = vcombine.low %v4019_v46, %v4022_v47 }
 0x12f   : > { %2458 = vmatmul.mubr.bf16.gmra.mrb[20].mxu1 %v5023_v12  ;;  %4267 = vmatmul.mubr.bf16.gmra.mrb[20].mxu0 %v5287_v9 }
 0x130   : > { %2467 = vmatprep.mubr.bf16.mxu1 %v6015_v2  ;;  %4276 = vmatprep.mubr.bf16.mxu0 %v6015_v2 }
 0x137   : > { %2468 = vmatmul.mubr.bf16.gmra.mrb[24].mxu1 %v5024_v36  ;;  %4277 = vmatmul.mubr.bf16.gmra.mrb[24].mxu0 %v5288_v37 }
 0x138   : > { %2477 = vmatprep.mubr.bf16.mxu1 %v6015_v2  ;;  %4286 = vmatprep.mubr.bf16.mxu0 %v6015_v2 }
 0x13f   : > { %2478 = vmatmul.mubr.bf16.gmra.mrb[28].mxu1 %v5025_v48  ;;  %4287 = vmatmul.mubr.bf16.gmra.mrb[28].mxu0 %v5289_v49 }
 0x1ba   : > { %v1855_v50 = vpop.f32.mrb[0].mxu1 }
 0x1bb   : > { %v1857_v51 = vpop.f32.mrb[1].mxu1 }
 0x1bc   : > { %v1859_v53 = vpop.f32.mrb[2].mxu1 }
 0x1bd   : > { %v1861_v54 = vpop.f32.mrb[3].mxu1 }
 0x1c2   : > { %v1865_v55 = vpop.f32.mrb[4].mxu1 }
 0x1c3   : > { %v1867_v52 = vpop.f32.mrb[5].mxu1 }
 0x1c4   : > { %v1869_v56 = vpop.f32.mrb[6].mxu1 }
 0x1c5   : > { %v1871_v57 = vpop.f32.mrb[7].mxu1 }
 0x1ca   : > { %v1875_v2 = vpop.f32.mrb[8].mxu1 }
 0x1cb   : > { %v1877_v58 = vpop.f32.mrb[9].mxu1 }
 0x1cc   : > { %v1879_v59 = vpop.f32.mrb[10].mxu1 }
 0x1cd   : > { %v7036_v60 = vpop.f32.mrb[11].mxu1 }
 0x1d2   : > { %v7038_v22 = vpop.f32.mrb[12].mxu1 }
 0x1d3   : > { %v7040_v61 = vpop.f32.mrb[13].mxu1 }
 0x1d4   : > { %v7042_v62 = vpop.f32.mrb[14].mxu1 }
 0x1d5   : > { %v7044_v63 = vpop.f32.mrb[15].mxu1 }
 0x1da   : > { %v4218_v0 = vpop.f32.mrb[0].mxu0 }
 0x1db   : > { %v5485_v1 = vadd.f32 %v4218_v0, %v1855_v50  ;;  %v4220_v3 = vpop.f32.mrb[1].mxu0 }
 0x1dc   : > { %v5486_v4 = vadd.f32 %v4220_v3, %v1857_v51  ;;  %v4222_v5 = vpop.f32.mrb[2].mxu0 }
 0x1dd   : > { %v5487_v6 = vadd.f32 %v4222_v5, %v1859_v53  ;;  %v4224_v7 = vpop.f32.mrb[3].mxu0  ;;  %v4595_v9 = vmul.f32 %v5485_v1, %v5485_v1 }
 0x1de   : > { %v5488_v8 = vadd.f32 %v4224_v7, %v1861_v54  ;;  %v4596_v13 = vmul.f32 %v5486_v4, %v5486_v4 }
 0x1df   : > { %v5378_v10 = vpack.c.bf16 %v5487_v6, %v5485_v1  ;;  %v4553_v11 = vadd.f32 %v5487_v6, %v5485_v1  ;;  %v4597_v12 = vmul.f32 %v5487_v6, %v5487_v6 }
 0x1e0   : > { %v5418_v14 = vpack.c.bf16 %v5488_v8, %v5486_v4  ;;  %v4574_v15 = vadd.f32 %v5488_v8, %v5486_v4  ;;  %v4598_v16 = vmul.f32 %v5488_v8, %v5488_v8 }
 0x1e1   : > { %5379 = vst [vmem:[%s7050_s18] sm:$0xff] %v5378_v10   ;;  %v4627_v17 = vadd.f32 %v4597_v12, %v4595_v9 }
 0x1e2   : > { %5419 = vst [vmem:[%s7055_s21] sm:$0xff] %v5418_v14   ;;  %v4648_v18 = vadd.f32 %v4598_v16, %v4596_v13  ;;  %v4228_v20 = vpop.f32.mrb[4].mxu0 }
 0x1e3   : > { %v5489_v21 = vadd.f32 %v4228_v20, %v1865_v55  ;;  %v4230_v19 = vpop.f32.mrb[5].mxu0 }
 0x1e4   : > { %v5490_v23 = vadd.f32 %v4230_v19, %v1867_v52  ;;  %v4232_v24 = vpop.f32.mrb[6].mxu0 }
 0x1e5   : > { %v4554_v25 = vadd.f32 %v5489_v21, %v4553_v11  ;;  %v4599_v26 = vmul.f32 %v5489_v21, %v5489_v21  ;;  %v5491_v27 = vadd.f32 %v4232_v24, %v1869_v56  ;;  %v4234_v28 = vpop.f32.mrb[7].mxu0 }
 0x1e6   : > { %v4575_v29 = vadd.f32 %v5490_v23, %v4574_v15  ;;  %v4600_v30 = vmul.f32 %v5490_v23, %v5490_v23  ;;  %v5492_v31 = vadd.f32 %v4234_v28, %v1871_v57 }
 0x1e7   : > { %v4628_v32 = vadd.f32 %v4627_v17, %v4599_v26  ;;  %v5383_v33 = vpack.c.bf16 %v5491_v27, %v5489_v21  ;;  %v4555_v34 = vadd.f32 %v5491_v27, %v4554_v25  ;;  %v4601_v35 = vmul.f32 %v5491_v27, %v5491_v27 }
 0x1e8   : > { %v4649_v36 = vadd.f32 %v4648_v18, %v4600_v30  ;;  %v5423_v37 = vpack.c.bf16 %v5492_v31, %v5490_v23  ;;  %v4576_v38 = vadd.f32 %v5492_v31, %v4575_v29  ;;  %v4602_v39 = vmul.f32 %v5492_v31, %v5492_v31 }
 0x1e9   : > { %5455 = vst [vmem:[%s7050_s18 + $0x8] sm:$0xff] %v5383_v33   ;;  %v4629_v40 = vadd.f32 %v4628_v32, %v4601_v35 }
 0x1ea   : > { %5462 = vst [vmem:[%s7055_s21 + $0x8] sm:$0xff] %v5423_v37   ;;  %v4650_v41 = vadd.f32 %v4649_v36, %v4602_v39  ;;  %v4238_v42 = vpop.f32.mrb[8].mxu0 }
 0x1eb   : > { %v5493_v43 = vadd.f32 %v4238_v42, %v1875_v2  ;;  %v4240_v44 = vpop.f32.mrb[9].mxu0 }
 0x1ec   : > { %v5494_v45 = vadd.f32 %v4240_v44, %v1877_v58  ;;  %v4242_v46 = vpop.f32.mrb[10].mxu0 }
 0x1ed   : > { %v4556_v47 = vadd.f32 %v5493_v43, %v4555_v34  ;;  %v4603_v48 = vmul.f32 %v5493_v43, %v5493_v43  ;;  %v5495_v49 = vadd.f32 %v4242_v46, %v1879_v59  ;;  %v4244_v50 = vpop.f32.mrb[11].mxu0 }
 0x1ee   : > { %v4577_v51 = vadd.f32 %v5494_v45, %v4576_v38  ;;  %v4604_v53 = vmul.f32 %v5494_v45, %v5494_v45  ;;  %v5496_v54 = vadd.f32 %v4244_v50, %v7036_v60 }
 0x1ef   : > { %v4630_v55 = vadd.f32 %v4629_v40, %v4603_v48  ;;  %v5388_v52 = vpack.c.bf16 %v5495_v49, %v5493_v43  ;;  %v4557_v56 = vadd.f32 %v5495_v49, %v4556_v47  ;;  %v4605_v57 = vmul.f32 %v5495_v49, %v5495_v49 }
 0x1f0   : > { %v4651_v0 = vadd.f32 %v4650_v41, %v4604_v53  ;;  %v5428_v1 = vpack.c.bf16 %v5496_v54, %v5494_v45  ;;  %v4578_v2 = vadd.f32 %v5496_v54, %v4577_v51  ;;  %v4606_v3 = vmul.f32 %v5496_v54, %v5496_v54 }
 0x1f1   : > { %5456 = vst [vmem:[%s7050_s18 + $0x10] sm:$0xff] %v5388_v52   ;;  %v4631_v58 = vadd.f32 %v4630_v55, %v4605_v57 }
 0x1f2   : > { %5463 = vst [vmem:[%s7055_s21 + $0x10] sm:$0xff] %v5428_v1   ;;  %v4652_v4 = vadd.f32 %v4651_v0, %v4606_v3  ;;  %v4248_v5 = vpop.f32.mrb[12].mxu0 }
 0x1f3   : > { %v5497_v59 = vadd.f32 %v4248_v5, %v7038_v22  ;;  %v4250_v6 = vpop.f32.mrb[13].mxu0 }
 0x1f4   : > { %v5498_v7 = vadd.f32 %v4250_v6, %v7040_v61  ;;  %v4252_v8 = vpop.f32.mrb[14].mxu0 }
 0x1f5   : > { %v4558_v60 = vadd.f32 %v5497_v59, %v4557_v56  ;;  %v4607_v9 = vmul.f32 %v5497_v59, %v5497_v59  ;;  %v5499_v10 = vadd.f32 %v4252_v8, %v7042_v62  ;;  %v4254_v11 = vpop.f32.mrb[15].mxu0 }
 0x1f6   : > { %v4579_v12 = vadd.f32 %v5498_v7, %v4578_v2  ;;  %v4608_v13 = vmul.f32 %v5498_v7, %v5498_v7  ;;  %v5500_v14 = vadd.f32 %v4254_v11, %v7044_v63 }
 0x1f7   : > { %v4632_v15 = vadd.f32 %v4631_v58, %v4607_v9  ;;  %v5393_v16 = vpack.c.bf16 %v5499_v10, %v5497_v59  ;;  %v4559_v17 = vadd.f32 %v5499_v10, %v4558_v60  ;;  %v4609_v18 = vmul.f32 %v5499_v10, %v5499_v10 }
 0x1f8   : > { %v4653_v22 = vadd.f32 %v4652_v4, %v4608_v13  ;;  %v5433_v20 = vpack.c.bf16 %v5500_v14, %v5498_v7  ;;  %v4580_v21 = vadd.f32 %v5500_v14, %v4579_v12  ;;  %v4610_v61 = vmul.f32 %v5500_v14, %v5500_v14 }
 0x1f9   : > { %5457 = vst [vmem:[%s7050_s18 + $0x18] sm:$0xff] %v5393_v16   ;;  %v4633_v19 = vadd.f32 %v4632_v15, %v4609_v18 }
 0x1fa   : > { %v2449_v23 = vpop.f32.mrb[16].mxu1  ;;  %5464 = vst [vmem:[%s7055_s21 + $0x18] sm:$0xff] %v5433_v20   ;;  %v4654_v24 = vadd.f32 %v4653_v22, %v4610_v61  ;;  %v4258_v62 = vpop.f32.mrb[16].mxu0 }
 0x1fb   : > { %v2451_v25 = vpop.f32.mrb[17].mxu1  ;;  %v5501_v26 = vadd.f32 %v4258_v62, %v2449_v23  ;;  %v4260_v27 = vpop.f32.mrb[17].mxu0 }
 0x1fc   : > { %v2453_v28 = vpop.f32.mrb[18].mxu1  ;;  %v5502_v29 = vadd.f32 %v4260_v27, %v2451_v25  ;;  %v4262_v63 = vpop.f32.mrb[18].mxu0 }
 0x1fd   : > { %v2455_v30 = vpop.f32.mrb[19].mxu1  ;;  %v4560_v31 = vadd.f32 %v5501_v26, %v4559_v17  ;;  %v4611_v32 = vmul.f32 %v5501_v26, %v5501_v26  ;;  %v5503_v33 = vadd.f32 %v4262_v63, %v2453_v28  ;;  %v4264_v34 = vpop.f32.mrb[19].mxu0 }
 0x1fe   : > { %v4581_v35 = vadd.f32 %v5502_v29, %v4580_v21  ;;  %v4612_v36 = vmul.f32 %v5502_v29, %v5502_v29  ;;  %v5504_v37 = vadd.f32 %v4264_v34, %v2455_v30 }
 0x1ff   : > { %v4634_v38 = vadd.f32 %v4633_v19, %v4611_v32  ;;  %v5398_v39 = vpack.c.bf16 %v5503_v33, %v5501_v26  ;;  %v4561_v40 = vadd.f32 %v5503_v33, %v4560_v31  ;;  %v4613_v41 = vmul.f32 %v5503_v33, %v5503_v33 }
 0x200   : > { %v4655_v42 = vadd.f32 %v4654_v24, %v4612_v36  ;;  %v5438_v43 = vpack.c.bf16 %v5504_v37, %v5502_v29  ;;  %v4582_v44 = vadd.f32 %v5504_v37, %v4581_v35  ;;  %v4614_v45 = vmul.f32 %v5504_v37, %v5504_v37 }
 0x201   : > { %5458 = vst [vmem:[%s7050_s18 + $0x20] sm:$0xff] %v5398_v39   ;;  %v4635_v46 = vadd.f32 %v4634_v38, %v4613_v41 }
 0x202   : > { %v2459_v47 = vpop.f32.mrb[20].mxu1  ;;  %5465 = vst [vmem:[%s7055_s21 + $0x20] sm:$0xff] %v5438_v43   ;;  %v4656_v48 = vadd.f32 %v4655_v42, %v4614_v45  ;;  %v4268_v49 = vpop.f32.mrb[20].mxu0 }
 0x203   : > { %v2461_v50 = vpop.f32.mrb[21].mxu1  ;;  %v5505_v51 = vadd.f32 %v4268_v49, %v2459_v47  ;;  %v4270_v53 = vpop.f32.mrb[21].mxu0 }
 0x204   : > { %v2463_v54 = vpop.f32.mrb[22].mxu1  ;;  %v5506_v55 = vadd.f32 %v4270_v53, %v2461_v50  ;;  %v4272_v52 = vpop.f32.mrb[22].mxu0 }
 0x205   : > { %v2465_v56 = vpop.f32.mrb[23].mxu1  ;;  %v4562_v57 = vadd.f32 %v5505_v51, %v4561_v40  ;;  %v4615_v0 = vmul.f32 %v5505_v51, %v5505_v51  ;;  %v5507_v1 = vadd.f32 %v4272_v52, %v2463_v54  ;;  %v4274_v2 = vpop.f32.mrb[23].mxu0 }
 0x206   : > { %v4583_v3 = vadd.f32 %v5506_v55, %v4582_v44  ;;  %v4616_v58 = vmul.f32 %v5506_v55, %v5506_v55  ;;  %v5508_v4 = vadd.f32 %v4274_v2, %v2465_v56 }
 0x207   : > { %v4636_v5 = vadd.f32 %v4635_v46, %v4615_v0  ;;  %v5403_v59 = vpack.c.bf16 %v5507_v1, %v5505_v51  ;;  %v4563_v6 = vadd.f32 %v5507_v1, %v4562_v57  ;;  %v4617_v7 = vmul.f32 %v5507_v1, %v5507_v1 }
 0x208   : > { %v4657_v8 = vadd.f32 %v4656_v48, %v4616_v58  ;;  %v5443_v60 = vpack.c.bf16 %v5508_v4, %v5506_v55  ;;  %v4584_v9 = vadd.f32 %v5508_v4, %v4583_v3  ;;  %v4618_v10 = vmul.f32 %v5508_v4, %v5508_v4 }
 0x209   : > { %5459 = vst [vmem:[%s7050_s18 + $0x28] sm:$0xff] %v5403_v59   ;;  %v4637_v11 = vadd.f32 %v4636_v5, %v4617_v7 }
 0x20a   : > { %v2469_v12 = vpop.f32.mrb[24].mxu1  ;;  %5466 = vst [vmem:[%s7055_s21 + $0x28] sm:$0xff] %v5443_v60   ;;  %v4658_v13 = vadd.f32 %v4657_v8, %v4618_v10  ;;  %v4278_v14 = vpop.f32.mrb[24].mxu0 }
 0x20b   : > { %v2471_v15 = vpop.f32.mrb[25].mxu1  ;;  %v5509_v16 = vadd.f32 %v4278_v14, %v2469_v12  ;;  %v4280_v17 = vpop.f32.mrb[25].mxu0 }
 0x20c   : > { %v2473_v18 = vpop.f32.mrb[26].mxu1  ;;  %v5510_v22 = vadd.f32 %v4280_v17, %v2471_v15  ;;  %v4282_v20 = vpop.f32.mrb[26].mxu0 }
 0x20d   : > { %v2475_v21 = vpop.f32.mrb[27].mxu1  ;;  %v4564_v61 = vadd.f32 %v5509_v16, %v4563_v6  ;;  %v4619_v19 = vmul.f32 %v5509_v16, %v5509_v16  ;;  %v5511_v23 = vadd.f32 %v4282_v20, %v2473_v18  ;;  %v4284_v24 = vpop.f32.mrb[27].mxu0 }
 0x20e   : > { %v4585_v62 = vadd.f32 %v5510_v22, %v4584_v9  ;;  %v4620_v25 = vmul.f32 %v5510_v22, %v5510_v22  ;;  %v5512_v26 = vadd.f32 %v4284_v24, %v2475_v21 }
 0x20f   : > { %v4638_v27 = vadd.f32 %v4637_v11, %v4619_v19  ;;  %v5408_v28 = vpack.c.bf16 %v5511_v23, %v5509_v16  ;;  %v4565_v29 = vadd.f32 %v5511_v23, %v4564_v61  ;;  %v4621_v63 = vmul.f32 %v5511_v23, %v5511_v23 }
 0x210   : > { %v4659_v30 = vadd.f32 %v4658_v13, %v4620_v25  ;;  %v5448_v31 = vpack.c.bf16 %v5512_v26, %v5510_v22  ;;  %v4586_v32 = vadd.f32 %v5512_v26, %v4585_v62  ;;  %v4622_v33 = vmul.f32 %v5512_v26, %v5512_v26 }
 0x211   : > { %5460 = vst [vmem:[%s7050_s18 + $0x30] sm:$0xff] %v5408_v28   ;;  %v4639_v34 = vadd.f32 %v4638_v27, %v4621_v63 }
 0x212   : > { %v2479_v35 = vpop.f32.mrb[28].mxu1  ;;  %5467 = vst [vmem:[%s7055_s21 + $0x30] sm:$0xff] %v5448_v31   ;;  %v4660_v36 = vadd.f32 %v4659_v30, %v4622_v33  ;;  %v4288_v37 = vpop.f32.mrb[28].mxu0 }
 0x213   : > { %v2481_v38 = vpop.f32.mrb[29].mxu1  ;;  %v5513_v39 = vadd.f32 %v4288_v37, %v2479_v35  ;;  %v4290_v40 = vpop.f32.mrb[29].mxu0 }
 0x214   : > { %v2483_v41 = vpop.f32.mrb[30].mxu1  ;;  %v5514_v42 = vadd.f32 %v4290_v40, %v2481_v38  ;;  %v4292_v43 = vpop.f32.mrb[30].mxu0 }
 0x215   : > { %v2485_v44 = vpop.f32.mrb[31].mxu1  ;;  %v4566_v45 = vadd.f32 %v5513_v39, %v4565_v29  ;;  %v4623_v46 = vmul.f32 %v5513_v39, %v5513_v39  ;;  %v5515_v47 = vadd.f32 %v4292_v43, %v2483_v41  ;;  %v4294_v48 = vpop.f32.mrb[31].mxu0 }
 0x216   : > { %v4587_v49 = vadd.f32 %v5514_v42, %v4586_v32  ;;  %v4624_v50 = vmul.f32 %v5514_v42, %v5514_v42  ;;  %v5516_v51 = vadd.f32 %v4294_v48, %v2485_v44 }
 0x217   : > { %v4640_v53 = vadd.f32 %v4639_v34, %v4623_v46  ;;  %v5413_v54 = vpack.c.bf16 %v5515_v47, %v5513_v39  ;;  %v4567_v55 = vadd.f32 %v5515_v47, %v4566_v45  ;;  %v4625_v52 = vmul.f32 %v5515_v47, %v5515_v47 }
 0x218   : > { %v4661_v56 = vadd.f32 %v4660_v36, %v4624_v50  ;;  %v5453_v57 = vpack.c.bf16 %v5516_v51, %v5514_v42  ;;  %v4588_v0 = vadd.f32 %v5516_v51, %v4587_v49  ;;  %v4626_v1 = vmul.f32 %v5516_v51, %v5516_v51 }
 0x219   : > { %5461 = vst [vmem:[%s7050_s18 + $0x38] sm:$0xff] %v5413_v54   ;;  %v4568_v2 = vrot.slane %v4567_v55, 4  ;;  %v4641_v3 = vadd.f32 %v4640_v53, %v4625_v52 }
 0x21a   : > { %5468 = vst [vmem:[%s7055_s21 + $0x38] sm:$0xff] %v5453_v57   ;;  %v4589_v58 = vrot.slane %v4588_v0, 4  ;;  %v4662_v4 = vadd.f32 %v4661_v56, %v4626_v1 }
 0x21b   : > { %v4569_v5 = vadd.f32 %v4568_v2, %v4567_v55  ;;  %v4642_v59 = vrot.slane %v4641_v3, 4 }
 0x21c   : > { %v4590_v6 = vadd.f32 %v4589_v58, %v4588_v0  ;;  %v4663_v7 = vrot.slane %v4662_v4, 4 }
 0x21d   : > { %v4570_v8 = vrot.slane %v4569_v5, 2  ;;  %v4643_v60 = vadd.f32 %v4642_v59, %v4641_v3 }
 0x21e   : > { %v4591_v9 = vrot.slane %v4590_v6, 2  ;;  %v4664_v10 = vadd.f32 %v4663_v7, %v4662_v4 }
 0x21f   : > { %v4571_v11 = vadd.f32 %v4570_v8, %v4569_v5  ;;  %v4644_v12 = vrot.slane %v4643_v60, 2 }
 0x220   : > { %v4592_v13 = vadd.f32 %v4591_v9, %v4590_v6  ;;  %v4665_v14 = vrot.slane %v4664_v10, 2 }
 0x221   : > { %v4572_v15 = vrot.slane %v4571_v11, 1  ;;  %v4645_v16 = vadd.f32 %v4644_v12, %v4643_v60 }
 0x222   : > { %v4593_v17 = vrot.slane %v4592_v13, 1  ;;  %v4666_v18 = vadd.f32 %v4665_v14, %v4664_v10 }
 0x223   : > { %v4646_v22 = vrot.slane %v4645_v16, 1  ;;  %v4573_v21 = vadd.f32 %v4572_v15, %v4571_v11 }
 0x224   : > { %v4667_v20 = vrot.slane %v4666_v18, 1  ;;  %v4594_v19 = vadd.f32 %v4593_v17, %v4592_v13 }
 0x225   : > { %v4647_v61 = vadd.f32 %v4646_v22, %v4645_v16 }
 0x226   : > { %v4668_v23 = vadd.f32 %v4667_v20, %v4666_v18 }
 0x227   : > { %v4670_v24 = vsel %vm4669_vm6, %v4573_v21, %v4647_v61 }
 0x228   : > { %v4673_v62 = vsel %vm4672_vm7, %v4670_v24, 0.0  ;;  %v4671_v25 = vsel %vm4669_vm6, %v4594_v19, %v4668_v23 }
 0x229   : > { %4675 = vst [vmem:[%s222_s26] sm:$0xff] %v4673_v62  ;;  %v4674_v26 = vsel %vm4672_vm7, %v4671_v25, 0.0 }
 0x22a   : > { %4676 = vst [vmem:[%s222_s26 + $0x8] sm:$0xff] %v4674_v26 }
 0x22b PF: > { %s15_s15 = sadd.s32 1, %s6013_s15  }
 0x22c   : > { %p12_p4 = scmp.ge.s32.totalorder %s15_s15, 6  }
 0x22e   :  { %14 = sbr.rel (!%p12_p4) target bundleno = 1 (0x1), region = 92 }

// kernel: resblock_forward.4
= control target key start
LH: loop header
LB: loop body
LE: loop exit
PB: predicated region body
PF: predicated region fallthrough
CT: control target
= control target key end

     0   :  { %s4909_s12 = smov 0   ;;  %s5616_s0 = inlined_call_operand.vmem [shape: bf16[4,10,18,128], index: 0, kind: input, shape index: {}]   ;;  %s5617_s1 = inlined_call_operand.vmem [shape: bf16[9,128,128], index: 1, kind: input, shape index: {}]   ;;  %s5618_s2 = inlined_call_operand.vmem [shape: bf16[4,8,16,128], index: 2, kind: output, shape index: {0}]   ;;  %s5619_s3 = inlined_call_operand.vmem [shape: f32[4,8,128], index: 3, kind: output, shape index: {1}]  }
   0x1 LB: > { %s3685_s13 = sadd.s32 4294967295, %s4887_s12   ;;  %p3689_p0 = scmp.ge.s32.totalorder %s4887_s12, 1  ;;  %s4887_s12 = sphi %s4909_s12, %s14_s12  }
   0x2   : > { %p140_p1 = scmp.lt.s32.totalorder %s4887_s12, 5 }
   0x4   : > { %p141_p2 = pnand %p3689_p0, %p140_p1 }
   0x5   : > { %v4785_v0 = vld [vmem:[%s5617_s1] sm:$0xff] (!%p141_p2)   ;;  %v4787_v2 = vld [vmem:[%s5617_s1 + $0x8] sm:$0xff] (!%p141_p2)   ;;  %p168_p3 = scmp.lt.s32.totalorder (!%p141_p2), %s3685_s13, 3  ;;  %v4789_v4 = vld [vmem:[%s5617_s1 + $0x10] sm:$0xff] (!%p141_p2)   ;;  %vm496_vm0 = vsmask.f32 (!%p141_p2), 3328 }
   0x6   : > { %144 = sbr.rel (%p141_p2) target bundleno = 447 (0x1bf), region = 28  ;;  %v4786_v1 = vld [vmem:[%s5617_s1 + $0x100] sm:$0xff] (!%p141_p2)   ;;  %4344 = vmatprep.subr.bf16.mxu1 (!%p141_p2), %v4785_v0  ;;  %v4788_v3 = vld [vmem:[%s5617_s1 + $0x108] sm:$0xff] (!%p141_p2)   ;;  %v4790_v5 = vld [vmem:[%s5617_s1 + $0x110] sm:$0xff] (!%p141_p2)   ;;  %vm497_vm1 = vsmask.f32 (!%p141_p2), 7440 }
   0x7   : > { %4472 = vmatprep.subr.bf16.mxu0 (!%p141_p2), %v4786_v1  ;;  %4345 = vmatpush3.bf16.msra.mxu1 (!%p141_p2), %v4785_v0  ;;  %v4791_v6 = vld [vmem:[%s5617_s1 + $0x18] sm:$0xff] (!%p141_p2)   ;;  %v4793_v8 = vld [vmem:[%s5617_s1 + $0x20] sm:$0xff] (!%p141_p2)   ;;  %v4795_v10 = vld [vmem:[%s5617_s1 + $0x28] sm:$0xff] (!%p141_p2)   ;;  %vm981_vm3 = vcmask (!%p141_p2), 1042432   ;;  %vm982_vm4 = vcmask (!%p141_p2), 1046532   ;;  %vm3594_vm6 = vcmask (!%p141_p2), 1040384  }
   0x8   : > { %4473 = vmatpush3.bf16.msra.mxu0 (!%p141_p2), %v4786_v1  ;;  %4346 = vmatprep.subr.bf16.mxu1 (!%p141_p2), %v4787_v2  ;;  %v4792_v7 = vld [vmem:[%s5617_s1 + $0x118] sm:$0xff] (!%p141_p2)   ;;  %v4794_v9 = vld [vmem:[%s5617_s1 + $0x120] sm:$0xff] (!%p141_p2)   ;;  %v4796_v11 = vld [vmem:[%s5617_s1 + $0x128] sm:$0xff] (!%p141_p2)   ;;  %vm3596_vm7 = vcmask (!%p141_p2), 1041408  }
   0x9   : > { %4474 = vmatprep.subr.bf16.mxu0 (!%p141_p2), %v4788_v3  ;;  %v4797_v18 = vld [vmem:[%s5617_s1 + $0x30] sm:$0xff] (!%p141_p2)   ;;  %v4799_v32 = vld [vmem:[%s5617_s1 + $0x38] sm:$0xff] (!%p141_p2)   ;;  %vm4979_vm2 = vmor (!%p141_p2), %vm496_vm0, %vm497_vm1 }
   0xa   : > { %v4798_v24 = vld [vmem:[%s5617_s1 + $0x130] sm:$0xff] (!%p141_p2)   ;;  %v4800_v38 = vld [vmem:[%s5617_s1 + $0x138] sm:$0xff] (!%p141_p2)   ;;  %v4803_v49 = vld [vmem:[%s5617_s1 + $0x40] sm:$0xff] (!%p141_p2)  }
   0xb   : > { %4347 = vmatpush3.bf16.msra.mxu1 (!%p141_p2), %v4787_v2  ;;  %v4804_v55 = vld [vmem:[%s5617_s1 + $0x140] sm:$0xff] (!%p141_p2)   ;;  %v4805_v2 = vld [vmem:[%s5617_s1 + $0x48] sm:$0xff] (!%p141_p2)   ;;  %vm5101_vm5 = vmor (!%p141_p2), %vm981_vm3, %vm982_vm4 }
   0xc   : > { %4475 = vmatpush3.bf16.msra.mxu0 (!%p141_p2), %v4788_v3  ;;  %4348 = vmatprep.subr.bf16.mxu1 (!%p141_p2), %v4789_v4 }
   0xd   : > { %s5625_s13 = smov (!%p168_p3, %s3685_s13), 3  ;;  %4476 = vmatprep.subr.bf16.mxu0 %v4790_v5 }
   0xe   : > { %s4776_s30 = smul.u32 120, %s5625_s13  ;;  %s3693_s20 = sshll.u32 %s5625_s13, 3 }
   0xf   : > { %4349 = vmatpush3.bf16.msra.mxu1 %v4789_v4  ;;  %s181_s23 = scalar_lea.vmem %s5619_s3, %s3693_s20 }
  0x10   : > { %4477 = vmatpush3.bf16.msra.mxu0 %v4790_v5  ;;  %4350 = vmatprep.subr.bf16.mxu1 %v4791_v6  ;;  %s4956_s14 = scalar_lea.vmem %s5616_s0, %s4776_s30 }
  0x11   : > { %4478 = vmatprep.subr.bf16.mxu0 %v4792_v7  ;;  %v4801_v12 = vld [vmem:[%s4956_s14] sm:$0xff]   ;;  %v3830_v13 = vld [vmem:[%s4956_s14 + $0xc] sm:$0xf]  ;;  %v3831_v14 = vld [vmem:[%s4956_s14 + $0x10] sm:$0xf] }
  0x12   : > { %4360 = vmatprep.mubr.bf16.mxu1 %v4801_v12  ;;  %v3832_v15 = vld [vmem:[%s4956_s14 + $0x14] sm:$0x1]  ;;  %v1582_v16 = vshrl.u32 %v3830_v13, 16  ;;  %v1585_v17 = vshll.u32 %v3830_v13, 16  ;;  %v1591_v19 = vshll.u32 %v3831_v14, 16  ;;  %v1595_v20 = vshrl.u32 %v3831_v14, 16 }
  0x13   : > { %4351 = vmatpush3.bf16.msra.mxu1 %v4791_v6  ;;  %v1601_v21 = vshll.u32 %v3832_v15, 16  ;;  %v3833_v29 = vld [vmem:[%s4956_s14 + $0x18] sm:$0xf]  ;;  %v3834_v30 = vld [vmem:[%s4956_s14 + $0x1c] sm:$0xf]  ;;  %v4802_v52 = vld [vmem:[%s4956_s14 + $0xc] sm:$0xff]  }
  0x14   : > { %4479 = vmatpush3.bf16.msra.mxu0 %v4792_v7  ;;  %4352 = vmatprep.subr.bf16.mxu1 %v4793_v8  ;;  %v1584_v22 = vrot.slane %v1582_v16, 4  ;;  %v1587_v23 = vrot.slane %v1585_v17, 5  ;;  %v1593_v25 = vrot.slane %v1591_v19, 5  ;;  %v1597_v26 = vrot.slane %v1595_v20, 4  ;;  %v3835_v31 = vld [vmem:[%s4956_s14 + $0x20] sm:$0x1] }
  0x15   : > { %4480 = vmatprep.subr.bf16.mxu0 %v4794_v9  ;;  %v1603_v27 = vrot.slane %v1601_v21, 5  ;;  %v1606_v35 = vshrl.u32 %v3833_v29, 16  ;;  %v1609_v36 = vshll.u32 %v3833_v29, 16  ;;  %v1615_v37 = vshll.u32 %v3834_v30, 16  ;;  %v3836_v56 = vld [vmem:[%s4956_s14 + $0x24] sm:$0xf] }
  0x16   : > { %v1588_v28 = vor.u32 %v1587_v23, %v1584_v22  ;;  %v1598_v34 = vor.u32 %v1597_v26, %v1593_v25  ;;  %v1619_v40 = vshrl.u32 %v3834_v30, 16  ;;  %v1625_v41 = vshll.u32 %v3835_v31, 16  ;;  %v3837_v58 = vld [vmem:[%s4956_s14 + $0x28] sm:$0xf]  ;;  %v3838_v59 = vld [vmem:[%s4956_s14 + $0x2c] sm:$0x1] }
  0x17   : > { %4353 = vmatpush3.bf16.msra.mxu1 %v4793_v8  ;;  %v1608_v43 = vrot.slane %v1606_v35, 4  ;;  %v1611_v44 = vrot.slane %v1609_v36, 5  ;;  %v1617_v45 = vrot.slane %v1615_v37, 5  ;;  %v1630_v60 = vshrl.u32 %v3836_v56, 16  ;;  %v4806_v6 = vld [vmem:[%s5617_s1 + $0x148] sm:$0xff]   ;;  %v4809_v16 = vld [vmem:[%s5617_s1 + $0x50] sm:$0xff]  }
  0x18   : > { %4481 = vmatpush3.bf16.msra.mxu0 %v4794_v9  ;;  %4354 = vmatprep.subr.bf16.mxu1 %v4795_v10  ;;  %v1589_v39 = vrot.slane %v1588_v28, 4  ;;  %v1599_v42 = vrot.slane %v1598_v34, 4  ;;  %v1621_v47 = vrot.slane %v1619_v40, 4  ;;  %v1627_v54 = vrot.slane %v1625_v41, 5  ;;  %v3839_v13 = vld [vmem:[%s4956_s14 + $0x30] sm:$0xf] }
  0x19   : > { %4482 = vmatprep.subr.bf16.mxu0 %v4796_v11  ;;  %v1612_v50 = vor.u32 %v1611_v44, %v1608_v43  ;;  %v1633_v62 = vshll.u32 %v3836_v56, 16  ;;  %v1639_v63 = vshll.u32 %v3837_v58, 16  ;;  %v1643_v0 = vshrl.u32 %v3837_v58, 16  ;;  %v3840_v17 = vld [vmem:[%s4956_s14 + $0x34] sm:$0xf]  ;;  %v4812_v41 = vld [vmem:[%s5617_s1 + $0x158] sm:$0xff]  }
  0x1a   : > { %v1594_v46 = vsel %vm4979_vm2, %v1589_v39, %v1593_v25  ;;  %v1604_v48 = vsel %vm4979_vm2, %v1599_v42, %v1603_v27  ;;  %v1622_v53 = vor.u32 %v1621_v47, %v1617_v45  ;;  %v1632_v3 = vrot.slane %v1630_v60, 4  ;;  %v4808_v27 = vld [vmem:[%s4956_s14 + $0x24] sm:$0xff]   ;;  %v4813_v34 = vld [vmem:[%s4956_s14 + $0x30] sm:$0xff]   ;;  %v3842_v42 = vld [vmem:[%s4956_s14 + $0x3c] sm:$0xf] }
  0x1b   : > { %4355 = vmatpush3.bf16.msra.mxu1 %v4795_v10  ;;  %v3870_v51 = vcombine.low %v1594_v46, %v1604_v48  ;;  %v1613_v57 = vrot.slane %v1612_v50, 4  ;;  %v1649_v4 = vshll.u32 %v3838_v59, 16  ;;  %v1635_v7 = vrot.slane %v1633_v62, 5  ;;  %v3843_v44 = vld [vmem:[%s4956_s14 + $0x40] sm:$0xf] }
  0x1c   : > { %4483 = vmatpush3.bf16.msra.mxu0 %v4796_v11  ;;  %4356 = vmatprep.subr.bf16.mxu1 %v4797_v18  ;;  %v1623_v61 = vrot.slane %v1622_v53, 4  ;;  %v1641_v8 = vrot.slane %v1639_v63, 5  ;;  %v1645_v9 = vrot.slane %v1643_v0, 4  ;;  %v4807_v11 = vld [vmem:[%s4956_s14 + $0x18] sm:$0xff]   ;;  %v1654_v19 = vshrl.u32 %v3839_v13, 16  ;;  %v4815_v58 = vld [vmem:[%s5617_s1 + $0x60] sm:$0xff]  }
  0x1d   : > { %4484 = vmatprep.subr.bf16.mxu0 %v4798_v24  ;;  %4488 = vmatprep.mubr.bf16.mxu0 %v3870_v51  ;;  %v1618_v1 = vsel %vm4979_vm2, %v1613_v57, %v1617_v45  ;;  %v1651_v12 = vrot.slane %v1649_v4, 5  ;;  %v1636_v14 = vor.u32 %v1635_v7, %v1632_v3  ;;  %v1657_v20 = vshll.u32 %v3839_v13, 16  ;;  %v3844_v45 = vld [vmem:[%s4956_s14 + $0x44] sm:$0x1]  ;;  %v4817_v13 = vld [vmem:[%s5617_s1 + $0x68] sm:$0xff]  }
  0x1e   : > { %v1628_v5 = vsel %vm4979_vm2, %v1623_v61, %v1627_v54  ;;  %v1646_v15 = vor.u32 %v1645_v9, %v1641_v8  ;;  %v1663_v21 = vshll.u32 %v3840_v17, 16  ;;  %v1667_v22 = vshrl.u32 %v3840_v17, 16  ;;  %v3845_v61 = vld [vmem:[%s4956_s14 + $0x48] sm:$0xf]  ;;  %v4816_v62 = vld [vmem:[%s5617_s1 + $0x160] sm:$0xff]  }
  0x1f   : > { %4357 = vmatpush3.bf16.msra.mxu1 %v4797_v18  ;;  %v3871_v10 = vcombine.low %v1618_v1, %v1628_v5  ;;  %v3841_v18 = vld [vmem:[%s4956_s14 + $0x38] sm:$0x1]  ;;  %v1637_v25 = vrot.slane %v1636_v14, 4  ;;  %v1656_v28 = vrot.slane %v1654_v19, 4  ;;  %v1659_v29 = vrot.slane %v1657_v20, 5  ;;  %v4814_v5 = vld [vmem:[%s4956_s14 + $0x3c] sm:$0xff]  }
  0x20   : > { %4485 = vmatpush3.bf16.msra.mxu0 %v4798_v24  ;;  %4358 = vmatprep.subr.bf16.mxu1 %v4799_v32  ;;  %v1673_v23 = vshll.u32 %v3841_v18, 16  ;;  %v4810_v24 = vld [vmem:[%s5617_s1 + $0x150] sm:$0xff]   ;;  %v1647_v26 = vrot.slane %v1646_v15, 4  ;;  %v1665_v30 = vrot.slane %v1663_v21, 5  ;;  %v1669_v31 = vrot.slane %v1667_v22, 4  ;;  %v4818_v14 = vld [vmem:[%s5617_s1 + $0x168] sm:$0xff]  }
  0x21   : > { %4486 = vmatprep.subr.bf16.mxu0 %v4800_v38  ;;  %v1642_v35 = vsel %vm4979_vm2, %v1637_v25, %v1641_v8  ;;  %v1660_v37 = vor.u32 %v1659_v29, %v1656_v28  ;;  %v1678_v46 = vshrl.u32 %v3842_v42, 16  ;;  %v1681_v48 = vshll.u32 %v3842_v42, 16  ;;  %v3846_v1 = vld [vmem:[%s4956_s14 + $0x4c] sm:$0xf] }
  0x22   : > { %v1652_v36 = vsel %vm4979_vm2, %v1647_v26, %v1651_v12  ;;  %v1670_v40 = vor.u32 %v1669_v31, %v1665_v30  ;;  %v1691_v50 = vshrl.u32 %v3843_v44, 16  ;;  %v1697_v53 = vshll.u32 %v3844_v45, 16  ;;  %v4819_v18 = vld [vmem:[%s4956_s14 + $0x48] sm:$0xff]   ;;  %v3849_v26 = vld [vmem:[%s4956_s14 + $0x58] sm:$0xf] }
  0x23   : > { %4359 = vmatpush3.bf16.msra.mxu1 %v4799_v32  ;;  %v1675_v32 = vrot.slane %v1673_v23, 5  ;;  %v3872_v39 = vcombine.low %v1642_v35, %v1652_v36  ;;  %v1661_v43 = vrot.slane %v1660_v37, 4  ;;  %v1702_v3 = vshrl.u32 %v3845_v61, 16  ;;  %v4820_v37 = vld [vmem:[%s4956_s14 + $0x54] sm:$0xff]  }
  0x24   : > { %4487 = vmatpush3.bf16.msra.mxu0 %v4800_v38  ;;  %4376 = vmatprep.subr.bf16.mxu1 %v4803_v49  ;;  %v4811_v38 = vld [vmem:[%s5617_s1 + $0x58] sm:$0xff]   ;;  %v1671_v47 = vrot.slane %v1670_v40, 4  ;;  %v1693_v57 = vrot.slane %v1691_v50, 4  ;;  %v1699_v60 = vrot.slane %v1697_v53, 5  ;;  %v1705_v4 = vshll.u32 %v3845_v61, 16 }
  0x25   : > { %4504 = vmatprep.subr.bf16.mxu0 %v4804_v55  ;;  %v1666_v51 = vsel %vm4979_vm2, %v1661_v43, %v1665_v30  ;;  %v1715_v7 = vshrl.u32 %v3846_v1, 16  ;;  %v1735_v31 = vshll.u32 %v3849_v26, 16  ;;  %v4822_v43 = vld [vmem:[%s5617_s1 + $0x170] sm:$0xff]   ;;  %v3852_v50 = vld [vmem:[%s4956_s14 + $0x64] sm:$0xf] }
  0x26   : > { %4361 = vmatmul.mubr.bf16.vlgmr.msra.gmra.mrb[0].mxu1 %v4802_v52  ;;  %v1680_v52 = vrot.slane %v1678_v46, 4  ;;  %v1676_v54 = vsel %vm4979_vm2, %v1671_v47, %v1675_v32  ;;  %v1707_v12 = vrot.slane %v1705_v4, 5  ;;  %v1739_v32 = vshrl.u32 %v3849_v26, 16  ;;  %v3851_v46 = vld [vmem:[%s4956_s14 + $0x60] sm:$0xf]  ;;  %v4823_v47 = vld [vmem:[%s5617_s1 + $0x78] sm:$0xff]  }
  0x27   : > { %4489 = vmatmul.mubr.bf16.vlgmr.msra.gmra.mrb[0].mxu0 %v3871_v10  ;;  %4377 = vmatpush3.bf16.msra.mxu1 %v4803_v49  ;;  %v1687_v49 = vshll.u32 %v3843_v44, 16  ;;  %v3873_v59 = vcombine.low %v1666_v51, %v1676_v54  ;;  %v3853_v51 = vld [vmem:[%s4956_s14 + $0x68] sm:$0x1]  ;;  %v1753_v53 = vshll.u32 %v3851_v46, 16  ;;  %v1759_v54 = vshll.u32 %v3852_v50, 16  ;;  %v5110_v26 = vld [vmem:[%s5617_s1 + $0x180] sm:$0xff]  }
  0x28   : > { %4505 = vmatpush3.bf16.msra.mxu0 %v4804_v55  ;;  %4378 = vmatprep.subr.bf16.mxu1 %v4805_v2  ;;  %v1683_v55 = vrot.slane %v1681_v48, 5  ;;  %v1741_v42 = vrot.slane %v1739_v32, 4 }
  0x29   : > { %4506 = vmatprep.subr.bf16.mxu0 %v4806_v6  ;;  %4364 = vmatprep.mubr.bf16.mxu1 %v4807_v11  ;;  %v1689_v56 = vrot.slane %v1687_v49, 5  ;;  %v1704_v11 = vrot.slane %v1702_v3, 4  ;;  %v1755_v61 = vrot.slane %v1753_v53, 5 }
  0x2a   : > { %4492 = vmatprep.mubr.bf16.mxu0 %v3872_v39  ;;  %v1684_v63 = vor.u32 %v1683_v55, %v1680_v52  ;;  %v1750_v52 = vshrl.u32 %v3851_v46, 16  ;;  %v1763_v55 = vshrl.u32 %v3852_v50, 16 }
  0x2b   : > { %4379 = vmatpush3.bf16.msra.mxu1 %v4805_v2  ;;  %v1694_v0 = vor.u32 %v1693_v57, %v1689_v56  ;;  %v3847_v2 = vld [vmem:[%s4956_s14 + $0x50] sm:$0x1]  ;;  %v1708_v21 = vor.u32 %v1707_v12, %v1704_v11  ;;  %v4824_v57 = vld [vmem:[%s5617_s1 + $0x178] sm:$0xff]  }
  0x2c   : > { %4507 = vmatpush3.bf16.msra.mxu0 %v4806_v6  ;;  %4380 = vmatprep.subr.bf16.mxu1 %v4809_v16  ;;  %v1711_v6 = vshll.u32 %v3846_v1, 16  ;;  %v1721_v8 = vshll.u32 %v3847_v2, 16  ;;  %v1685_v9 = vrot.slane %v1684_v63, 4  ;;  %v1765_v63 = vrot.slane %v1763_v55, 4  ;;  %v5086_v1 = vld [vmem:[%s5617_s1 + $0x80] sm:$0xff]  }
  0x2d   : > { %4508 = vmatprep.subr.bf16.mxu0 %v4810_v24  ;;  %v1695_v10 = vrot.slane %v1694_v0, 4  ;;  %v1709_v25 = vrot.slane %v1708_v21, 4 }
  0x2e   : > { %4365 = vmatmul.mubr.bf16.gmra.mrb[4].mxu1 %v4808_v27  ;;  %v1713_v15 = vrot.slane %v1711_v6, 5  ;;  %v1723_v17 = vrot.slane %v1721_v8, 5  ;;  %v1690_v19 = vsel %vm4979_vm2, %v1685_v9, %v1689_v56  ;;  %v3850_v27 = vld [vmem:[%s4956_s14 + $0x5c] sm:$0x1]  ;;  %v1769_v56 = vshll.u32 %v3853_v51, 16 }
  0x2f   : > { %4381 = vmatpush3.bf16.msra.mxu1 %v4809_v16  ;;  %4368 = vmatprep.mubr.bf16.mxu1 %v4813_v34  ;;  %v1717_v16 = vrot.slane %v1715_v7, 4  ;;  %v1700_v20 = vsel %vm4979_vm2, %v1695_v10, %v1699_v60  ;;  %v1745_v36 = vshll.u32 %v3850_v27, 16  ;;  %v1752_v60 = vrot.slane %v1750_v52, 4  ;;  %v472_v7 = vld [vmem:[%s4956_s14] sm:$0xf] }
  0x30   : > { %4509 = vmatpush3.bf16.msra.mxu0 %v4810_v24  ;;  %4382 = vmatprep.subr.bf16.mxu1 %v4811_v38  ;;  %v3874_v22 = vcombine.low %v1690_v19, %v1700_v20  ;;  %v3848_v24 = vld [vmem:[%s4956_s14 + $0x54] sm:$0xf]  ;;  %v1714_v34 = vsel %vm4979_vm2, %v1709_v25, %v1713_v15  ;;  %v1771_v0 = vrot.slane %v1769_v56, 5  ;;  %v473_v8 = vld [vmem:[%s4956_s14 + $0x4] sm:$0xf]  ;;  %v500_v11 = vshrl.u32 %v472_v7, 16 }
  0x31   : > { %4510 = vmatprep.subr.bf16.mxu0 %v4812_v41  ;;  %4493 = vmatmul.mubr.bf16.gmra.mrb[4].mxu0 %v3873_v59  ;;  %v1718_v23 = vor.u32 %v1717_v16, %v1713_v15  ;;  %v1726_v28 = vshrl.u32 %v3848_v24, 16  ;;  %v1729_v30 = vshll.u32 %v3848_v24, 16  ;;  %v1747_v45 = vrot.slane %v1745_v36, 5  ;;  %v474_v9 = vld [vmem:[%s4956_s14 + $0x8] sm:$0x1] }
  0x32   : > { %4496 = vmatprep.mubr.bf16.mxu0 %v3874_v22  ;;  %v1756_v4 = vor.u32 %v1755_v61, %v1752_v60  ;;  %v503_v12 = vshll.u32 %v472_v7, 16  ;;  %v513_v16 = vshrl.u32 %v473_v8, 16  ;;  %v502_v21 = vrot.slane %v500_v11, 4  ;;  %v3888_v25 = vld [vmem:[%s4956_s14 + $0x14] sm:$0x1]  ;;  %v4827_v11 = vld [vmem:[%s5617_s1 + $0x88] sm:$0xff]  }
  0x33   : > { %4383 = vmatpush3.bf16.msra.mxu1 %v4811_v38  ;;  %v1719_v29 = vrot.slane %v1718_v23, 4  ;;  %v1728_v35 = vrot.slane %v1726_v28, 4  ;;  %v4821_v38 = vld [vmem:[%s5617_s1 + $0x70] sm:$0xff]   ;;  %v1731_v40 = vrot.slane %v1729_v30, 5  ;;  %v3890_v52 = vld [vmem:[%s4956_s14 + $0x1c] sm:$0xf] }
  0x34   : > { %4511 = vmatpush3.bf16.msra.mxu0 %v4812_v41  ;;  %4384 = vmatprep.subr.bf16.mxu1 %v4815_v58  ;;  %v1737_v41 = vrot.slane %v1735_v31, 5  ;;  %v1757_v10 = vrot.slane %v1756_v4, 4  ;;  %v505_v22 = vrot.slane %v503_v12, 5  ;;  %v515_v28 = vrot.slane %v513_v16, 4  ;;  %v475_v31 = vld [vmem:[%s4956_s14 + $0xc] sm:$0xf] }
  0x35   : > { %4512 = vmatprep.subr.bf16.mxu0 %v4816_v62  ;;  %v1724_v39 = vsel %vm4979_vm2, %v1719_v29, %v1723_v17  ;;  %v1732_v48 = vor.u32 %v1731_v40, %v1728_v35  ;;  %v519_v17 = vshll.u32 %v474_v9, 16  ;;  %v2068_v35 = vrot.slane %v3888_v25, 5  ;;  %v476_v36 = vld [vmem:[%s4956_s14 + $0x10] sm:$0xf]  ;;  %v478_v4 = vld [vmem:[%s4956_s14 + $0x18] sm:$0xf] }
  0x36   : > { %4369 = vmatmul.mubr.bf16.gmra.mrb[8].mxu1 %v4814_v5  ;;  %v3875_v44 = vcombine.low %v1714_v34, %v1724_v39  ;;  %v1742_v49 = vor.u32 %v1741_v42, %v1737_v41  ;;  %v506_v34 = vor.u32 %v505_v22, %v502_v21  ;;  %v527_v42 = vshll.u32 %v475_v31, 16  ;;  %v480_v9 = vld [vmem:[%s4956_s14 + $0x20] sm:$0x1]  ;;  %v4828_v12 = vld [vmem:[%s5617_s1 + $0x188] sm:$0xff]   ;;  %v3892_v16 = vld [vmem:[%s4956_s14 + $0x24] sm:$0xe] }
  0x37   : > { %4385 = vmatpush3.bf16.msra.mxu1 %v4815_v58  ;;  %4372 = vmatprep.mubr.bf16.mxu1 %v4819_v18  ;;  %v1733_v58 = vrot.slane %v1732_v48, 4  ;;  %v3887_v18 = vld [vmem:[%s4956_s14 + $0x10] sm:$0xf]  ;;  %v521_v29 = vrot.slane %v519_v17, 5  ;;  %v537_v46 = vshrl.u32 %v476_v36, 16 }
  0x38   : > { %4513 = vmatpush3.bf16.msra.mxu0 %v4816_v62  ;;  %4386 = vmatprep.subr.bf16.mxu1 %v4817_v13  ;;  %v1743_v59 = vrot.slane %v1742_v49, 4  ;;  %v1761_v62 = vrot.slane %v1759_v54, 5  ;;  %v2065_v30 = vrot.slane %v3887_v18, 5  ;;  %v529_v50 = vrot.slane %v527_v42, 5  ;;  %v3893_v21 = vld [vmem:[%s4956_s14 + $0x28] sm:$0xf] }
  0x39   : > { %4514 = vmatprep.subr.bf16.mxu0 %v4818_v14  ;;  %4497 = vmatmul.mubr.bf16.gmra.mrb[8].mxu0 %v3875_v44  ;;  %v1738_v2 = vsel %vm4979_vm2, %v1733_v58, %v1737_v41  ;;  %v539_v56 = vrot.slane %v537_v46, 4  ;;  %v3894_v22 = vld [vmem:[%s4956_s14 + $0x2c] sm:$0x1] }
  0x3a   : > { %v1748_v3 = vsel %vm4979_vm2, %v1743_v59, %v1747_v45  ;;  %v1766_v6 = vor.u32 %v1765_v63, %v1761_v62  ;;  %v1762_v20 = vsel %vm4979_vm2, %v1757_v10, %v1761_v62  ;;  %v2067_v41 = vrot.slane %v2065_v30, 4 }
  0x3b   : > { %4387 = vmatpush3.bf16.msra.mxu1 %v4817_v13  ;;  %v3876_v5 = vcombine.low %v1738_v2, %v1748_v3  ;;  %v509_v13 = vshll.u32 %v473_v8, 16  ;;  %v533_v45 = vshll.u32 %v476_v36, 16  ;;  %v479_v8 = vld [vmem:[%s4956_s14 + $0x1c] sm:$0xf]  ;;  %v483_v36 = vld [vmem:[%s4956_s14 + $0x2c] sm:$0x1] }
  0x3c   : > { %4515 = vmatpush3.bf16.msra.mxu0 %v4818_v14  ;;  %4388 = vmatprep.subr.bf16.mxu1 %v4821_v38  ;;  %v3886_v14 = vld [vmem:[%s4956_s14 + $0xc] sm:$0xe]  ;;  %v1767_v15 = vrot.slane %v1766_v6, 4  ;;  %v2069_v49 = vsel %vm5101_vm5, %v2067_v41, %v2068_v35  ;;  %v3912_v35 = vrot.slane %v3892_v16, 9 }
  0x3d   : > { %4516 = vmatprep.subr.bf16.mxu0 %v4822_v43  ;;  %4500 = vmatprep.mubr.bf16.mxu0 %v3876_v5  ;;  %v3910_v19 = vrot.slane %v3886_v14, 9  ;;  %v511_v23 = vrot.slane %v509_v13, 5  ;;  %v535_v55 = vrot.slane %v533_v45, 5  ;;  %v548_v13 = vshrl.u32 %v478_v4, 16  ;;  %v4829_v45 = vld [vmem:[%s5617_s1 + $0x90] sm:$0xff]  }
  0x3e   : > { %4373 = vmatmul.mubr.bf16.gmra.mrb[12].mxu1 %v4820_v37  ;;  %v1772_v27 = vsel %vm4979_vm2, %v1767_v15, %v1771_v0  ;;  %v477_v37 = vld [vmem:[%s4956_s14 + $0x14] sm:$0x1]  ;;  %v2072_v0 = vrot.slane %v3890_v52, 5  ;;  %v551_v14 = vshll.u32 %v478_v4, 16  ;;  %v557_v15 = vshll.u32 %v479_v8, 16 }
  0x3f   : > { %4389 = vmatpush3.bf16.msra.mxu1 %v4821_v38  ;;  %v3877_v32 = vcombine.low %v1762_v20, %v1772_v27  ;;  %v524_v38 = vshrl.u32 %v475_v31, 16  ;;  %v516_v39 = vor.u32 %v515_v28, %v511_v23  ;;  %v2066_v40 = vsel %vm5101_vm5, %v3910_v19, %v2065_v30  ;;  %v482_v30 = vld [vmem:[%s4956_s14 + $0x28] sm:$0xf] }
  0x40   : > { %4517 = vmatpush3.bf16.msra.mxu0 %v4822_v43  ;;  %4390 = vmatprep.subr.bf16.mxu1 %v4823_v47  ;;  %v507_v43 = vrot.slane %v506_v34, 4  ;;  %v543_v51 = vshll.u32 %v477_v37, 16  ;;  %v3934_v54 = vcombine.low %v2066_v40, %v2069_v49  ;;  %v540_v63 = vor.u32 %v539_v56, %v535_v55  ;;  %v3895_v49 = vld [vmem:[%s4956_s14 + $0x30] sm:$0xe] }
  0x41   : > { %4518 = vmatprep.subr.bf16.mxu0 %v4824_v57  ;;  %4501 = vmatmul.mubr.bf16.gmra.mrb[12].mxu0 %v3877_v32  ;;  %v526_v44 = vrot.slane %v524_v38, 4  ;;  %v517_v48 = vrot.slane %v516_v39, 4  ;;  %v2074_v7 = vrot.slane %v2072_v0, 4  ;;  %v561_v19 = vshrl.u32 %v479_v8, 16 }
  0x42   : > { %v512_v53 = vsel %vm4979_vm2, %v507_v43, %v511_v23  ;;  %v545_v60 = vrot.slane %v543_v51, 5  ;;  %4520 = vmatprep.mubr.bf16.mxu0 %v3934_v54  ;;  %v541_v5 = vrot.slane %v540_v63, 4  ;;  %v567_v20 = vshll.u32 %v480_v9, 16  ;;  %v3896_v54 = vld [vmem:[%s4956_s14 + $0x34] sm:$0xf] }
  0x43   : > { %4391 = vmatpush3.bf16.msra.mxu1 %v4823_v47  ;;  %v3889_v47 = vld [vmem:[%s4956_s14 + $0x18] sm:$0xe]  ;;  %v522_v58 = vsel %vm4979_vm2, %v517_v48, %v521_v29  ;;  %v530_v59 = vor.u32 %v529_v50, %v526_v44  ;;  %v550_v27 = vrot.slane %v548_v13, 4  ;;  %v553_v28 = vrot.slane %v551_v14, 5  ;;  %v481_v29 = vld [vmem:[%s4956_s14 + $0x24] sm:$0xf] }
  0x44   : > { %4519 = vmatpush3.bf16.msra.mxu0 %v4824_v57  ;;  %4408 = vmatprep.subr.bf16.mxu1 %v5086_v1  ;;  %v3891_v57 = vld [vmem:[%s4956_s14 + $0x20] sm:$0x1]  ;;  %v3911_v61 = vrot.slane %v3889_v47, 9  ;;  %v3726_v62 = vcombine.low %v512_v53, %v522_v58  ;;  %v546_v17 = vsel %vm4979_vm2, %v541_v5, %v545_v60  ;;  %v559_v31 = vrot.slane %v557_v15, 5  ;;  %v3897_v58 = vld [vmem:[%s4956_s14 + $0x38] sm:$0x1] }
  0x45   : > { %4536 = vmatprep.subr.bf16.mxu0 %v5110_v26  ;;  %v2075_v2 = vrot.slane %v3891_v57, 5  ;;  %v531_v3 = vrot.slane %v530_v59, 4  ;;  %v563_v32 = vrot.slane %v561_v19, 4  ;;  %v569_v34 = vrot.slane %v567_v20, 5  ;;  %v4831_v60 = vld [vmem:[%s5617_s1 + $0x98] sm:$0xff]   ;;  %v4834_v15 = vld [vmem:[%s5617_s1 + $0x1a0] sm:$0xff]  }
  0x46   : > { %4392 = vmatprep.mubr.bf16.mxu1 %v3726_v62  ;;  %v2073_v6 = vsel %vm5101_vm5, %v3911_v61, %v2072_v0  ;;  %v554_v37 = vor.u32 %v553_v28, %v550_v27  ;;  %v2079_v38 = vrot.slane %v3893_v21, 5  ;;  %v2082_v39 = vrot.slane %v3894_v22, 5  ;;  %v486_v13 = vld [vmem:[%s4956_s14 + $0x38] sm:$0x1]  ;;  %v3898_v20 = vld [vmem:[%s4956_s14 + $0x3c] sm:$0xe] }
  0x47   : > { %v536_v10 = vsel %vm4979_vm2, %v531_v3, %v535_v55  ;;  %v2076_v18 = vsel %vm5101_vm5, %v2074_v7, %v2075_v2  ;;  %v572_v40 = vshrl.u32 %v481_v29, 16  ;;  %v564_v41 = vor.u32 %v563_v32, %v559_v31  ;;  %v4832_v2 = vld [vmem:[%s5617_s1 + $0x198] sm:$0xff]   ;;  %v3899_v21 = vld [vmem:[%s4956_s14 + $0x40] sm:$0xf]  ;;  %v3900_v28 = vld [vmem:[%s4956_s14 + $0x44] sm:$0x1] }
  0x48   : > { %v3727_v23 = vcombine.low %v536_v10, %v546_v17  ;;  %v3935_v25 = vcombine.low %v2073_v6, %v2076_v18  ;;  %v575_v42 = vshll.u32 %v481_v29, 16  ;;  %v581_v43 = vshll.u32 %v482_v30, 16  ;;  %v484_v10 = vld [vmem:[%s4956_s14 + $0x30] sm:$0xf]  ;;  %v487_v29 = vld [vmem:[%s4956_s14 + $0x3c] sm:$0xf] }
  0x49   : > { %v585_v44 = vshrl.u32 %v482_v30, 16  ;;  %v555_v46 = vrot.slane %v554_v37, 4  ;;  %v2080_v47 = vsel %vm5101_vm5, %v3912_v35, %v2079_v38  ;;  %v2081_v48 = vrot.slane %v2079_v38, 4  ;;  %v488_v35 = vld [vmem:[%s4956_s14 + $0x40] sm:$0xf] }
  0x4a   : > { %4393 = vmatmul.mubr.bf16.vlgmr.msra.gmra.mrb[0].mxu1 %v3727_v23  ;;  %4521 = vmatmul.mubr.bf16.vlgmr.msra.gmra.mrb[0].mxu0 %v3935_v25  ;;  %v565_v50 = vrot.slane %v564_v41, 4  ;;  %v577_v51 = vrot.slane %v575_v42, 5  ;;  %v583_v52 = vrot.slane %v581_v43, 5  ;;  %v591_v57 = vshll.u32 %v483_v36, 16  ;;  %v4833_v36 = vld [vmem:[%s5617_s1 + $0xa0] sm:$0xff]  }
  0x4b   : > { %4409 = vmatpush3.bf16.msra.mxu1 %v5086_v1  ;;  %4537 = vmatpush3.bf16.msra.mxu0 %v5110_v26  ;;  %v574_v1 = vrot.slane %v572_v40, 4  ;;  %v4830_v26 = vld [vmem:[%s5617_s1 + $0x190] sm:$0xff]   ;;  %v587_v53 = vrot.slane %v585_v44, 4  ;;  %v560_v55 = vsel %vm4979_vm2, %v555_v46, %v559_v31  ;;  %v2083_v56 = vsel %vm5101_vm5, %v2081_v48, %v2082_v39  ;;  %v489_v41 = vld [vmem:[%s4956_s14 + $0x44] sm:$0x1]  ;;  %v4835_v46 = vld [vmem:[%s5617_s1 + $0xa8] sm:$0xff]  }
  0x4c   : > { %4410 = vmatprep.subr.bf16.mxu1 %v4827_v11  ;;  %4538 = vmatprep.subr.bf16.mxu0 %v4828_v12  ;;  %v3913_v59 = vrot.slane %v3895_v49, 9  ;;  %v570_v61 = vsel %vm4979_vm2, %v565_v50, %v569_v34  ;;  %v3936_v62 = vcombine.low %v2080_v47, %v2083_v56  ;;  %v2086_v0 = vrot.slane %v3896_v54, 5  ;;  %v4836_v47 = vld [vmem:[%s5617_s1 + $0x1a8] sm:$0xff]  }
  0x4d   : > { %v578_v63 = vor.u32 %v577_v51, %v574_v1  ;;  %v3728_v3 = vcombine.low %v560_v55, %v570_v61  ;;  %v588_v4 = vor.u32 %v587_v53, %v583_v52  ;;  %v593_v5 = vrot.slane %v591_v57, 5  ;;  %v3901_v50 = vld [vmem:[%s4956_s14 + $0x48] sm:$0xe]  ;;  %v3902_v55 = vld [vmem:[%s4956_s14 + $0x4c] sm:$0xf] }
  0x4e   : > { %v2089_v6 = vrot.slane %v3897_v58, 5  ;;  %4524 = vmatprep.mubr.bf16.mxu0 %v3936_v62  ;;  %v2087_v8 = vsel %vm5101_vm5, %v3913_v59, %v2086_v0  ;;  %v2088_v9 = vrot.slane %v2086_v0, 4  ;;  %v596_v14 = vshrl.u32 %v484_v10, 16 }
  0x4f   : > { %4411 = vmatpush3.bf16.msra.mxu1 %v4827_v11  ;;  %4539 = vmatpush3.bf16.msra.mxu0 %v4828_v12  ;;  %v579_v7 = vrot.slane %v578_v63, 4  ;;  %v589_v11 = vrot.slane %v588_v4, 4  ;;  %v485_v12 = vld [vmem:[%s4956_s14 + $0x34] sm:$0xf]  ;;  %v599_v18 = vshll.u32 %v484_v10, 16  ;;  %v615_v34 = vshll.u32 %v486_v13, 16 }
  0x50   : > { %4412 = vmatprep.subr.bf16.mxu1 %v4829_v45  ;;  %4540 = vmatprep.subr.bf16.mxu0 %v4830_v26  ;;  %v2090_v17 = vsel %vm5101_vm5, %v2088_v9, %v2089_v6  ;;  %v605_v19 = vshll.u32 %v485_v12, 16  ;;  %v598_v25 = vrot.slane %v596_v14, 4  ;;  %v609_v27 = vshrl.u32 %v485_v12, 16  ;;  %v490_v14 = vld [vmem:[%s4956_s14 + $0x48] sm:$0xf] }
  0x51   : > { %4396 = vmatprep.mubr.bf16.mxu1 %v3728_v3  ;;  %v584_v16 = vsel %vm4979_vm2, %v579_v7, %v583_v52  ;;  %v594_v22 = vsel %vm4979_vm2, %v589_v11, %v593_v5  ;;  %v3937_v23 = vcombine.low %v2087_v8, %v2090_v17  ;;  %v601_v31 = vrot.slane %v599_v18, 5  ;;  %v4838_v7 = vld [vmem:[%s5617_s1 + $0x1b0] sm:$0xff]   ;;  %v491_v17 = vld [vmem:[%s4956_s14 + $0x4c] sm:$0xf] }
  0x52   : > { %v3729_v30 = vcombine.low %v584_v16, %v594_v22  ;;  %v607_v32 = vrot.slane %v605_v19, 5  ;;  %v611_v37 = vrot.slane %v609_v27, 4  ;;  %v3914_v38 = vrot.slane %v3898_v20, 9  ;;  %v492_v18 = vld [vmem:[%s4956_s14 + $0x50] sm:$0x1]  ;;  %v4840_v27 = vld [vmem:[%s5617_s1 + $0x1b8] sm:$0xff]  }
  0x53   : > { %4413 = vmatpush3.bf16.msra.mxu1 %v4829_v45  ;;  %4541 = vmatpush3.bf16.msra.mxu0 %v4830_v26  ;;  %v2093_v39 = vrot.slane %v3899_v21, 5  ;;  %v2096_v40 = vrot.slane %v3900_v28, 5  ;;  %v602_v42 = vor.u32 %v601_v31, %v598_v25  ;;  %v617_v43 = vrot.slane %v615_v34, 5  ;;  %v3904_v25 = vld [vmem:[%s4956_s14 + $0x54] sm:$0xe] }
  0x54   : > { %4414 = vmatprep.subr.bf16.mxu1 %v4831_v60  ;;  %4542 = vmatprep.subr.bf16.mxu0 %v4832_v2  ;;  %v620_v44 = vshrl.u32 %v487_v29, 16  ;;  %v623_v45 = vshll.u32 %v487_v29, 16  ;;  %v612_v48 = vor.u32 %v611_v37, %v607_v32  ;;  %v629_v26 = vshll.u32 %v488_v35, 16  ;;  %v3906_v34 = vld [vmem:[%s4956_s14 + $0x5c] sm:$0x1] }
  0x55   : > { %4525 = vmatmul.mubr.bf16.gmra.mrb[4].mxu0 %v3937_v23  ;;  %4397 = vmatmul.mubr.bf16.gmra.mrb[4].mxu1 %v3729_v30  ;;  %v2094_v1 = vsel %vm5101_vm5, %v3914_v38, %v2093_v39  ;;  %v2095_v49 = vrot.slane %v2093_v39, 4  ;;  %v603_v51 = vrot.slane %v602_v42, 4  ;;  %v633_v54 = vshrl.u32 %v488_v35, 16  ;;  %v493_v39 = vld [vmem:[%s4956_s14 + $0x54] sm:$0xf] }
  0x56   : > { %v622_v52 = vrot.slane %v620_v44, 4  ;;  %v625_v53 = vrot.slane %v623_v45, 5  ;;  %v613_v56 = vrot.slane %v612_v48, 4  ;;  %v631_v58 = vrot.slane %v629_v26, 5  ;;  %v494_v45 = vld [vmem:[%s4956_s14 + $0x58] sm:$0xf] }
  0x57   : > { %4543 = vmatpush3.bf16.msra.mxu0 %v4832_v2  ;;  %4415 = vmatpush3.bf16.msra.mxu1 %v4831_v60  ;;  %v2097_v57 = vsel %vm5101_vm5, %v2095_v49, %v2096_v40  ;;  %v639_v59 = vshll.u32 %v489_v41, 16  ;;  %v3903_v60 = vld [vmem:[%s4956_s14 + $0x50] sm:$0x1]  ;;  %v608_v61 = vsel %vm4979_vm2, %v603_v51, %v607_v32  ;;  %v635_v0 = vrot.slane %v633_v54, 4  ;;  %v3905_v32 = vld [vmem:[%s4956_s14 + $0x58] sm:$0xf] }
  0x58   : > { %4544 = vmatprep.subr.bf16.mxu0 %v4834_v15  ;;  %4416 = vmatprep.subr.bf16.mxu1 %v4833_v36  ;;  %v3938_v62 = vcombine.low %v2094_v1, %v2097_v57  ;;  %v626_v63 = vor.u32 %v625_v53, %v622_v52  ;;  %v4837_v2 = vld [vmem:[%s5617_s1 + $0xb0] sm:$0xff]   ;;  %v618_v3 = vsel %vm4979_vm2, %v613_v56, %v617_v43  ;;  %v3915_v5 = vrot.slane %v3901_v50, 9  ;;  %v4839_v40 = vld [vmem:[%s5617_s1 + $0xb8] sm:$0xff]   ;;  %v5251_v53 = vld [vmem:[%s5617_s1 + $0xc0] sm:$0xff]  }
  0x59   : > { %v641_v4 = vrot.slane %v639_v59, 5  ;;  %v2100_v6 = vrot.slane %v3902_v55, 5  ;;  %v3730_v8 = vcombine.low %v608_v61, %v618_v3  ;;  %v636_v10 = vor.u32 %v635_v0, %v631_v58  ;;  %v495_v48 = vld [vmem:[%s4956_s14 + $0x5c] sm:$0x1]  ;;  %v5260_v0 = vld [vmem:[%s5617_s1 + $0x1c0] sm:$0xff]  }
  0x5a   : > { %4528 = vmatprep.mubr.bf16.mxu0 %v3938_v62  ;;  %v627_v9 = vrot.slane %v626_v63, 4  ;;  %v2103_v11 = vrot.slane %v3903_v60, 5  ;;  %v644_v19 = vshrl.u32 %v490_v14, 16  ;;  %v647_v21 = vshll.u32 %v490_v14, 16  ;;  %v3908_v63 = vld [vmem:[%s4956_s14 + $0x64] sm:$0xf] }
  0x5b   : > { %4545 = vmatpush3.bf16.msra.mxu0 %v4834_v15  ;;  %4417 = vmatpush3.bf16.msra.mxu1 %v4833_v36  ;;  %v2101_v12 = vsel %vm5101_vm5, %v3915_v5, %v2100_v6  ;;  %v2102_v13 = vrot.slane %v2100_v6, 4  ;;  %v637_v16 = vrot.slane %v636_v10, 4  ;;  %v653_v22 = vshll.u32 %v491_v17, 16  ;;  %v3909_v6 = vld [vmem:[%s4956_s14 + $0x68] sm:$0x1] }
  0x5c   : > { %4546 = vmatprep.subr.bf16.mxu0 %v4836_v47  ;;  %4418 = vmatprep.subr.bf16.mxu1 %v4835_v46  ;;  %v632_v15 = vsel %vm4979_vm2, %v627_v9, %v631_v58  ;;  %v657_v23 = vshrl.u32 %v491_v17, 16  ;;  %v646_v30 = vrot.slane %v644_v19, 4  ;;  %v663_v31 = vshll.u32 %v492_v18, 16  ;;  %v3907_v58 = vld [vmem:[%s4956_s14 + $0x60] sm:$0xe] }
  0x5d   : > { %4400 = vmatprep.mubr.bf16.mxu1 %v3730_v8  ;;  %v2104_v20 = vsel %vm5101_vm5, %v2102_v13, %v2103_v11  ;;  %v642_v28 = vsel %vm4979_vm2, %v637_v16, %v641_v4  ;;  %v649_v36 = vrot.slane %v647_v21, 5  ;;  %v655_v37 = vrot.slane %v653_v22, 5  ;;  %v934_v19 = vld [vmem:[%s4956_s14 + $0x4] sm:$0xf]  ;;  %v4841_v22 = vld [vmem:[%s4956_s14 + $0x18] sm:$0xff]  }
  0x5e   : > { %v3939_v29 = vcombine.low %v2101_v12, %v2104_v20  ;;  %v3731_v35 = vcombine.low %v632_v15, %v642_v28  ;;  %v659_v38 = vrot.slane %v657_v23, 4  ;;  %v665_v41 = vrot.slane %v663_v31, 5  ;;  %v933_v15 = vld [vmem:[%s4956_s14] sm:$0xe]  ;;  %v935_v20 = vld [vmem:[%s4956_s14 + $0x8] sm:$0x1] }
  0x5f   : > { %4547 = vmatpush3.bf16.msra.mxu0 %v4836_v47  ;;  %4419 = vmatpush3.bf16.msra.mxu1 %v4835_v46  ;;  %v3916_v42 = vrot.slane %v3904_v25, 9  ;;  %v2107_v43 = vrot.slane %v3905_v32, 5  ;;  %v2110_v44 = vrot.slane %v3906_v34, 5  ;;  %v650_v46 = vor.u32 %v649_v36, %v646_v30  ;;  %v936_v30 = vld [vmem:[%s4956_s14 + $0xc] sm:$0xe] }
  0x60   : > { %4548 = vmatprep.subr.bf16.mxu0 %v4838_v7  ;;  %4420 = vmatprep.subr.bf16.mxu1 %v4837_v2  ;;  %v660_v47 = vor.u32 %v659_v38, %v655_v37  ;;  %v668_v1 = vshrl.u32 %v493_v39, 16  ;;  %v671_v49 = vshll.u32 %v493_v39, 16  ;;  %v677_v51 = vshll.u32 %v494_v45, 16  ;;  %v937_v31 = vld [vmem:[%s4956_s14 + $0x10] sm:$0xf] }
  0x61   : > { %4529 = vmatmul.mubr.bf16.gmra.mrb[8].mxu0 %v3939_v29  ;;  %4401 = vmatmul.mubr.bf16.gmra.mrb[8].mxu1 %v3731_v35  ;;  %v2108_v26 = vsel %vm5101_vm5, %v3916_v42, %v2107_v43  ;;  %v2109_v50 = vrot.slane %v2107_v43, 4  ;;  %v681_v52 = vshrl.u32 %v494_v45, 16  ;;  %v651_v54 = vrot.slane %v650_v46, 4  ;;  %v938_v32 = vld [vmem:[%s4956_s14 + $0x14] sm:$0x1] }
  0x62   : > { %v661_v55 = vrot.slane %v660_v47, 4  ;;  %v670_v56 = vrot.slane %v668_v1, 4  ;;  %v673_v57 = vrot.slane %v671_v49, 5  ;;  %v679_v60 = vrot.slane %v677_v51, 5  ;;  %v939_v45 = vld [vmem:[%s4956_s14 + $0x18] sm:$0xe] }
  0x63   : > { %4549 = vmatpush3.bf16.msra.mxu0 %v4838_v7  ;;  %4421 = vmatpush3.bf16.msra.mxu1 %v4837_v2  ;;  %v2111_v59 = vsel %vm5101_vm5, %v2109_v50, %v2110_v44  ;;  %v683_v61 = vrot.slane %v681_v52, 4  ;;  %v687_v62 = vshll.u32 %v495_v48, 16  ;;  %v656_v2 = vsel %vm4979_vm2, %v651_v54, %v655_v37  ;;  %v4843_v44 = vld [vmem:[%s4956_s14 + $0x24] sm:$0xff]   ;;  %v940_v46 = vld [vmem:[%s4956_s14 + $0x1c] sm:$0xf] }
  0x64   : > { %4550 = vmatprep.subr.bf16.mxu0 %v4840_v27  ;;  %4422 = vmatprep.subr.bf16.mxu1 %v4839_v40  ;;  %v666_v3 = vsel %vm4979_vm2, %v661_v55, %v665_v41  ;;  %v3940_v4 = vcombine.low %v2108_v26, %v2111_v59  ;;  %v674_v5 = vor.u32 %v673_v57, %v670_v56  ;;  %v3917_v10 = vrot.slane %v3907_v58, 9  ;;  %v4845_v48 = vld [vmem:[%s5617_s1 + $0xc8] sm:$0xff]   ;;  %v941_v1 = vld [vmem:[%s4956_s14 + $0x20] sm:$0x1]  ;;  %v942_v54 = vld [vmem:[%s4956_s14 + $0x24] sm:$0xe] }
  0x65   : > { %v3732_v7 = vcombine.low %v656_v2, %v666_v3  ;;  %v684_v8 = vor.u32 %v683_v61, %v679_v60  ;;  %v689_v9 = vrot.slane %v687_v62, 5  ;;  %v2114_v12 = vrot.slane %v3908_v63, 5  ;;  %v4846_v51 = vld [vmem:[%s5617_s1 + $0x1c8] sm:$0xff]   ;;  %v4847_v63 = vld [vmem:[%s4956_s14 + $0x30] sm:$0xff]  }
  0x66   : > { %4532 = vmatprep.mubr.bf16.mxu0 %v3940_v4  ;;  %v675_v11 = vrot.slane %v674_v5, 4  ;;  %v2117_v13 = vrot.slane %v3909_v6, 5  ;;  %v3742_v21 = vrot.slane %v933_v15, 9  ;;  %v986_v25 = vrot.slane %v934_v19, 5  ;;  %v943_v57 = vld [vmem:[%s4956_s14 + $0x28] sm:$0xf] }
  0x67   : > { %4551 = vmatpush3.bf16.msra.mxu0 %v4840_v27  ;;  %4423 = vmatpush3.bf16.msra.mxu1 %v4839_v40  ;;  %v685_v14 = vrot.slane %v684_v8, 4  ;;  %v2115_v17 = vsel %vm5101_vm5, %v3917_v10, %v2114_v12  ;;  %v2116_v18 = vrot.slane %v2114_v12, 4  ;;  %v989_v27 = vrot.slane %v935_v20, 5  ;;  %v944_v58 = vld [vmem:[%s4956_s14 + $0x2c] sm:$0x1]  ;;  %v4848_v5 = vld [vmem:[%s5617_s1 + $0xd0] sm:$0xff]  }
  0x68   : > { %4568 = vmatprep.subr.bf16.mxu0 %v5260_v0  ;;  %4440 = vmatprep.subr.bf16.mxu1 %v5251_v53  ;;  %v680_v16 = vsel %vm4979_vm2, %v675_v11, %v679_v60  ;;  %v987_v35 = vsel %vm5101_vm5, %v3742_v21, %v986_v25  ;;  %v988_v36 = vrot.slane %v986_v25, 4  ;;  %v3743_v37 = vrot.slane %v936_v30, 9  ;;  %v946_v10 = vld [vmem:[%s4956_s14 + $0x34] sm:$0xf]  ;;  %v947_v11 = vld [vmem:[%s4956_s14 + $0x38] sm:$0x1] }
  0x69   : > { %4404 = vmatprep.mubr.bf16.mxu1 %v3732_v7  ;;  %v690_v23 = vsel %vm4979_vm2, %v685_v14, %v689_v9  ;;  %v2118_v29 = vsel %vm5101_vm5, %v2116_v18, %v2117_v13  ;;  %v993_v38 = vrot.slane %v937_v31, 5  ;;  %v996_v39 = vrot.slane %v938_v32, 5  ;;  %v4850_v7 = vld [vmem:[%s5617_s1 + $0x1d0] sm:$0xff]   ;;  %v4852_v12 = vld [vmem:[%s5617_s1 + $0x1d8] sm:$0xff]   ;;  %v4853_v20 = vld [vmem:[%s4956_s14 + $0x48] sm:$0xff]  }
  0x6a   : > { %v3733_v28 = vcombine.low %v680_v16, %v690_v23  ;;  %v3941_v34 = vcombine.low %v2115_v17, %v2118_v29  ;;  %v990_v40 = vsel %vm5101_vm5, %v988_v36, %v989_v27  ;;  %v3744_v49 = vrot.slane %v939_v45, 9  ;;  %v945_v9 = vld [vmem:[%s4956_s14 + $0x30] sm:$0xe]  ;;  %v948_v16 = vld [vmem:[%s4956_s14 + $0x3c] sm:$0xe]  ;;  %v4854_v30 = vld [vmem:[%s5617_s1 + $0xe0] sm:$0xff]  }
  0x6b   : > { %v3766_v41 = vcombine.low %v987_v35, %v990_v40  ;;  %v994_v42 = vsel %vm5101_vm5, %v3743_v37, %v993_v38  ;;  %v995_v43 = vrot.slane %v993_v38, 4  ;;  %v1000_v26 = vrot.slane %v940_v46, 5  ;;  %v949_v17 = vld [vmem:[%s4956_s14 + $0x40] sm:$0xf]  ;;  %v950_v21 = vld [vmem:[%s4956_s14 + $0x44] sm:$0x1] }
  0x6c   : > { %4405 = vmatmul.mubr.bf16.gmra.mrb[12].mxu1 %v3733_v28  ;;  %4533 = vmatmul.mubr.bf16.gmra.mrb[12].mxu0 %v3941_v34  ;;  %v1003_v52 = vrot.slane %v941_v1, 5  ;;  %v3745_v59 = vrot.slane %v942_v54, 9  ;;  %v1007_v60 = vrot.slane %v943_v57, 5  ;;  %v1010_v61 = vrot.slane %v944_v58, 5  ;;  %v4855_v34 = vld [vmem:[%s4956_s14 + $0x54] sm:$0xff]   ;;  %v4856_v35 = vld [vmem:[%s5617_s1 + $0x1e0] sm:$0xff]  }
  0x6d   : > { %4552 = vmatprep.mubr.bf16.mxu0 %v4841_v22  ;;  %4424 = vmatprep.mubr.bf16.mxu1 %v3766_v41  ;;  %v997_v47 = vsel %vm5101_vm5, %v995_v43, %v996_v39  ;;  %v1001_v55 = vsel %vm5101_vm5, %v3744_v49, %v1000_v26  ;;  %v1002_v56 = vrot.slane %v1000_v26, 4  ;;  %v3746_v13 = vrot.slane %v945_v9, 9  ;;  %v4857_v37 = vld [vmem:[%s5617_s1 + $0xe8] sm:$0xff]   ;;  %v953_v41 = vld [vmem:[%s4956_s14 + $0x50] sm:$0x1]  ;;  %v4859_v43 = vld [vmem:[%s4956_s14 + $0x60] sm:$0xff]  }
  0x6e   : > { %v3767_v50 = vcombine.low %v994_v42, %v997_v47  ;;  %v1008_v3 = vsel %vm5101_vm5, %v3745_v59, %v1007_v60  ;;  %v1009_v4 = vrot.slane %v1007_v60, 4  ;;  %v1014_v14 = vrot.slane %v946_v10, 5  ;;  %v951_v38 = vld [vmem:[%s4956_s14 + $0x48] sm:$0xe]  ;;  %v952_v40 = vld [vmem:[%s4956_s14 + $0x4c] sm:$0xf] }
  0x6f   : > { %v1004_v62 = vsel %vm5101_vm5, %v1002_v56, %v1003_v52  ;;  %v1017_v15 = vrot.slane %v947_v11, 5  ;;  %v3747_v22 = vrot.slane %v948_v16, 9  ;;  %v1021_v23 = vrot.slane %v949_v17, 5  ;;  %v4858_v39 = vld [vmem:[%s5617_s1 + $0x1e8] sm:$0xff]   ;;  %v954_v46 = vld [vmem:[%s4956_s14 + $0x54] sm:$0xe] }
  0x70   : > { %v3768_v2 = vcombine.low %v1001_v55, %v1004_v62  ;;  %v1011_v6 = vsel %vm5101_vm5, %v1009_v4, %v1010_v61  ;;  %v1015_v18 = vsel %vm5101_vm5, %v3746_v13, %v1014_v14  ;;  %v1016_v19 = vrot.slane %v1014_v14, 4  ;;  %v955_v47 = vld [vmem:[%s4956_s14 + $0x58] sm:$0xf]  ;;  %v4860_v52 = vld [vmem:[%s5617_s1 + $0xf0] sm:$0xff]   ;;  %v3999_v4 = vld [vmem:[%s4956_s14 + $0x1c] sm:$0xf] }
  0x71   : > { %v3769_v8 = vcombine.low %v1008_v3, %v1011_v6  ;;  %v1024_v25 = vrot.slane %v950_v21, 5  ;;  %v1022_v28 = vsel %vm5101_vm5, %v3747_v22, %v1021_v23  ;;  %v1023_v29 = vrot.slane %v1021_v23, 4  ;;  %v4862_v57 = vld [vmem:[%s5617_s1 + $0x1f0] sm:$0xff]   ;;  %v4863_v61 = vld [vmem:[%s5617_s1 + $0xf8] sm:$0xff]   ;;  %v4001_v13 = vld [vmem:[%s4956_s14 + $0x24] sm:$0xf] }
  0x72   : > { %v1018_v27 = vsel %vm5101_vm5, %v1016_v19, %v1017_v15  ;;  %v3748_v42 = vrot.slane %v951_v38, 9  ;;  %v1031_v45 = vrot.slane %v953_v41, 5  ;;  %v3749_v26 = vrot.slane %v954_v46, 9  ;;  %v4861_v59 = vld [vmem:[%s4956_s14 + $0x6c] sm:$0xff]   ;;  %v3998_v3 = vld [vmem:[%s4956_s14 + $0x18] sm:$0xf] }
  0x73   : > { %v3770_v31 = vcombine.low %v1015_v18, %v1018_v27  ;;  %v1025_v32 = vsel %vm5101_vm5, %v1023_v29, %v1024_v25  ;;  %v2661_v6 = vshrl.u32 %v3998_v3, 16  ;;  %v4866_v15 = vld [vmem:[%s4956_s14 + $0x18] sm:$0xff]   ;;  %v4002_v16 = vld [vmem:[%s4956_s14 + $0x28] sm:$0xf]  ;;  %v4003_v17 = vld [vmem:[%s4956_s14 + $0x2c] sm:$0x1] }
  0x74   : > { %4425 = vmatmul.mubr.bf16.vlgmr.msra.gmra.mrb[0].mxu1 %v3767_v50  ;;  %4553 = vmatmul.mubr.bf16.vlgmr.msra.gmra.mrb[0].mxu0 %v4843_v44  ;;  %v3771_v36 = vcombine.low %v1022_v28, %v1025_v32  ;;  %v1028_v44 = vrot.slane %v952_v40, 5  ;;  %v1035_v50 = vrot.slane %v955_v47, 5  ;;  %v2685_v18 = vshrl.u32 %v4001_v13, 16  ;;  %v4867_v28 = vld [vmem:[%s5617_s1 + $0x200] sm:$0xff]   ;;  %v4004_v41 = vld [vmem:[%s4956_s14 + $0x30] sm:$0xf] }
  0x75   : > { %4441 = vmatpush3.bf16.msra.mxu1 %v5251_v53  ;;  %4569 = vmatpush3.bf16.msra.mxu0 %v5260_v0  ;;  %v4849_v53 = vld [vmem:[%s4956_s14 + $0x3c] sm:$0xff]   ;;  %v2663_v9 = vrot.slane %v2661_v6, 4  ;;  %v2688_v21 = vshll.u32 %v4001_v13, 16  ;;  %v2694_v22 = vshll.u32 %v4002_v16, 16  ;;  %v2698_v25 = vshrl.u32 %v4002_v16, 16 }
  0x76   : > { %4442 = vmatprep.subr.bf16.mxu1 %v4845_v48  ;;  %4570 = vmatprep.subr.bf16.mxu0 %v4846_v51  ;;  %v4851_v0 = vld [vmem:[%s5617_s1 + $0xd8] sm:$0xff]   ;;  %v1029_v1 = vsel %vm5101_vm5, %v3748_v42, %v1028_v44  ;;  %v1030_v49 = vrot.slane %v1028_v44, 4  ;;  %v1036_v55 = vsel %vm5101_vm5, %v3749_v26, %v1035_v50  ;;  %v1037_v56 = vrot.slane %v1035_v50, 4  ;;  %v4005_v42 = vld [vmem:[%s4956_s14 + $0x34] sm:$0xf] }
  0x77   : > { %4428 = vmatprep.mubr.bf16.mxu1 %v3768_v2  ;;  %4556 = vmatprep.mubr.bf16.mxu0 %v4847_v63  ;;  %v4864_v63 = vld [vmem:[%s5617_s1 + $0x1f8] sm:$0xff]   ;;  %v4865_v2 = vld [vmem:[%s4956_s14 + $0xc] sm:$0xff]   ;;  %v2687_v23 = vrot.slane %v2685_v18, 4  ;;  %v2704_v27 = vshll.u32 %v4003_v17, 16  ;;  %v2696_v32 = vrot.slane %v2694_v22, 5  ;;  %v2709_v46 = vshrl.u32 %v4004_v41, 16 }
  0x78   : > { %v1032_v54 = vsel %vm5101_vm5, %v1030_v49, %v1031_v45  ;;  %v4006_v45 = vld [vmem:[%s4956_s14 + $0x38] sm:$0x1]  ;;  %v2712_v47 = vshll.u32 %v4004_v41, 16  ;;  %v2722_v49 = vshrl.u32 %v4005_v42, 16  ;;  %v4873_v18 = vld [vmem:[%s4956_s14 + $0x3c] sm:$0xff]  }
  0x79   : > { %4443 = vmatpush3.bf16.msra.mxu1 %v4845_v48  ;;  %4571 = vmatpush3.bf16.msra.mxu0 %v4846_v51  ;;  %v956_v48 = vld [vmem:[%s4956_s14 + $0x5c] sm:$0x1]  ;;  %v3772_v58 = vcombine.low %v1029_v1, %v1032_v54  ;;  %v2718_v1 = vshll.u32 %v4005_v42, 16  ;;  %v2728_v26 = vshll.u32 %v4006_v45, 16  ;;  %v4870_v54 = vld [vmem:[%s4956_s14 + $0x30] sm:$0xff]  }
  0x7a   : > { %4444 = vmatprep.subr.bf16.mxu1 %v4848_v5  ;;  %4572 = vmatprep.subr.bf16.mxu0 %v4850_v7  ;;  %v1038_v51 = vrot.slane %v956_v48, 5  ;;  %v4011_v22 = vld [vmem:[%s4956_s14 + $0x4c] sm:$0xf]  ;;  %v4013_v42 = vld [vmem:[%s4956_s14 + $0x54] sm:$0xf] }
  0x7c   : > { %4429 = vmatmul.mubr.bf16.gmra.mrb[4].mxu1 %v3769_v8  ;;  %4557 = vmatmul.mubr.bf16.gmra.mrb[4].mxu0 %v4849_v53  ;;  %v1039_v60 = vsel %vm5101_vm5, %v1037_v56, %v1038_v51  ;;  %v2664_v53 = vshll.u32 %v3998_v3, 16  ;;  %v2674_v8 = vshrl.u32 %v3999_v4, 16  ;;  %v2711_v51 = vrot.slane %v2709_v46, 4 }
  0x7d   : > { %4445 = vmatpush3.bf16.msra.mxu1 %v4848_v5  ;;  %4573 = vmatpush3.bf16.msra.mxu0 %v4850_v7  ;;  %v3773_v62 = vcombine.low %v1036_v55, %v1039_v60  ;;  %v4000_v5 = vld [vmem:[%s4956_s14 + $0x20] sm:$0x1]  ;;  %v2670_v7 = vshll.u32 %v3999_v4, 16  ;;  %v4007_v55 = vld [vmem:[%s4956_s14 + $0x3c] sm:$0xf] }
  0x7e   : > { %4446 = vmatprep.subr.bf16.mxu1 %v4851_v0  ;;  %4574 = vmatprep.subr.bf16.mxu0 %v4852_v12  ;;  %v2666_v10 = vrot.slane %v2664_v53, 5  ;;  %v4008_v60 = vld [vmem:[%s4956_s14 + $0x40] sm:$0xf]  ;;  %v2733_v3 = vshrl.u32 %v4007_v55, 16  ;;  %v2736_v4 = vshll.u32 %v4007_v55, 16 }
  0x7f   : > { %4560 = vmatprep.mubr.bf16.mxu0 %v4853_v20  ;;  %4432 = vmatprep.mubr.bf16.mxu1 %v3770_v31  ;;  %v2672_v11 = vrot.slane %v2670_v7, 5  ;;  %v2690_v31 = vrot.slane %v2688_v21, 5  ;;  %v2742_v53 = vshll.u32 %v4008_v60, 16  ;;  %v2746_v7 = vshrl.u32 %v4008_v60, 16  ;;  %v4877_v60 = vld [vmem:[%s4956_s14 + $0x54] sm:$0xff]  }
  0x80   : > { %v2667_v19 = vor.u32 %v2666_v10, %v2663_v9  ;;  %v2738_v9 = vrot.slane %v2736_v4, 5 }
  0x81   : > { %4447 = vmatpush3.bf16.msra.mxu1 %v4851_v0  ;;  %4575 = vmatpush3.bf16.msra.mxu0 %v4852_v12  ;;  %v2680_v0 = vshll.u32 %v4000_v5, 16  ;;  %v2676_v12 = vrot.slane %v2674_v8, 4  ;;  %v2691_v40 = vor.u32 %v2690_v31, %v2687_v23  ;;  %v2748_v13 = vrot.slane %v2746_v7, 4  ;;  %v4012_v23 = vld [vmem:[%s4956_s14 + $0x50] sm:$0x1] }
  0x82   : > { %4448 = vmatprep.subr.bf16.mxu1 %v4854_v30  ;;  %4576 = vmatprep.subr.bf16.mxu0 %v4856_v35  ;;  %v2668_v29 = vrot.slane %v2667_v19, 4  ;;  %v4010_v19 = vld [vmem:[%s4956_s14 + $0x48] sm:$0xf]  ;;  %v2770_v31 = vshrl.u32 %v4011_v22, 16 }
  0x83   : > { %v2682_v14 = vrot.slane %v2680_v0, 5  ;;  %v2677_v20 = vor.u32 %v2676_v12, %v2672_v11  ;;  %v2692_v48 = vrot.slane %v2691_v40, 4  ;;  %v2735_v0 = vrot.slane %v2733_v3, 4 }
  0x84   : > { %4433 = vmatmul.mubr.bf16.gmra.mrb[8].mxu1 %v3771_v36  ;;  %4561 = vmatmul.mubr.bf16.gmra.mrb[8].mxu0 %v4855_v34  ;;  %v2700_v34 = vrot.slane %v2698_v25, 4  ;;  %v5399_v36 = vld [vmem:[%s5617_s1 + $0x208] sm:$0xff]   ;;  %v2673_v38 = vsel %vm4979_vm2, %v2668_v29, %v2672_v11  ;;  %v2744_v12 = vrot.slane %v2742_v53, 5  ;;  %v2757_v25 = vshrl.u32 %v4010_v19, 16 }
  0x85   : > { %4449 = vmatpush3.bf16.msra.mxu1 %v4854_v30  ;;  %4577 = vmatpush3.bf16.msra.mxu0 %v4856_v35  ;;  %v2678_v30 = vrot.slane %v2677_v20, 4  ;;  %v2706_v35 = vrot.slane %v2704_v27, 5  ;;  %v2697_v56 = vsel %vm4979_vm2, %v2692_v48, %v2696_v32  ;;  %v2739_v16 = vor.u32 %v2738_v9, %v2735_v0  ;;  %v4018_v53 = vld [vmem:[%s4956_s14 + $0x68] sm:$0x1] }
  0x86   : > { %4450 = vmatprep.subr.bf16.mxu1 %v4857_v37  ;;  %4578 = vmatprep.subr.bf16.mxu0 %v4858_v39  ;;  %v2701_v44 = vor.u32 %v2700_v34, %v2696_v32  ;;  %v2749_v21 = vor.u32 %v2748_v13, %v2744_v12  ;;  %v2760_v27 = vshll.u32 %v4010_v19, 16  ;;  %v4874_v32 = vld [vmem:[%s4956_s14 + $0x48] sm:$0xff]   ;;  %v2772_v41 = vrot.slane %v2770_v31, 4  ;;  %v4878_v13 = vld [vmem:[%s4956_s14 + $0x60] sm:$0xff]  }
  0x87   : > { %4564 = vmatprep.mubr.bf16.mxu0 %v4859_v43  ;;  %4436 = vmatprep.mubr.bf16.mxu1 %v3772_v58  ;;  %v2724_v58 = vrot.slane %v2722_v49, 4  ;;  %v2740_v29 = vrot.slane %v2739_v16, 4  ;;  %v2781_v48 = vshrl.u32 %v4013_v42, 16  ;;  %v2784_v49 = vshll.u32 %v4013_v42, 16  ;;  %v4019_v19 = vld [vmem:[%s4956_s14 + $0x6c] sm:$0xf] }
  0x88   : > { %v2702_v50 = vrot.slane %v2701_v44, 4  ;;  %v2750_v34 = vrot.slane %v2749_v21, 4  ;;  %v2832_v31 = vshll.u32 %v4019_v19, 16 }
  0x89   : > { %4451 = vmatpush3.bf16.msra.mxu1 %v4857_v37  ;;  %4579 = vmatpush3.bf16.msra.mxu0 %v4858_v39  ;;  %v4869_v37 = vld [vmem:[%s4956_s14 + $0x24] sm:$0xff]   ;;  %v2683_v39 = vsel %vm4979_vm2, %v2678_v30, %v2682_v14  ;;  %v5428_v14 = vld [vmem:[%s5617_s1 + $0x218] sm:$0xff]   ;;  %v2766_v30 = vshll.u32 %v4011_v22, 16 }
  0x8a   : > { %4452 = vmatprep.subr.bf16.mxu1 %v4860_v52  ;;  %4580 = vmatprep.subr.bf16.mxu0 %v4862_v57  ;;  %v4038_v43 = vcombine.low %v2673_v38, %v2683_v39  ;;  %v2776_v38 = vshll.u32 %v4012_v23, 16  ;;  %v2745_v39 = vsel %vm4979_vm2, %v2740_v29, %v2744_v12  ;;  %v2824_v12 = vshll.u32 %v4018_v53, 16  ;;  %v4021_v29 = vld [vmem:[%s4956_s14 + $0x74] sm:$0x1] }
  0x8b   : > { %v2768_v40 = vrot.slane %v2766_v30, 5  ;;  %v2829_v30 = vshrl.u32 %v4019_v19, 16  ;;  %v4071_v19 = vld [vmem:[%s4956_s14 + $0x5c] sm:$0x1] }
  0x8c   : > { %4437 = vmatmul.mubr.bf16.gmra.mrb[12].mxu1 %v3773_v62  ;;  %4565 = vmatmul.mubr.bf16.gmra.mrb[12].mxu0 %v4861_v59  ;;  %v2730_v59 = vrot.slane %v2728_v26, 5  ;;  %v2707_v62 = vsel %vm4979_vm2, %v2702_v50, %v2706_v35  ;;  %v2759_v35 = vrot.slane %v2757_v25, 4  ;;  %v2778_v46 = vrot.slane %v2776_v38, 5  ;;  %v4875_v50 = vld [vmem:[%s5617_s1 + $0x220] sm:$0xff]   ;;  %v4020_v25 = vld [vmem:[%s4956_s14 + $0x70] sm:$0xf] }
  0x8d   : > { %4453 = vmatpush3.bf16.msra.mxu1 %v4860_v52  ;;  %4581 = vmatpush3.bf16.msra.mxu0 %v4862_v57  ;;  %v2714_v52 = vrot.slane %v2712_v47, 5  ;;  %v2720_v57 = vrot.slane %v2718_v1, 5  ;;  %v4039_v5 = vcombine.low %v2697_v56, %v2707_v62  ;;  %v4015_v47 = vld [vmem:[%s4956_s14 + $0x5c] sm:$0x1]  ;;  %v2773_v1 = vor.u32 %v2772_v41, %v2768_v40 }
  0x8e   : > { %4454 = vmatprep.subr.bf16.mxu1 %v4863_v61  ;;  %4582 = vmatprep.subr.bf16.mxu0 %v4864_v63  ;;  %v2800_v56 = vshll.u32 %v4015_v47, 16  ;;  %v2826_v23 = vrot.slane %v2824_v12, 5  ;;  %v2848_v41 = vshll.u32 %v4021_v29, 16  ;;  %v4069_v12 = vld [vmem:[%s4956_s14 + $0x54] sm:$0xe] }
  0x8f   : > { %4456 = vmatprep.mubr.bf16.mxu1 %v4865_v2  ;;  %4584 = vmatprep.mubr.bf16.mxu0 %v4038_v43  ;;  %v4009_v2 = vld [vmem:[%s4956_s14 + $0x44] sm:$0x1]  ;;  %v2725_v6 = vor.u32 %v2724_v58, %v2720_v57  ;;  %v4014_v43 = vld [vmem:[%s4956_s14 + $0x58] sm:$0xf]  ;;  %v2786_v58 = vrot.slane %v2784_v49, 5  ;;  %v4083_v33 = vrot.slane %v4069_v12, 9 }
  0x90   : > { %v2752_v10 = vshll.u32 %v4009_v2, 16  ;;  %v2790_v26 = vshll.u32 %v4014_v43, 16  ;;  %v2794_v55 = vshrl.u32 %v4014_v43, 16  ;;  %v2802_v2 = vrot.slane %v2800_v56, 5  ;;  %v4067_v56 = vld [vmem:[%s4956_s14 + $0x4c] sm:$0xf] }
  0x91   : > { %4455 = vmatpush3.bf16.msra.mxu1 %v4863_v61  ;;  %4583 = vmatpush3.bf16.msra.mxu0 %v4864_v63  ;;  %v5418_v61 = vld [vmem:[%s5617_s1 + $0x210] sm:$0xff]   ;;  %v2715_v63 = vor.u32 %v2714_v52, %v2711_v51  ;;  %v2726_v11 = vrot.slane %v2725_v6, 4  ;;  %v5458_v51 = vld [vmem:[%s5617_s1 + $0x228] sm:$0xff]   ;;  %v4017_v6 = vld [vmem:[%s4956_s14 + $0x64] sm:$0xf] }
  0x92   : > { %4632 = vmatprep.subr.bf16.mxu1 %v4867_v28  ;;  %4600 = vmatprep.subr.bf16.mxu0 %v4867_v28  ;;  %v2754_v17 = vrot.slane %v2752_v10, 5  ;;  %v2814_v10 = vshll.u32 %v4017_v6, 16 }
  0x93   : > { %v2716_v8 = vrot.slane %v2715_v63, 4  ;;  %v2731_v20 = vsel %vm4979_vm2, %v2726_v11, %v2730_v59  ;;  %v2792_v59 = vrot.slane %v2790_v26, 5  ;;  %v2796_v63 = vrot.slane %v2794_v55, 4  ;;  %v4066_v55 = vld [vmem:[%s4956_s14 + $0x48] sm:$0xe] }
  0x94   : > { %4457 = vmatmul.mubr.bf16.vlgmr.msra.gmra.mrb[0].mxu1 %v4866_v15  ;;  %4585 = vmatmul.mubr.bf16.vlgmr.msra.gmra.mrb[0].mxu0 %v4039_v5  ;;  %v2755_v44 = vsel %vm4979_vm2, %v2750_v34, %v2754_v17  ;;  %v4016_v5 = vld [vmem:[%s4956_s14 + $0x60] sm:$0xf]  ;;  %v2818_v11 = vshrl.u32 %v4017_v6, 16  ;;  %v2816_v21 = vrot.slane %v2814_v10, 5 }
  0x95   : > { %4640 = vmatpush3.bf16.msra.mxu1 %v4867_v28  ;;  %4460 = vmatprep.mubr.bf16.mxu1 %v4869_v37  ;;  %v2721_v15 = vsel %vm4979_vm2, %v2716_v8, %v2720_v57  ;;  %v2762_v37 = vrot.slane %v2760_v27, 5  ;;  %v2774_v57 = vrot.slane %v2773_v1, 4  ;;  %v2797_v8 = vor.u32 %v2796_v63, %v2792_v59  ;;  %v4056_v1 = vld [vmem:[%s4956_s14 + $0x20] sm:$0x1] }
  0x96   : > { %4633 = vmatprep.subr.bf16.mxu1 %v5399_v36  ;;  %4601 = vmatpush3.bf16.msra.mxu0 %v4867_v28  ;;  %v4040_v28 = vcombine.low %v2721_v15, %v2731_v20  ;;  %v2808_v0 = vshll.u32 %v4016_v5, 16  ;;  %v5475_v15 = vld [vmem:[%s5617_s1 + $0x230] sm:$0xff]   ;;  %v2820_v22 = vrot.slane %v2818_v11, 4 }
  0x97   : > { %4602 = vmatprep.subr.bf16.mxu0 %v5399_v36  ;;  %v2763_v45 = vor.u32 %v2762_v37, %v2759_v35  ;;  %v2779_v3 = vsel %vm4979_vm2, %v2774_v57, %v2778_v46  ;;  %v2798_v16 = vrot.slane %v2797_v8, 4  ;;  %v2838_v35 = vshll.u32 %v4020_v25, 16  ;;  %v4059_v8 = vld [vmem:[%s4956_s14 + $0x2c] sm:$0x1] }
  0x98   : > { %4588 = vmatprep.mubr.bf16.mxu0 %v4040_v28  ;;  %v2821_v34 = vor.u32 %v2820_v22, %v2816_v21  ;;  %v2842_v37 = vshrl.u32 %v4020_v25, 16  ;;  %v3154_v11 = vrot.slane %v4059_v8, 5 }
  0x99   : > { %4641 = vmatpush3.bf16.msra.mxu1 %v5399_v36  ;;  %v2764_v52 = vrot.slane %v2763_v45, 4  ;;  %v2803_v27 = vsel %vm4979_vm2, %v2798_v16, %v2802_v2  ;;  %v2840_v43 = vrot.slane %v2838_v35, 5  ;;  %v4054_v45 = vld [vmem:[%s4956_s14 + $0x18] sm:$0xe] }
  0x9a   : > { %4634 = vmatprep.subr.bf16.mxu1 %v5418_v61  ;;  %4603 = vmatpush3.bf16.msra.mxu0 %v5399_v36  ;;  %v4041_v36 = vcombine.low %v2745_v39, %v2755_v44  ;;  %v2831_v39 = vrot.slane %v2829_v30, 4  ;;  %v2822_v42 = vrot.slane %v2821_v34, 4  ;;  %v2844_v44 = vrot.slane %v2842_v37, 4 }
  0x9b   : > { %4604 = vmatprep.subr.bf16.mxu0 %v5418_v61  ;;  %v2769_v62 = vsel %vm4979_vm2, %v2764_v52, %v2768_v40  ;;  %v2834_v40 = vrot.slane %v2832_v31, 5  ;;  %v4078_v49 = vrot.slane %v4054_v45, 9  ;;  %v4064_v45 = vld [vmem:[%s4956_s14 + $0x40] sm:$0xf] }
  0x9c   : > { %4461 = vmatmul.mubr.bf16.gmra.mrb[4].mxu1 %v4870_v54  ;;  %v2783_v54 = vrot.slane %v2781_v48, 4  ;;  %4589 = vmatmul.mubr.bf16.gmra.mrb[4].mxu0 %v4041_v36  ;;  %v4042_v7 = vcombine.low %v2769_v62, %v2779_v3  ;;  %v2850_v48 = vrot.slane %v2848_v41, 5  ;;  %v4055_v36 = vld [vmem:[%s4956_s14 + $0x1c] sm:$0xf]  ;;  %v2827_v26 = vsel %vm4979_vm2, %v2822_v42, %v2826_v23 }
  0x9d   : > { %4642 = vmatpush3.bf16.msra.mxu1 %v5418_v61  ;;  %4464 = vmatprep.mubr.bf16.mxu1 %v4873_v18  ;;  %v2810_v18 = vrot.slane %v2808_v0, 5  ;;  %v2835_v47 = vor.u32 %v2834_v40, %v2831_v39  ;;  %v3144_v52 = vrot.slane %v4055_v36, 5  ;;  %v3172_v62 = vrot.slane %v4067_v56, 5  ;;  %v4074_v39 = vld [vmem:[%s4956_s14 + $0x68] sm:$0x1] }
  0x9e   : > { %4635 = vmatprep.subr.bf16.mxu1 %v5428_v14  ;;  %4605 = vmatpush3.bf16.msra.mxu0 %v5418_v61  ;;  %v2787_v4 = vor.u32 %v2786_v58, %v2783_v54  ;;  %v2805_v61 = vshrl.u32 %v4016_v5, 16  ;;  %v3147_v54 = vrot.slane %v4056_v1, 5  ;;  %v4057_v5 = vld [vmem:[%s4956_s14 + $0x24] sm:$0xe]  ;;  %v4065_v36 = vld [vmem:[%s4956_s14 + $0x44] sm:$0x1] }
  0x9f   : > { %4606 = vmatprep.subr.bf16.mxu0 %v5428_v14  ;;  %4592 = vmatprep.mubr.bf16.mxu0 %v4042_v7  ;;  %v2836_v58 = vrot.slane %v2835_v47, 4  ;;  %v3145_v2 = vsel %vm5101_vm5, %v4078_v49, %v3144_v52  ;;  %v3146_v3 = vrot.slane %v3144_v52, 4  ;;  %v3174_v53 = vrot.slane %v3172_v62, 4  ;;  %v4058_v7 = vld [vmem:[%s4956_s14 + $0x28] sm:$0xf] }
  0xa0   : > { %v2788_v9 = vrot.slane %v2787_v4, 4  ;;  %v2807_v17 = vrot.slane %v2805_v61, 4  ;;  %v4079_v61 = vrot.slane %v4057_v5, 9  ;;  %v3151_v10 = vrot.slane %v4058_v7, 5  ;;  %v4075_v52 = vld [vmem:[%s4956_s14 + $0x6c] sm:$0xe] }
  0xa1   : > { %4643 = vmatpush3.bf16.msra.mxu1 %v5428_v14  ;;  %v3165_v1 = vrot.slane %v4064_v45, 5 }
  0xa2   : > { %4636 = vmatprep.subr.bf16.mxu1 %v4875_v50  ;;  %4607 = vmatpush3.bf16.msra.mxu0 %v5428_v14  ;;  %v2793_v20 = vsel %vm4979_vm2, %v2788_v9, %v2792_v59  ;;  %v5486_v14 = vld [vmem:[%s5617_s1 + $0x238] sm:$0xff]   ;;  %v2811_v28 = vor.u32 %v2810_v18, %v2807_v17  ;;  %v4068_v59 = vld [vmem:[%s4956_s14 + $0x50] sm:$0x1]  ;;  %v3148_v9 = vsel %vm5101_vm5, %v3146_v3, %v3147_v54  ;;  %v3153_v23 = vrot.slane %v3151_v10, 4 }
  0xa3   : > { %4608 = vmatprep.subr.bf16.mxu0 %v4875_v50  ;;  %v3175_v4 = vrot.slane %v4068_v59, 5  ;;  %v4102_v17 = vcombine.low %v3145_v2, %v3148_v9  ;;  %v3152_v22 = vsel %vm5101_vm5, %v4079_v61, %v3151_v10  ;;  %v4076_v54 = vld [vmem:[%s4956_s14 + $0x70] sm:$0xf]  ;;  %v4077_v59 = vld [vmem:[%s4956_s14 + $0x74] sm:$0x1] }
  0xa4   : > { %4465 = vmatmul.mubr.bf16.gmra.mrb[8].mxu1 %v4874_v32  ;;  %v4043_v32 = vcombine.low %v2793_v20, %v2803_v27  ;;  %v2812_v38 = vrot.slane %v2811_v28, 4  ;;  %v4060_v20 = vld [vmem:[%s4956_s14 + $0x30] sm:$0xe]  ;;  %v4061_v27 = vld [vmem:[%s4956_s14 + $0x34] sm:$0xf]  ;;  %v3182_v28 = vrot.slane %v4071_v19, 5  ;;  %v3155_v34 = vsel %vm5101_vm5, %v3153_v23, %v3154_v11 }
  0xa5   : > { %4644 = vmatpush3.bf16.msra.mxu1 %v4875_v50  ;;  %4468 = vmatprep.mubr.bf16.mxu1 %v4877_v60  ;;  %v4082_v60 = vrot.slane %v4066_v55, 9  ;;  %v3176_v18 = vsel %vm5101_vm5, %v3174_v53, %v3175_v4  ;;  %v4080_v29 = vrot.slane %v4060_v20, 9  ;;  %v3158_v30 = vrot.slane %v4061_v27, 5 }
  0xa6   : > { %4637 = vmatprep.subr.bf16.mxu1 %v5458_v51  ;;  %4609 = vmatpush3.bf16.msra.mxu0 %v4875_v50  ;;  %v2817_v46 = vsel %vm4979_vm2, %v2812_v38, %v2816_v21  ;;  %v2845_v50 = vor.u32 %v2844_v44, %v2840_v43  ;;  %v4073_v38 = vld [vmem:[%s4956_s14 + $0x64] sm:$0xf]  ;;  %v4063_v44 = vld [vmem:[%s4956_s14 + $0x3c] sm:$0xe]  ;;  %v3196_v2 = vrot.slane %v4077_v59, 5 }
  0xa7   : > { %4593 = vmatmul.mubr.bf16.gmra.mrb[8].mxu0 %v4043_v32  ;;  %4610 = vmatprep.subr.bf16.mxu0 %v5458_v51  ;;  %v4044_v57 = vcombine.low %v2817_v46, %v2827_v26  ;;  %v3173_v6 = vsel %vm5101_vm5, %v4082_v60, %v3172_v62  ;;  %v4072_v32 = vld [vmem:[%s4956_s14 + $0x60] sm:$0xe]  ;;  %v3159_v41 = vsel %vm5101_vm5, %v4080_v29, %v3158_v30  ;;  %v3160_v42 = vrot.slane %v3158_v30, 4 }
  0xa8   : > { %v2846_v63 = vrot.slane %v2845_v50, 4  ;;  %v4106_v21 = vcombine.low %v3173_v6, %v3176_v18  ;;  %v4084_v40 = vrot.slane %v4072_v32, 9  ;;  %v4103_v46 = vcombine.low %v3152_v22, %v3155_v34 }
  0xa9   : > { %4645 = vmatpush3.bf16.msra.mxu1 %v5458_v51  ;;  %4596 = vmatprep.mubr.bf16.mxu0 %v4044_v57  ;;  %v4081_v56 = vrot.slane %v4063_v44, 9  ;;  %v3167_v57 = vrot.slane %v3165_v1, 4  ;;  %v4085_v62 = vrot.slane %v4075_v52, 9 }
  0xaa   : > { %4638 = vmatprep.subr.bf16.mxu1 %v5475_v15  ;;  %4611 = vmatpush3.bf16.msra.mxu0 %v5458_v51  ;;  %v2841_v51 = vsel %vm4979_vm2, %v2836_v58, %v2840_v43  ;;  %v2851_v0 = vsel %vm4979_vm2, %v2846_v63, %v2850_v48  ;;  %v3186_v43 = vrot.slane %v4073_v38, 5  ;;  %v3189_v48 = vrot.slane %v4074_v39, 5 }
  0xab   : > { %4612 = vmatprep.subr.bf16.mxu0 %v5475_v15  ;;  %v4045_v16 = vcombine.low %v2841_v51, %v2851_v0  ;;  %v3168_v58 = vrot.slane %v4065_v36, 5  ;;  %v3193_v63 = vrot.slane %v4076_v54, 5  ;;  %v3166_v51 = vsel %vm5101_vm5, %v4081_v56, %v3165_v1 }
  0xac   : > { %4469 = vmatmul.mubr.bf16.gmra.mrb[12].mxu1 %v4878_v13  ;;  %v4070_v13 = vld [vmem:[%s4956_s14 + $0x58] sm:$0xf]  ;;  %v3187_v26 = vsel %vm5101_vm5, %v4084_v40, %v3186_v43  ;;  %v3188_v50 = vrot.slane %v3186_v43, 4 }
  0xad   : > { %4646 = vmatpush3.bf16.msra.mxu1 %v5475_v15  ;;  %v3179_v25 = vrot.slane %v4070_v13, 5  ;;  %4624 = vmatprep.mubr.bf16.mxu1 %v4106_v21  ;;  %v3194_v4 = vsel %vm5101_vm5, %v4085_v62, %v3193_v63  ;;  %v3195_v5 = vrot.slane %v3193_v63, 4  ;;  %v3169_v6 = vsel %vm5101_vm5, %v3167_v57, %v3168_v58 }
  0xae   : > { %4639 = vmatprep.subr.bf16.mxu1 %v5486_v14  ;;  %4613 = vmatpush3.bf16.msra.mxu0 %v5475_v15  ;;  %v4062_v15 = vld [vmem:[%s4956_s14 + $0x38] sm:$0x1]  ;;  %v3190_v60 = vsel %vm5101_vm5, %v3188_v50, %v3189_v48  ;;  %v4105_v8 = vcombine.low %v3166_v51, %v3169_v6  ;;  %s4136_s14 = sshll.u32 %s5625_s13, 6 }
  0xaf   : > { %4614 = vmatprep.subr.bf16.mxu0 %v5486_v14  ;;  %4597 = vmatmul.mubr.bf16.gmra.mrb[12].mxu0 %v4045_v16  ;;  %v3161_v31 = vrot.slane %v4062_v15, 5  ;;  %v3180_v35 = vsel %vm5101_vm5, %v4083_v33, %v3179_v25  ;;  %v3181_v37 = vrot.slane %v3179_v25, 4  ;;  %v4108_v3 = vcombine.low %v3187_v26, %v3190_v60  ;;  %s5583_s19 = scalar_lea.vmem %s5618_s2, %s4136_s14 }
  0xb0   : > { %4616 = vmatprep.mubr.bf16.mxu0 %v4102_v17  ;;  %v3197_v53 = vsel %vm5101_vm5, %v3195_v5, %v3196_v2 }
  0xb1   : > { %4647 = vmatpush3.bf16.msra.mxu1 %v5486_v14  ;;  %v3183_v47 = vsel %vm5101_vm5, %v3181_v37, %v3182_v28  ;;  %v4109_v7 = vcombine.low %v3194_v4, %v3197_v53 }
  0xb2   : > { %4615 = vmatpush3.bf16.msra.mxu0 %v5486_v14  ;;  %v4107_v49 = vcombine.low %v3180_v35, %v3183_v47  ;;  %v3162_v14 = vsel %vm5101_vm5, %v3160_v42, %v3161_v31 }
  0xb3   : > { %v4104_v55 = vcombine.low %v3159_v41, %v3162_v14 }
  0xb4   : > { %4625 = vmatmul.mubr.bf16.vlgmr.msra.gmra.mrb[16].mxu1 %v4107_v49 }
  0xb5   : > { %4628 = vmatprep.mubr.bf16.mxu1 %v4108_v3 }
  0xb7   : > { %4617 = vmatmul.mubr.bf16.vlgmr.msra.gmra.mrb[0].mxu0 %v4103_v46 }
  0xb8   : > { %4620 = vmatprep.mubr.bf16.mxu0 %v4104_v55 }
  0xbc   : > { %4629 = vmatmul.mubr.bf16.gmra.mrb[20].mxu1 %v4109_v7 }
  0xbf   : > { %4621 = vmatmul.mubr.bf16.gmra.mrb[4].mxu0 %v4105_v8 }
 0x167   : > { %v4458_v61 = vpop.f32.mrb[0].mxu1 }
 0x168   : > { %v1462_v0 = vpop.f32.mrb[1].mxu1 }
 0x169   : > { %v4459_v9 = vpop.f32.mrb[2].mxu1 }
 0x16a   : > { %v1465_v10 = vpop.f32.mrb[3].mxu1 }
 0x16f   : > { %v5565_v11 = vpop.f32.mrb[4].mxu1 }
 0x170   : > { %v5567_v12 = vpop.f32.mrb[5].mxu1 }
 0x171   : > { %v5569_v13 = vpop.f32.mrb[6].mxu1 }
 0x172   : > { %v5571_v16 = vpop.f32.mrb[7].mxu1 }
 0x177   : > { %v4466_v17 = vpop.f32.mrb[8].mxu1 }
 0x178   : > { %v1494_v18 = vpop.f32.mrb[9].mxu1 }
 0x179   : > { %v4467_v24 = vpop.f32.mrb[10].mxu1 }
 0x17a   : > { %v1497_v19 = vpop.f32.mrb[11].mxu1  ;;  %v4594_v21 = vpop.f32.mrb[8].mxu0 }
 0x17b   : > { %v4656_v23 = vadd.f32 %v4594_v21, %v4466_v17  ;;  %v3031_v25 = vpop.f32.mrb[9].mxu0 }
 0x17c   : > { %v4658_v15 = vadd.f32 %v3031_v25, %v1494_v18  ;;  %v4595_v28 = vpop.f32.mrb[10].mxu0 }
 0x17d   : > { %v4660_v29 = vadd.f32 %v4595_v28, %v4467_v24  ;;  %v3034_v30 = vpop.f32.mrb[11].mxu0 }
 0x17e   : > { %v4662_v31 = vadd.f32 %v3034_v30, %v1497_v19 }
 0x17f   : > { %v4470_v33 = vpop.f32.mrb[12].mxu1 }
 0x180   : > { %v1510_v20 = vpop.f32.mrb[13].mxu1 }
 0x181   : > { %v4471_v22 = vpop.f32.mrb[14].mxu1 }
 0x182   : > { %v1513_v27 = vpop.f32.mrb[15].mxu1  ;;  %v4598_v32 = vpop.f32.mrb[12].mxu0 }
 0x183   : > { %v4664_v34 = vadd.f32 %v4598_v32, %v4470_v33  ;;  %v3047_v35 = vpop.f32.mrb[13].mxu0 }
 0x184   : > { %v4666_v37 = vadd.f32 %v3047_v35, %v1510_v20  ;;  %v4599_v38 = vpop.f32.mrb[14].mxu0 }
 0x185   : > { %v4668_v39 = vadd.f32 %v4599_v38, %v4471_v22  ;;  %v3050_v40 = vpop.f32.mrb[15].mxu0 }
 0x186   : > { %v4670_v41 = vadd.f32 %v3050_v40, %v1513_v27 }
 0x187   : > { %v4626_v42 = vpop.f32.mrb[16].mxu1 }
 0x188   : > { %v5573_v43 = vadd.f32 %v4656_v23, %v4626_v42  ;;  %v3377_v44 = vpop.f32.mrb[17].mxu1 }
 0x189   : > { %v5576_v46 = vadd.f32 %v4658_v15, %v3377_v44  ;;  %v4627_v47 = vpop.f32.mrb[18].mxu1 }
 0x18a   : > { %v4618_v45 = vpop.f32.mrb[0].mxu0  ;;  %v5578_v1 = vadd.f32 %v4660_v29, %v4627_v47  ;;  %v3380_v49 = vpop.f32.mrb[19].mxu1  ;;  %v3567_v47 = vmul.f32 %v5573_v43, %v5573_v43 }
 0x18b   : > { %v4648_v48 = vadd.f32 %v4618_v45, %v4458_v61  ;;  %v3345_v36 = vpop.f32.mrb[1].mxu0  ;;  %v4663_v50 = vadd.f32 %v4662_v31, %v3380_v49 }
 0x18c   : > { %v4649_v14 = vadd.f32 %v3345_v36, %v1462_v0  ;;  %v4619_v26 = vpop.f32.mrb[2].mxu0  ;;  %v4181_v54 = vpack.c.bf16 %v5578_v1, %v5573_v43  ;;  %v3568_v49 = vmul.f32 %v5578_v1, %v5578_v1 }
 0x18d   : > { %v4650_v52 = vadd.f32 %v4619_v26, %v4459_v9  ;;  %v3348_v55 = vpop.f32.mrb[3].mxu0  ;;  %v4176_v57 = vpack.c.bf16 %v4663_v50, %v5576_v46  ;;  %v3559_v5 = vmul.f32 %v4648_v48, %v4648_v48  ;;  %v3566_v42 = vmul.f32 %v4663_v50, %v4663_v50 }
 0x18e   : > { %v4651_v56 = vadd.f32 %v3348_v55, %v1465_v10  ;;  %4197 = vst [vmem:[%s5583_s19 + $0x28] sm:$0xff] %v4181_v54   ;;  %v3557_v59 = vmul.f32 %v4649_v14, %v4649_v14 }
 0x18f   : > { %v4161_v58 = vpack.c.bf16 %v4650_v52, %v4648_v48  ;;  %4196 = vst [vmem:[%s5583_s19 + $0x20] sm:$0xff] %v4176_v57   ;;  %v4630_v2 = vpop.f32.mrb[20].mxu1  ;;  %v3560_v17 = vmul.f32 %v4650_v52, %v4650_v52 }
 0x190   : > { %v4156_v60 = vpack.c.bf16 %v4651_v56, %v4649_v14  ;;  %v3536_v62 = vadd.f32 %v4651_v56, %v4649_v14  ;;  %v3558_v63 = vmul.f32 %v4651_v56, %v4651_v56  ;;  %v4665_v3 = vadd.f32 %v4664_v34, %v4630_v2  ;;  %v3393_v4 = vpop.f32.mrb[21].mxu1 }
 0x191   : > { %4193 = vst [vmem:[%s5583_s19 + $0x8] sm:$0xff] %v4161_v58   ;;  %v4667_v7 = vadd.f32 %v4666_v37, %v3393_v4  ;;  %v4631_v8 = vpop.f32.mrb[22].mxu1 }
 0x192   : > { %4157 = vst [vmem:[%s5583_s19] sm:$0xff] %v4156_v60   ;;  %v3537_v51 = vadd.f32 %v4648_v48, %v3536_v62  ;;  %v3573_v6 = vadd.f32 %v3558_v63, %v3557_v59  ;;  %v4622_v53 = vpop.f32.mrb[4].mxu0  ;;  %v4669_v9 = vadd.f32 %v4668_v39, %v4631_v8  ;;  %v3396_v10 = vpop.f32.mrb[23].mxu1  ;;  %v3571_v58 = vmul.f32 %v4665_v3, %v4665_v3 }
 0x193   : > { %v4652_v61 = vadd.f32 %v4622_v53, %v5565_v11  ;;  %v3361_v0 = vpop.f32.mrb[5].mxu0  ;;  %v4671_v28 = vadd.f32 %v4670_v41, %v3396_v10 }
 0x194   : > { %v3574_v18 = vadd.f32 %v3573_v6, %v3559_v5  ;;  %v4653_v24 = vadd.f32 %v3361_v0, %v5567_v12  ;;  %v3538_v19 = vadd.f32 %v4650_v52, %v3537_v51  ;;  %v4623_v33 = vpop.f32.mrb[6].mxu0  ;;  %v4191_v21 = vpack.c.bf16 %v4669_v9, %v4665_v3 }
 0x195   : > { %v4654_v20 = vadd.f32 %v4623_v33, %v5569_v13  ;;  %v3364_v22 = vpop.f32.mrb[7].mxu0  ;;  %v4186_v32 = vpack.c.bf16 %v4671_v28, %v4667_v7  ;;  %v3563_v34 = vmul.f32 %v4652_v61, %v4652_v61  ;;  %v3569_v52 = vmul.f32 %v4667_v7, %v4667_v7 }
 0x196   : > { %v3539_v23 = vadd.f32 %v4653_v24, %v3538_v19  ;;  %v3561_v25 = vmul.f32 %v4653_v24, %v4653_v24  ;;  %v3575_v11 = vadd.f32 %v3574_v18, %v3560_v17  ;;  %v4655_v27 = vadd.f32 %v3364_v22, %v5571_v16  ;;  %4199 = vst [vmem:[%s5583_s19 + $0x38] sm:$0xff] %v4191_v21  }
 0x197   : > { %v4171_v15 = vpack.c.bf16 %v4654_v20, %v4652_v61  ;;  %4198 = vst [vmem:[%s5583_s19 + $0x30] sm:$0xff] %v4186_v32   ;;  %v3564_v37 = vmul.f32 %v4654_v20, %v4654_v20  ;;  %v3565_v16 = vmul.f32 %v5576_v46, %v5576_v46  ;;  %v3570_v56 = vmul.f32 %v4671_v28, %v4671_v28 }
 0x198   : > { %v3576_v29 = vadd.f32 %v3575_v11, %v3561_v25  ;;  %v4166_v30 = vpack.c.bf16 %v4655_v27, %v4653_v24  ;;  %v3540_v12 = vadd.f32 %v4655_v27, %v3539_v23  ;;  %v3562_v31 = vmul.f32 %v4655_v27, %v4655_v27 }
 0x199   : > { %4195 = vst [vmem:[%s5583_s19 + $0x18] sm:$0xff] %v4171_v15   ;;  %v3572_v60 = vmul.f32 %v4669_v9, %v4669_v9 }
 0x19a   : > { %4194 = vst [vmem:[%s5583_s19 + $0x10] sm:$0xff] %v4166_v30   ;;  %v3541_v13 = vadd.f32 %v4652_v61, %v3540_v12  ;;  %v3577_v35 = vadd.f32 %v3576_v29, %v3562_v31 }
 0x19c   : > { %v3542_v38 = vadd.f32 %v4654_v20, %v3541_v13  ;;  %v3578_v39 = vadd.f32 %v3577_v35, %v3563_v34 }
 0x19e   : > { %v3543_v40 = vadd.f32 %v5576_v46, %v3542_v38  ;;  %v3579_v41 = vadd.f32 %v3578_v39, %v3564_v37 }
 0x1a0   : > { %v3580_v44 = vadd.f32 %v3579_v41, %v3565_v16  ;;  %v3544_v45 = vadd.f32 %v4663_v50, %v3543_v40 }
 0x1a2   : > { %v3545_v48 = vadd.f32 %v5573_v43, %v3544_v45  ;;  %v3581_v36 = vadd.f32 %v3580_v44, %v3566_v42 }
 0x1a4   : > { %v3546_v14 = vadd.f32 %v5578_v1, %v3545_v48  ;;  %v3582_v26 = vadd.f32 %v3581_v36, %v3567_v47 }
 0x1a6   : > { %v3547_v54 = vadd.f32 %v4667_v7, %v3546_v14  ;;  %v3583_v55 = vadd.f32 %v3582_v26, %v3568_v49 }
 0x1a8   : > { %v3548_v46 = vadd.f32 %v4671_v28, %v3547_v54  ;;  %v3584_v57 = vadd.f32 %v3583_v55, %v3569_v52 }
 0x1aa   : > { %v3549_v50 = vadd.f32 %v4665_v3, %v3548_v46  ;;  %v3585_v59 = vadd.f32 %v3584_v57, %v3570_v56 }
 0x1ac   : > { %v3550_v62 = vadd.f32 %v4669_v9, %v3549_v50  ;;  %v3586_v43 = vadd.f32 %v3585_v59, %v3571_v58 }
 0x1ae   : > { %v3551_v63 = vrot.slane %v3550_v62, 4  ;;  %v3587_v2 = vadd.f32 %v3586_v43, %v3572_v60 }
 0x1b0   : > { %v3552_v4 = vadd.f32 %v3551_v63, %v3550_v62  ;;  %v3588_v5 = vrot.slane %v3587_v2, 4 }
 0x1b2   : > { %v3553_v51 = vrot.slane %v3552_v4, 2  ;;  %v3589_v1 = vadd.f32 %v3588_v5, %v3587_v2 }
 0x1b4   : > { %v3554_v6 = vadd.f32 %v3553_v51, %v3552_v4  ;;  %v3590_v53 = vrot.slane %v3589_v1, 2 }
 0x1b6   : > { %v3555_v7 = vrot.slane %v3554_v6, 1  ;;  %v3591_v8 = vadd.f32 %v3590_v53, %v3589_v1 }
 0x1b8   : > { %v3592_v61 = vrot.slane %v3591_v8, 1  ;;  %v3556_v0 = vadd.f32 %v3555_v7, %v3554_v6 }
 0x1ba   : > { %v3593_v10 = vadd.f32 %v3592_v61, %v3591_v8 }
 0x1bc   : > { %v3595_v3 = vsel %vm3594_vm6, %v3556_v0, %v3593_v10 }
 0x1bd   : > { %v3597_v9 = vsel %vm3596_vm7, %v3595_v3, 0.0 }
 0x1be   : > { %3598 = vst [vmem:[%s181_s23] sm:$0xff] %v3597_v9 }
 0x1bf PF: > { %s14_s12 = sadd.s32 1, %s4887_s12  }
 0x1c0   : > { %p11_p4 = scmp.ge.s32.totalorder %s14_s12, 6  }
 0x1c2   :  { %13 = sbr.rel (!%p11_p4) target bundleno = 1 (0x1), region = 80 }

</bundles_post_ra>
